<compile_context>
chip_gen: v5e
topology: v5e:2x2
jax: 0.10.0
libtpu: 0.0.40
codegen_flags: <defaults>
</compile_context>

<pallas_src>
import functools

import jax
import jax.numpy as jnp
from jax.experimental import pallas as pl
from jax.experimental.pallas import tpu as pltpu


_IMAGES_PER_STEP = 8   # images fused into one grid step (clamped to N)
_CHUNK = 256           # conv M-tile (rows) kept register-resident


# ---------------------------------------------------------------------------
# In-kernel building blocks (operate on VMEM refs / values)
# ---------------------------------------------------------------------------

def _conv3x3_fused(src_ref, dst_ref, w_ref, shift, m, wp):
    """3x3/pad=1 conv + (BN shift, ReLU) from a flattened zero-padded f32
    buffer.  BN scale is pre-folded into the bf16 weights.  Output row r of
    dst corresponds to source rows r + dh*wp + dw (dh, dw in 0..2).  The M
    dimension is processed in _CHUNK-row tiles so the f32 accumulator of the
    9 accumulated MXU dots stays in vregs."""
    cout = dst_ref.shape[-1]
    for c0 in range(0, m, _CHUNK):
        cm = min(_CHUNK, m - c0)
        acc = jnp.zeros((cm, cout), jnp.float32)
        for t in range(9):                              # 9 accumulated dots
            off = c0 + (t // 3) * wp + (t % 3)
            xs = src_ref[off:off + cm, :].astype(jnp.bfloat16)
            acc = acc + jnp.dot(xs, w_ref[t], preferred_element_type=jnp.float32)
        dst_ref[c0:c0 + cm, :] = jnp.maximum(acc + shift, 0.0)


def _maxpool2_into(q_ref, dst_ref, B, hs, ws, src_pitch, src_rowlen):
    """2x2, stride-2 max pool.  Source pixel (b, y, x) lives at flattened row
    b*src_pitch + y*src_rowlen + x of q_ref.  The pooled values are written
    into the interior of dst_ref, the next layer's stacked zero-padded buffer
    (row (b*(hs/2 + 2) + yo + 1)*(ws/2 + 2) + xo + 1)."""
    ho, wo = hs // 2, ws // 2
    wpo = wo + 2
    for b in range(B):
        for yo in range(ho):
            r0 = b * src_pitch + (2 * yo) * src_rowlen
            r1 = r0 + src_rowlen
            a00 = q_ref[pl.ds(r0, wo, stride=2), :]
            a01 = q_ref[pl.ds(r0 + 1, wo, stride=2), :]
            a10 = q_ref[pl.ds(r1, wo, stride=2), :]
            a11 = q_ref[pl.ds(r1 + 1, wo, stride=2), :]
            pooled = jnp.maximum(jnp.maximum(a00, a01), jnp.maximum(a10, a11))
            d0 = (b * (ho + 2) + yo + 1) * wpo + 1
            dst_ref[d0:d0 + wo, :] = pooled


# ---------------------------------------------------------------------------
# Fused whole-network kernel (one grid step == B images)
# ---------------------------------------------------------------------------

def _convnet_kernel(x_ref, w1_ref, w2_ref, w3_ref, w4_ref, sh_ref, o_ref,
                    q1, p2, q2, p3, q3, p4, *, B, H, W):
    c4 = o_ref.shape[-1]
    H2, W2 = H // 2, W // 2
    H3, W3 = H2 // 2, W2 // 2
    H4, W4 = H3 // 2, W3 // 2
    Wp2, Wp3, Wp4 = W2 + 2, W3 + 2, W4 + 2

    # Pad rows/cols of the stacked inter-layer buffers must be zero; interiors
    # are fully rewritten below.  One memset per B-image step (not per image,
    # and not only at program_id==0: scratch is per-core under megacore
    # "parallel" partitioning, so step-0-only init would leave one core's
    # borders uninitialised).
    p2[...] = jnp.zeros_like(p2)
    p3[...] = jnp.zeros_like(p3)
    p4[...] = jnp.zeros_like(p4)

    # ---- layer 1: im2col'd input, single K=9*Cin dot per row tile ----------
    m1 = B * H * W
    sh1 = sh_ref[0:1, :]
    w1 = w1_ref[...]
    for c0 in range(0, m1, _CHUNK):
        cm = min(_CHUNK, m1 - c0)
        acc = jnp.dot(x_ref[c0:c0 + cm, :], w1,
                      preferred_element_type=jnp.float32)
        q1[c0:c0 + cm, :] = jnp.maximum(acc + sh1, 0.0)
    _maxpool2_into(q1, p2, B, H, W, src_pitch=H * W, src_rowlen=W)

    # ---- layer 2 ------------------------------------------------------------
    m2 = (B * (H2 + 2) - 2) * Wp2
    _conv3x3_fused(p2, q2, w2_ref, sh_ref[1:2, :], m2, Wp2)
    _maxpool2_into(q2, p3, B, H2, W2, src_pitch=(H2 + 2) * Wp2, src_rowlen=Wp2)

    # ---- layer 3 ------------------------------------------------------------
    m3 = (B * (H3 + 2) - 2) * Wp3
    _conv3x3_fused(p3, q3, w3_ref, sh_ref[2:3, :], m3, Wp3)
    _maxpool2_into(q3, p4, B, H3, W3, src_pitch=(H3 + 2) * Wp3, src_rowlen=Wp3)

    # ---- layer 4 + AdaptiveAvgPool2d(1), fused per image --------------------
    # Only the H4*Wp4 rows of each image are computed (no junk pad-row work),
    # and the mean is a masked sublane reduction instead of an MXU dot.
    n4 = H4 * Wp4
    col = jax.lax.broadcasted_iota(jnp.int32, (n4, 1), 0)
    mask = ((col % Wp4) < W4).astype(jnp.float32)       # drop junk pad columns
    inv = 1.0 / float(H4 * W4)
    sh4 = sh_ref[3:4, :]
    for b in range(B):
        c0 = b * (H4 + 2) * Wp4
        acc = jnp.zeros((n4, c4), jnp.float32)
        for t in range(9):
            off = c0 + (t // 3) * Wp4 + (t % 3)
            xs = p4[off:off + n4, :].astype(jnp.bfloat16)
            acc = acc + jnp.dot(xs, w4_ref[t], preferred_element_type=jnp.float32)
        y = jnp.maximum(acc + sh4, 0.0) * mask
        o_ref[b:b + 1, :] = jnp.sum(y, axis=0, keepdims=True) * inv


# ---------------------------------------------------------------------------
# Wrapper: layout glue + pallas_call setup
# ---------------------------------------------------------------------------

@jax.jit
def convnet_forward(x_nchw, params):
    # PyTorch NCHW -> NHWC; channels stay on the lane (last) dim in-kernel.
    x = jnp.transpose(x_nchw, (0, 2, 3, 1)).astype(jnp.float32)
    N, H, W, Cin = x.shape
    assert H % 8 == 0 and W % 8 == 0, "three 2x2 pools need H, W % 8 == 0"

    ws = [params[f"w{i}"] for i in range(4)]
    C = tuple(w.shape[-1] for w in ws)                  # (64, 64, 64, 64)
    assert len(set(C)) == 1, "stacked BN params assume equal out-channels"
    assert ws[0].shape[2] == Cin
    c1, c2, c3, c4 = C

    # ---- per-step image batch (amortises grid-step overhead / memsets) -----
    B = _IMAGES_PER_STEP if N >= _IMAGES_PER_STEP else N
    G = -(-N // B)                                      # grid length
    NB = G * B
    if NB != N:
        x = jnp.pad(x, ((0, NB - N), (0, 0), (0, 0), (0, 0)))

    # ---- wrapper-side im2col for layer 1: (NB*H*W, 9*Cin -> KP) bf16 --------
    K1 = 9 * Cin
    KP = -(-K1 // 8) * 8                                # 27 -> 32
    xp = jnp.pad(x, ((0, 0), (1, 1), (1, 1), (0, 0)))
    patches = jnp.concatenate(
        [xp[:, dh:dh + H, dw:dw + W, :] for dh in range(3) for dw in range(3)],
        axis=-1)                                        # (NB, H, W, 27)
    patches = jnp.pad(patches, ((0, 0), (0, 0), (0, 0), (0, KP - K1)))
    patches = patches.reshape(NB * H * W, KP).astype(jnp.bfloat16)

    # ---- weights: fold BN scale in, bf16; keep shift for the epilogue -------
    scales = [params[f"scale{i}"].astype(jnp.float32) for i in range(4)]
    shifts = jnp.stack([params[f"shift{i}"] for i in range(4)]).astype(jnp.float32)
    w1 = (ws[0].astype(jnp.float32) * scales[0]).reshape(K1, c1)
    w1 = jnp.pad(w1, ((0, KP - K1), (0, 0))).astype(jnp.bfloat16)
    w2 = (ws[1].astype(jnp.float32) * scales[1]).reshape(9, c1, c2).astype(jnp.bfloat16)
    w3 = (ws[2].astype(jnp.float32) * scales[2]).reshape(9, c2, c3).astype(jnp.bfloat16)
    w4 = (ws[3].astype(jnp.float32) * scales[3]).reshape(9, c3, c4).astype(jnp.bfloat16)

    # ---- stacked-buffer geometry (B images separated by their pad rows) -----
    H2, W2 = H // 2, W // 2
    H3, W3 = H2 // 2, W2 // 2
    H4, W4 = H3 // 2, W3 // 2
    Wp2, Wp3, Wp4 = W2 + 2, W3 + 2, W4 + 2
    PR2, m2 = (B * (H2 + 2) + 1) * Wp2, (B * (H2 + 2) - 2) * Wp2
    PR3, m3 = (B * (H3 + 2) + 1) * Wp3, (B * (H3 + 2) - 2) * Wp3
    PR4 = (B * (H4 + 2) + 1) * Wp4

    scratch_bytes = 4 * (B * H * W * c1 + PR2 * c1 + m2 * c2
                         + PR3 * c2 + m3 * c3 + PR4 * c3)
    # 32 MiB is safe on v5e/v6e/v7x and above v5e's 16 MiB default; scale up
    # (capped at v7x's 64 MiB physical VMEM) if the scratch ever grows.
    vmem_limit = int(min(max(32 * 2 ** 20, 2 * scratch_bytes + 8 * 2 ** 20),
                         64 * 2 ** 20))

    kernel = functools.partial(_convnet_kernel, B=B, H=H, W=W)

    out = pl.pallas_call(
        kernel,
        out_shape=jax.ShapeDtypeStruct((NB, c4), jnp.float32),
        grid=(G,),
        in_specs=[
            pl.BlockSpec((B * H * W, KP), lambda g: (g, 0)),    # im2col patches
            pl.BlockSpec((KP, c1), lambda g: (0, 0)),           # w1 (scale-folded)
            pl.BlockSpec((9, c1, c2), lambda g: (0, 0, 0)),     # w2
            pl.BlockSpec((9, c2, c3), lambda g: (0, 0, 0)),     # w3
            pl.BlockSpec((9, c3, c4), lambda g: (0, 0, 0)),     # w4
            pl.BlockSpec((4, c4), lambda g: (0, 0)),            # BN shifts
        ],
        out_specs=pl.BlockSpec((B, c4), lambda g: (g, 0)),
        scratch_shapes=[
            pltpu.VMEM((B * H * W, c1), jnp.float32),           # q1: conv1 out (dense)
            pltpu.VMEM((PR2, c1), jnp.float32),                 # p2: padded in2
            pltpu.VMEM((m2, c2), jnp.float32),                  # q2: conv2 out
            pltpu.VMEM((PR3, c2), jnp.float32),                 # p3: padded in3
            pltpu.VMEM((m3, c3), jnp.float32),                  # q3: conv3 out
            pltpu.VMEM((PR4, c3), jnp.float32),                 # p4: padded in4
        ],
        compiler_params=pltpu.CompilerParams(
            dimension_semantics=("parallel",),                  # v7x: 2 TCs share grid
            vmem_limit_bytes=vmem_limit),
    )(patches, w1, w2, w3, w4, shifts)

    # AdaptiveAvgPool2d(1) + flatten == (N, 64) features (num_classes == -1).
    return out[:N]


# ---------------------------------------------------------------------------
# Parameter init (deterministic; matches module shapes & init scheme)
# ---------------------------------------------------------------------------

def init_params(key, out_channel=(64, 64, 64, 64), in_channels=3):
    params = {}
    eps = 1e-5
    cin = in_channels
    keys = jax.random.split(key, len(out_channel))
    for i, cout in enumerate(out_channel):
        # kaiming_normal_(mode='fan_out', nonlinearity='relu'): std=sqrt(2/fan_out)
        fan_out = 3 * 3 * cout
        std = (2.0 / fan_out) ** 0.5
        w = std * jax.random.normal(keys[i], (3, 3, cin, cout), jnp.float32)  # HWIO
        bias = jnp.zeros((cout,), jnp.float32)       # deterministic conv bias
        # BatchNorm: gamma=1, beta=0; eval-mode running stats mean=0, var=1.
        # TODO(synk): training-mode BN (per-batch statistics) not implemented.
        gamma = jnp.ones((cout,), jnp.float32)
        beta = jnp.zeros((cout,), jnp.float32)
        running_mean = jnp.zeros((cout,), jnp.float32)
        running_var = jnp.ones((cout,), jnp.float32)
        scale = gamma / jnp.sqrt(running_var + eps)
        shift = beta + (bias - running_mean) * scale
        params[f"w{i}"] = w
        params[f"scale{i}"] = scale
        params[f"shift{i}"] = shift
        cin = cout
    return params


# TODO(synk): classifier / rot_classifier heads and the is_feat/rot output
# branches are not implemented (inactive for the default num_classes=-1 path).

if __name__ == "__main__":
    key = jax.random.PRNGKey(0)
    kx, kp = jax.random.split(key)
    x = jax.random.normal(kx, (2, 3, 16, 16), jnp.float32)   # NCHW like PyTorch
    params = init_params(kp)

    out = convnet_forward(x, params)
    out = jax.block_until_ready(out)

    assert out.shape == (2, 64), out.shape
    assert bool(jnp.all(jnp.isfinite(out)))
    print("KERNEL_OK")
</pallas_src>

<mosaic_0001>
module attributes {stable_mosaic.version = 11 : i64} {
  func.func @_convnet_kernel(%arg0: i32, %arg1: memref<512x32xbf16, #tpu.memory_space<vmem>>, %arg2: memref<32x64xbf16, #tpu.memory_space<vmem>>, %arg3: memref<9x64x64xbf16, #tpu.memory_space<vmem>>, %arg4: memref<9x64x64xbf16, #tpu.memory_space<vmem>>, %arg5: memref<9x64x64xbf16, #tpu.memory_space<vmem>>, %arg6: memref<4x64xf32, #tpu.memory_space<vmem>>, %arg7: memref<2x64xf32, #tpu.memory_space<vmem>>, %arg8: memref<512x64xf32, #tpu.memory_space<vmem>>, %arg9: memref<210x64xf32, #tpu.memory_space<vmem>>, %arg10: memref<180x64xf32, #tpu.memory_space<vmem>>, %arg11: memref<78x64xf32, #tpu.memory_space<vmem>>, %arg12: memref<60x64xf32, #tpu.memory_space<vmem>>, %arg13: memref<36x64xf32, #tpu.memory_space<vmem>>) attributes {dimension_semantics = [#tpu.dimension_semantics<parallel>], iteration_bounds = array<i64: 1>, scalar_prefetch = 0 : i64, scratch_operands = 6 : i64, tpu.core_type = #tpu.core_type<tc>, window_params = [{transform_indices = @transform_0, window_bounds = array<i64: 512, 32>}, {pipeline_mode = #tpu.pipeline_mode<synchronous>, transform_indices = @transform_1, window_bounds = array<i64: 32, 64>}, {pipeline_mode = #tpu.pipeline_mode<synchronous>, transform_indices = @transform_2, window_bounds = array<i64: 9, 64, 64>}, {pipeline_mode = #tpu.pipeline_mode<synchronous>, transform_indices = @transform_3, window_bounds = array<i64: 9, 64, 64>}, {pipeline_mode = #tpu.pipeline_mode<synchronous>, transform_indices = @transform_4, window_bounds = array<i64: 9, 64, 64>}, {pipeline_mode = #tpu.pipeline_mode<synchronous>, transform_indices = @transform_5, window_bounds = array<i64: 4, 64>}, {transform_indices = @transform_6, window_bounds = array<i64: 2, 64>}]} {
    %cst = arith.constant 0.000000e+00 : f32
    %0 = vector.broadcast %cst : f32 to vector<210x64xf32>
    %c0 = arith.constant 0 : index
    %c0_0 = arith.constant 0 : index
    %1 = vector.load %arg9[%c0, %c0_0] : memref<210x64xf32, #tpu.memory_space<vmem>>, vector<210x64xf32>
    tpu.vector_store %arg9[%c0, %c0_0], %0 {strides = array<i32>} : memref<210x64xf32, #tpu.memory_space<vmem>>, vector<210x64xf32>,
    %cst_1 = arith.constant 0.000000e+00 : f32
    %2 = vector.broadcast %cst_1 : f32 to vector<78x64xf32>
    %c0_2 = arith.constant 0 : index
    %c0_3 = arith.constant 0 : index
    %3 = vector.load %arg11[%c0_2, %c0_3] : memref<78x64xf32, #tpu.memory_space<vmem>>, vector<78x64xf32>
    tpu.vector_store %arg11[%c0_2, %c0_3], %2 {strides = array<i32>} : memref<78x64xf32, #tpu.memory_space<vmem>>, vector<78x64xf32>,
    %cst_4 = arith.constant 0.000000e+00 : f32
    %4 = vector.broadcast %cst_4 : f32 to vector<36x64xf32>
    %c0_5 = arith.constant 0 : index
    %c0_6 = arith.constant 0 : index
    %5 = vector.load %arg13[%c0_5, %c0_6] : memref<36x64xf32, #tpu.memory_space<vmem>>, vector<36x64xf32>
    tpu.vector_store %arg13[%c0_5, %c0_6], %4 {strides = array<i32>} : memref<36x64xf32, #tpu.memory_space<vmem>>, vector<36x64xf32>,
    %c0_7 = arith.constant 0 : index
    %c0_8 = arith.constant 0 : index
    %6 = vector.load %arg6[%c0_7, %c0_8] : memref<4x64xf32, #tpu.memory_space<vmem>>, vector<1x64xf32>
    %c0_9 = arith.constant 0 : index
    %c0_10 = arith.constant 0 : index
    %7 = vector.load %arg2[%c0_9, %c0_10] : memref<32x64xbf16, #tpu.memory_space<vmem>>, vector<32x64xbf16>
    %c0_11 = arith.constant 0 : index
    %c0_12 = arith.constant 0 : index
    %8 = vector.load %arg1[%c0_11, %c0_12] : memref<512x32xbf16, #tpu.memory_space<vmem>>, vector<256x32xbf16>
    %cst_13 = arith.constant dense<0.000000e+00> : vector<256x64xf32>
    %9 = tpu.matmul %8, %7, %cst_13 {dimension_numbers = #tpu.dot_dimension_numbers<[1], [0], [0], [1], [0, 0, 1, 1], [], []>} : vector<256x32xbf16>, vector<32x64xbf16>, vector<256x64xf32> -> vector<256x64xf32>
    %10 = vector.broadcast %6 : vector<1x64xf32> to vector<256x64xf32>
    %11 = arith.addf %9, %10 : vector<256x64xf32>
    %cst_14 = arith.constant 0.000000e+00 : f32
    %12 = vector.broadcast %cst_14 : f32 to vector<256x64xf32>
    %13 = arith.maximumf %11, %12 : vector<256x64xf32>
    %c0_15 = arith.constant 0 : index
    %c0_16 = arith.constant 0 : index
    %14 = vector.load %arg8[%c0_15, %c0_16] : memref<512x64xf32, #tpu.memory_space<vmem>>, vector<256x64xf32>
    tpu.vector_store %arg8[%c0_15, %c0_16], %13 {strides = array<i32>} : memref<512x64xf32, #tpu.memory_space<vmem>>, vector<256x64xf32>,
    %c256 = arith.constant 256 : index
    %c0_17 = arith.constant 0 : index
    %15 = vector.load %arg1[%c256, %c0_17] : memref<512x32xbf16, #tpu.memory_space<vmem>>, vector<256x32xbf16>
    %cst_18 = arith.constant dense<0.000000e+00> : vector<256x64xf32>
    %16 = tpu.matmul %15, %7, %cst_18 {dimension_numbers = #tpu.dot_dimension_numbers<[1], [0], [0], [1], [0, 0, 1, 1], [], []>} : vector<256x32xbf16>, vector<32x64xbf16>, vector<256x64xf32> -> vector<256x64xf32>
    %17 = vector.broadcast %6 : vector<1x64xf32> to vector<256x64xf32>
    %18 = arith.addf %16, %17 : vector<256x64xf32>
    %cst_19 = arith.constant 0.000000e+00 : f32
    %19 = vector.broadcast %cst_19 : f32 to vector<256x64xf32>
    %20 = arith.maximumf %18, %19 : vector<256x64xf32>
    %c256_20 = arith.constant 256 : index
    %c0_21 = arith.constant 0 : index
    %21 = vector.load %arg8[%c256_20, %c0_21] : memref<512x64xf32, #tpu.memory_space<vmem>>, vector<256x64xf32>
    tpu.vector_store %arg8[%c256_20, %c0_21], %20 {strides = array<i32>} : memref<512x64xf32, #tpu.memory_space<vmem>>, vector<256x64xf32>,
    %c0_22 = arith.constant 0 : index
    %c0_23 = arith.constant 0 : index
    %22 = tpu.strided_load %arg8[%c0_22, %c0_23] {strides = array<i32: 2, 1>} : memref<512x64xf32, #tpu.memory_space<vmem>>, vector<8x64xf32>
    %c1 = arith.constant 1 : index
    %c0_24 = arith.constant 0 : index
    %23 = tpu.strided_load %arg8[%c1, %c0_24] {strides = array<i32: 2, 1>} : memref<512x64xf32, #tpu.memory_space<vmem>>, vector<8x64xf32>
    %c16 = arith.constant 16 : index
    %c0_25 = arith.constant 0 : index
    %24 = tpu.strided_load %arg8[%c16, %c0_25] {strides = array<i32: 2, 1>} : memref<512x64xf32, #tpu.memory_space<vmem>>, vector<8x64xf32>
    %c17 = arith.constant 17 : index
    %c0_26 = arith.constant 0 : index
    %25 = tpu.strided_load %arg8[%c17, %c0_26] {strides = array<i32: 2, 1>} : memref<512x64xf32, #tpu.memory_space<vmem>>, vector<8x64xf32>
    %26 = arith.maximumf %22, %23 : vector<8x64xf32>
    %27 = arith.maximumf %24, %25 : vector<8x64xf32>
    %28 = arith.maximumf %26, %27 : vector<8x64xf32>
    %c11 = arith.constant 11 : index
    %c0_27 = arith.constant 0 : index
    %29 = vector.load %arg9[%c11, %c0_27] : memref<210x64xf32, #tpu.memory_space<vmem>>, vector<8x64xf32>
    tpu.vector_store %arg9[%c11, %c0_27], %28 {strides = array<i32>} : memref<210x64xf32, #tpu.memory_space<vmem>>, vector<8x64xf32>,
    %c32 = arith.constant 32 : index
    %c0_28 = arith.constant 0 : index
    %30 = tpu.strided_load %arg8[%c32, %c0_28] {strides = array<i32: 2, 1>} : memref<512x64xf32, #tpu.memory_space<vmem>>, vector<8x64xf32>
    %c33 = arith.constant 33 : index
    %c0_29 = arith.constant 0 : index
    %31 = tpu.strided_load %arg8[%c33, %c0_29] {strides = array<i32: 2, 1>} : memref<512x64xf32, #tpu.memory_space<vmem>>, vector<8x64xf32>
    %c48 = arith.constant 48 : index
    %c0_30 = arith.constant 0 : index
    %32 = tpu.strided_load %arg8[%c48, %c0_30] {strides = array<i32: 2, 1>} : memref<512x64xf32, #tpu.memory_space<vmem>>, vector<8x64xf32>
    %c49 = arith.constant 49 : index
    %c0_31 = arith.constant 0 : index
    %33 = tpu.strided_load %arg8[%c49, %c0_31] {strides = array<i32: 2, 1>} : memref<512x64xf32, #tpu.memory_space<vmem>>, vector<8x64xf32>
    %34 = arith.maximumf %30, %31 : vector<8x64xf32>
    %35 = arith.maximumf %32, %33 : vector<8x64xf32>
    %36 = arith.maximumf %34, %35 : vector<8x64xf32>
    %c21 = arith.constant 21 : index
    %c0_32 = arith.constant 0 : index
    %37 = vector.load %arg9[%c21, %c0_32] : memref<210x64xf32, #tpu.memory_space<vmem>>, vector<8x64xf32>
    tpu.vector_store %arg9[%c21, %c0_32], %36 {strides = array<i32>} : memref<210x64xf32, #tpu.memory_space<vmem>>, vector<8x64xf32>,
    %c64 = arith.constant 64 : index
    %c0_33 = arith.constant 0 : index
    %38 = tpu.strided_load %arg8[%c64, %c0_33] {strides = array<i32: 2, 1>} : memref<512x64xf32, #tpu.memory_space<vmem>>, vector<8x64xf32>
    %c65 = arith.constant 65 : index
    %c0_34 = arith.constant 0 : index
    %39 = tpu.strided_load %arg8[%c65, %c0_34] {strides = array<i32: 2, 1>} : memref<512x64xf32, #tpu.memory_space<vmem>>, vector<8x64xf32>
    %c80 = arith.constant 80 : index
    %c0_35 = arith.constant 0 : index
    %40 = tpu.strided_load %arg8[%c80, %c0_35] {strides = array<i32: 2, 1>} : memref<512x64xf32, #tpu.memory_space<vmem>>, vector<8x64xf32>
    %c81 = arith.constant 81 : index
    %c0_36 = arith.constant 0 : index
    %41 = tpu.strided_load %arg8[%c81, %c0_36] {strides = array<i32: 2, 1>} : memref<512x64xf32, #tpu.memory_space<vmem>>, vector<8x64xf32>
    %42 = arith.maximumf %38, %39 : vector<8x64xf32>
    %43 = arith.maximumf %40, %41 : vector<8x64xf32>
    %44 = arith.maximumf %42, %43 : vector<8x64xf32>
    %c31 = arith.constant 31 : index
    %c0_37 = arith.constant 0 : index
    %45 = vector.load %arg9[%c31, %c0_37] : memref<210x64xf32, #tpu.memory_space<vmem>>, vector<8x64xf32>
    tpu.vector_store %arg9[%c31, %c0_37], %44 {strides = array<i32>} : memref<210x64xf32, #tpu.memory_space<vmem>>, vector<8x64xf32>,
    %c96 = arith.constant 96 : index
    %c0_38 = arith.constant 0 : index
    %46 = tpu.strided_load %arg8[%c96, %c0_38] {strides = array<i32: 2, 1>} : memref<512x64xf32, #tpu.memory_space<vmem>>, vector<8x64xf32>
    %c97 = arith.constant 97 : index
    %c0_39 = arith.constant 0 : index
    %47 = tpu.strided_load %arg8[%c97, %c0_39] {strides = array<i32: 2, 1>} : memref<512x64xf32, #tpu.memory_space<vmem>>, vector<8x64xf32>
    %c112 = arith.constant 112 : index
    %c0_40 = arith.constant 0 : index
    %48 = tpu.strided_load %arg8[%c112, %c0_40] {strides = array<i32: 2, 1>} : memref<512x64xf32, #tpu.memory_space<vmem>>, vector<8x64xf32>
    %c113 = arith.constant 113 : index
    %c0_41 = arith.constant 0 : index
    %49 = tpu.strided_load %arg8[%c113, %c0_41] {strides = array<i32: 2, 1>} : memref<512x64xf32, #tpu.memory_space<vmem>>, vector<8x64xf32>
    %50 = arith.maximumf %46, %47 : vector<8x64xf32>
    %51 = arith.maximumf %48, %49 : vector<8x64xf32>
    %52 = arith.maximumf %50, %51 : vector<8x64xf32>
    %c41 = arith.constant 41 : index
    %c0_42 = arith.constant 0 : index
    %53 = vector.load %arg9[%c41, %c0_42] : memref<210x64xf32, #tpu.memory_space<vmem>>, vector<8x64xf32>
    tpu.vector_store %arg9[%c41, %c0_42], %52 {strides = array<i32>} : memref<210x64xf32, #tpu.memory_space<vmem>>, vector<8x64xf32>,
    %c128 = arith.constant 128 : index
    %c0_43 = arith.constant 0 : index
    %54 = tpu.strided_load %arg8[%c128, %c0_43] {strides = array<i32: 2, 1>} : memref<512x64xf32, #tpu.memory_space<vmem>>, vector<8x64xf32>
    %c129 = arith.constant 129 : index
    %c0_44 = arith.constant 0 : index
    %55 = tpu.strided_load %arg8[%c129, %c0_44] {strides = array<i32: 2, 1>} : memref<512x64xf32, #tpu.memory_space<vmem>>, vector<8x64xf32>
    %c144 = arith.constant 144 : index
    %c0_45 = arith.constant 0 : index
    %56 = tpu.strided_load %arg8[%c144, %c0_45] {strides = array<i32: 2, 1>} : memref<512x64xf32, #tpu.memory_space<vmem>>, vector<8x64xf32>
    %c145 = arith.constant 145 : index
    %c0_46 = arith.constant 0 : index
    %57 = tpu.strided_load %arg8[%c145, %c0_46] {strides = array<i32: 2, 1>} : memref<512x64xf32, #tpu.memory_space<vmem>>, vector<8x64xf32>
    %58 = arith.maximumf %54, %55 : vector<8x64xf32>
    %59 = arith.maximumf %56, %57 : vector<8x64xf32>
    %60 = arith.maximumf %58, %59 : vector<8x64xf32>
    %c51 = arith.constant 51 : index
    %c0_47 = arith.constant 0 : index
    %61 = vector.load %arg9[%c51, %c0_47] : memref<210x64xf32, #tpu.memory_space<vmem>>, vector<8x64xf32>
    tpu.vector_store %arg9[%c51, %c0_47], %60 {strides = array<i32>} : memref<210x64xf32, #tpu.memory_space<vmem>>, vector<8x64xf32>,
    %c160 = arith.constant 160 : index
    %c0_48 = arith.constant 0 : index
    %62 = tpu.strided_load %arg8[%c160, %c0_48] {strides = array<i32: 2, 1>} : memref<512x64xf32, #tpu.memory_space<vmem>>, vector<8x64xf32>
    %c161 = arith.constant 161 : index
    %c0_49 = arith.constant 0 : index
    %63 = tpu.strided_load %arg8[%c161, %c0_49] {strides = array<i32: 2, 1>} : memref<512x64xf32, #tpu.memory_space<vmem>>, vector<8x64xf32>
    %c176 = arith.constant 176 : index
    %c0_50 = arith.constant 0 : index
    %64 = tpu.strided_load %arg8[%c176, %c0_50] {strides = array<i32: 2, 1>} : memref<512x64xf32, #tpu.memory_space<vmem>>, vector<8x64xf32>
    %c177 = arith.constant 177 : index
    %c0_51 = arith.constant 0 : index
    %65 = tpu.strided_load %arg8[%c177, %c0_51] {strides = array<i32: 2, 1>} : memref<512x64xf32, #tpu.memory_space<vmem>>, vector<8x64xf32>
    %66 = arith.maximumf %62, %63 : vector<8x64xf32>
    %67 = arith.maximumf %64, %65 : vector<8x64xf32>
    %68 = arith.maximumf %66, %67 : vector<8x64xf32>
    %c61 = arith.constant 61 : index
    %c0_52 = arith.constant 0 : index
    %69 = vector.load %arg9[%c61, %c0_52] : memref<210x64xf32, #tpu.memory_space<vmem>>, vector<8x64xf32>
    tpu.vector_store %arg9[%c61, %c0_52], %68 {strides = array<i32>} : memref<210x64xf32, #tpu.memory_space<vmem>>, vector<8x64xf32>,
    %c192 = arith.constant 192 : index
    %c0_53 = arith.constant 0 : index
    %70 = tpu.strided_load %arg8[%c192, %c0_53] {strides = array<i32: 2, 1>} : memref<512x64xf32, #tpu.memory_space<vmem>>, vector<8x64xf32>
    %c193 = arith.constant 193 : index
    %c0_54 = arith.constant 0 : index
    %71 = tpu.strided_load %arg8[%c193, %c0_54] {strides = array<i32: 2, 1>} : memref<512x64xf32, #tpu.memory_space<vmem>>, vector<8x64xf32>
    %c208 = arith.constant 208 : index
    %c0_55 = arith.constant 0 : index
    %72 = tpu.strided_load %arg8[%c208, %c0_55] {strides = array<i32: 2, 1>} : memref<512x64xf32, #tpu.memory_space<vmem>>, vector<8x64xf32>
    %c209 = arith.constant 209 : index
    %c0_56 = arith.constant 0 : index
    %73 = tpu.strided_load %arg8[%c209, %c0_56] {strides = array<i32: 2, 1>} : memref<512x64xf32, #tpu.memory_space<vmem>>, vector<8x64xf32>
    %74 = arith.maximumf %70, %71 : vector<8x64xf32>
    %75 = arith.maximumf %72, %73 : vector<8x64xf32>
    %76 = arith.maximumf %74, %75 : vector<8x64xf32>
    %c71 = arith.constant 71 : index
    %c0_57 = arith.constant 0 : index
    %77 = vector.load %arg9[%c71, %c0_57] : memref<210x64xf32, #tpu.memory_space<vmem>>, vector<8x64xf32>
    tpu.vector_store %arg9[%c71, %c0_57], %76 {strides = array<i32>} : memref<210x64xf32, #tpu.memory_space<vmem>>, vector<8x64xf32>,
    %c224 = arith.constant 224 : index
    %c0_58 = arith.constant 0 : index
    %78 = tpu.strided_load %arg8[%c224, %c0_58] {strides = array<i32: 2, 1>} : memref<512x64xf32, #tpu.memory_space<vmem>>, vector<8x64xf32>
    %c225 = arith.constant 225 : index
    %c0_59 = arith.constant 0 : index
    %79 = tpu.strided_load %arg8[%c225, %c0_59] {strides = array<i32: 2, 1>} : memref<512x64xf32, #tpu.memory_space<vmem>>, vector<8x64xf32>
    %c240 = arith.constant 240 : index
    %c0_60 = arith.constant 0 : index
    %80 = tpu.strided_load %arg8[%c240, %c0_60] {strides = array<i32: 2, 1>} : memref<512x64xf32, #tpu.memory_space<vmem>>, vector<8x64xf32>
    %c241 = arith.constant 241 : index
    %c0_61 = arith.constant 0 : index
    %81 = tpu.strided_load %arg8[%c241, %c0_61] {strides = array<i32: 2, 1>} : memref<512x64xf32, #tpu.memory_space<vmem>>, vector<8x64xf32>
    %82 = arith.maximumf %78, %79 : vector<8x64xf32>
    %83 = arith.maximumf %80, %81 : vector<8x64xf32>
    %84 = arith.maximumf %82, %83 : vector<8x64xf32>
    %c81_62 = arith.constant 81 : index
    %c0_63 = arith.constant 0 : index
    %85 = vector.load %arg9[%c81_62, %c0_63] : memref<210x64xf32, #tpu.memory_space<vmem>>, vector<8x64xf32>
    tpu.vector_store %arg9[%c81_62, %c0_63], %84 {strides = array<i32>} : memref<210x64xf32, #tpu.memory_space<vmem>>, vector<8x64xf32>,
    %c256_64 = arith.constant 256 : index
    %c0_65 = arith.constant 0 : index
    %86 = tpu.strided_load %arg8[%c256_64, %c0_65] {strides = array<i32: 2, 1>} : memref<512x64xf32, #tpu.memory_space<vmem>>, vector<8x64xf32>
    %c257 = arith.constant 257 : index
    %c0_66 = arith.constant 0 : index
    %87 = tpu.strided_load %arg8[%c257, %c0_66] {strides = array<i32: 2, 1>} : memref<512x64xf32, #tpu.memory_space<vmem>>, vector<8x64xf32>
    %c272 = arith.constant 272 : index
    %c0_67 = arith.constant 0 : index
    %88 = tpu.strided_load %arg8[%c272, %c0_67] {strides = array<i32: 2, 1>} : memref<512x64xf32, #tpu.memory_space<vmem>>, vector<8x64xf32>
    %c273 = arith.constant 273 : index
    %c0_68 = arith.constant 0 : index
    %89 = tpu.strided_load %arg8[%c273, %c0_68] {strides = array<i32: 2, 1>} : memref<512x64xf32, #tpu.memory_space<vmem>>, vector<8x64xf32>
    %90 = arith.maximumf %86, %87 : vector<8x64xf32>
    %91 = arith.maximumf %88, %89 : vector<8x64xf32>
    %92 = arith.maximumf %90, %91 : vector<8x64xf32>
    %c111 = arith.constant 111 : index
    %c0_69 = arith.constant 0 : index
    %93 = vector.load %arg9[%c111, %c0_69] : memref<210x64xf32, #tpu.memory_space<vmem>>, vector<8x64xf32>
    tpu.vector_store %arg9[%c111, %c0_69], %92 {strides = array<i32>} : memref<210x64xf32, #tpu.memory_space<vmem>>, vector<8x64xf32>,
    %c288 = arith.constant 288 : index
    %c0_70 = arith.constant 0 : index
    %94 = tpu.strided_load %arg8[%c288, %c0_70] {strides = array<i32: 2, 1>} : memref<512x64xf32, #tpu.memory_space<vmem>>, vector<8x64xf32>
    %c289 = arith.constant 289 : index
    %c0_71 = arith.constant 0 : index
    %95 = tpu.strided_load %arg8[%c289, %c0_71] {strides = array<i32: 2, 1>} : memref<512x64xf32, #tpu.memory_space<vmem>>, vector<8x64xf32>
    %c304 = arith.constant 304 : index
    %c0_72 = arith.constant 0 : index
    %96 = tpu.strided_load %arg8[%c304, %c0_72] {strides = array<i32: 2, 1>} : memref<512x64xf32, #tpu.memory_space<vmem>>, vector<8x64xf32>
    %c305 = arith.constant 305 : index
    %c0_73 = arith.constant 0 : index
    %97 = tpu.strided_load %arg8[%c305, %c0_73] {strides = array<i32: 2, 1>} : memref<512x64xf32, #tpu.memory_space<vmem>>, vector<8x64xf32>
    %98 = arith.maximumf %94, %95 : vector<8x64xf32>
    %99 = arith.maximumf %96, %97 : vector<8x64xf32>
    %100 = arith.maximumf %98, %99 : vector<8x64xf32>
    %c121 = arith.constant 121 : index
    %c0_74 = arith.constant 0 : index
    %101 = vector.load %arg9[%c121, %c0_74] : memref<210x64xf32, #tpu.memory_space<vmem>>, vector<8x64xf32>
    tpu.vector_store %arg9[%c121, %c0_74], %100 {strides = array<i32>} : memref<210x64xf32, #tpu.memory_space<vmem>>, vector<8x64xf32>,
    %c320 = arith.constant 320 : index
    %c0_75 = arith.constant 0 : index
    %102 = tpu.strided_load %arg8[%c320, %c0_75] {strides = array<i32: 2, 1>} : memref<512x64xf32, #tpu.memory_space<vmem>>, vector<8x64xf32>
    %c321 = arith.constant 321 : index
    %c0_76 = arith.constant 0 : index
    %103 = tpu.strided_load %arg8[%c321, %c0_76] {strides = array<i32: 2, 1>} : memref<512x64xf32, #tpu.memory_space<vmem>>, vector<8x64xf32>
    %c336 = arith.constant 336 : index
    %c0_77 = arith.constant 0 : index
    %104 = tpu.strided_load %arg8[%c336, %c0_77] {strides = array<i32: 2, 1>} : memref<512x64xf32, #tpu.memory_space<vmem>>, vector<8x64xf32>
    %c337 = arith.constant 337 : index
    %c0_78 = arith.constant 0 : index
    %105 = tpu.strided_load %arg8[%c337, %c0_78] {strides = array<i32: 2, 1>} : memref<512x64xf32, #tpu.memory_space<vmem>>, vector<8x64xf32>
    %106 = arith.maximumf %102, %103 : vector<8x64xf32>
    %107 = arith.maximumf %104, %105 : vector<8x64xf32>
    %108 = arith.maximumf %106, %107 : vector<8x64xf32>
    %c131 = arith.constant 131 : index
    %c0_79 = arith.constant 0 : index
    %109 = vector.load %arg9[%c131, %c0_79] : memref<210x64xf32, #tpu.memory_space<vmem>>, vector<8x64xf32>
    tpu.vector_store %arg9[%c131, %c0_79], %108 {strides = array<i32>} : memref<210x64xf32, #tpu.memory_space<vmem>>, vector<8x64xf32>,
    %c352 = arith.constant 352 : index
    %c0_80 = arith.constant 0 : index
    %110 = tpu.strided_load %arg8[%c352, %c0_80] {strides = array<i32: 2, 1>} : memref<512x64xf32, #tpu.memory_space<vmem>>, vector<8x64xf32>
    %c353 = arith.constant 353 : index
    %c0_81 = arith.constant 0 : index
    %111 = tpu.strided_load %arg8[%c353, %c0_81] {strides = array<i32: 2, 1>} : memref<512x64xf32, #tpu.memory_space<vmem>>, vector<8x64xf32>
    %c368 = arith.constant 368 : index
    %c0_82 = arith.constant 0 : index
    %112 = tpu.strided_load %arg8[%c368, %c0_82] {strides = array<i32: 2, 1>} : memref<512x64xf32, #tpu.memory_space<vmem>>, vector<8x64xf32>
    %c369 = arith.constant 369 : index
    %c0_83 = arith.constant 0 : index
    %113 = tpu.strided_load %arg8[%c369, %c0_83] {strides = array<i32: 2, 1>} : memref<512x64xf32, #tpu.memory_space<vmem>>, vector<8x64xf32>
    %114 = arith.maximumf %110, %111 : vector<8x64xf32>
    %115 = arith.maximumf %112, %113 : vector<8x64xf32>
    %116 = arith.maximumf %114, %115 : vector<8x64xf32>
    %c141 = arith.constant 141 : index
    %c0_84 = arith.constant 0 : index
    %117 = vector.load %arg9[%c141, %c0_84] : memref<210x64xf32, #tpu.memory_space<vmem>>, vector<8x64xf32>
    tpu.vector_store %arg9[%c141, %c0_84], %116 {strides = array<i32>} : memref<210x64xf32, #tpu.memory_space<vmem>>, vector<8x64xf32>,
    %c384 = arith.constant 384 : index
    %c0_85 = arith.constant 0 : index
    %118 = tpu.strided_load %arg8[%c384, %c0_85] {strides = array<i32: 2, 1>} : memref<512x64xf32, #tpu.memory_space<vmem>>, vector<8x64xf32>
    %c385 = arith.constant 385 : index
    %c0_86 = arith.constant 0 : index
    %119 = tpu.strided_load %arg8[%c385, %c0_86] {strides = array<i32: 2, 1>} : memref<512x64xf32, #tpu.memory_space<vmem>>, vector<8x64xf32>
    %c400 = arith.constant 400 : index
    %c0_87 = arith.constant 0 : index
    %120 = tpu.strided_load %arg8[%c400, %c0_87] {strides = array<i32: 2, 1>} : memref<512x64xf32, #tpu.memory_space<vmem>>, vector<8x64xf32>
    %c401 = arith.constant 401 : index
    %c0_88 = arith.constant 0 : index
    %121 = tpu.strided_load %arg8[%c401, %c0_88] {strides = array<i32: 2, 1>} : memref<512x64xf32, #tpu.memory_space<vmem>>, vector<8x64xf32>
    %122 = arith.maximumf %118, %119 : vector<8x64xf32>
    %123 = arith.maximumf %120, %121 : vector<8x64xf32>
    %124 = arith.maximumf %122, %123 : vector<8x64xf32>
    %c151 = arith.constant 151 : index
    %c0_89 = arith.constant 0 : index
    %125 = vector.load %arg9[%c151, %c0_89] : memref<210x64xf32, #tpu.memory_space<vmem>>, vector<8x64xf32>
    tpu.vector_store %arg9[%c151, %c0_89], %124 {strides = array<i32>} : memref<210x64xf32, #tpu.memory_space<vmem>>, vector<8x64xf32>,
    %c416 = arith.constant 416 : index
    %c0_90 = arith.constant 0 : index
    %126 = tpu.strided_load %arg8[%c416, %c0_90] {strides = array<i32: 2, 1>} : memref<512x64xf32, #tpu.memory_space<vmem>>, vector<8x64xf32>
    %c417 = arith.constant 417 : index
    %c0_91 = arith.constant 0 : index
    %127 = tpu.strided_load %arg8[%c417, %c0_91] {strides = array<i32: 2, 1>} : memref<512x64xf32, #tpu.memory_space<vmem>>, vector<8x64xf32>
    %c432 = arith.constant 432 : index
    %c0_92 = arith.constant 0 : index
    %128 = tpu.strided_load %arg8[%c432, %c0_92] {strides = array<i32: 2, 1>} : memref<512x64xf32, #tpu.memory_space<vmem>>, vector<8x64xf32>
    %c433 = arith.constant 433 : index
    %c0_93 = arith.constant 0 : index
    %129 = tpu.strided_load %arg8[%c433, %c0_93] {strides = array<i32: 2, 1>} : memref<512x64xf32, #tpu.memory_space<vmem>>, vector<8x64xf32>
    %130 = arith.maximumf %126, %127 : vector<8x64xf32>
    %131 = arith.maximumf %128, %129 : vector<8x64xf32>
    %132 = arith.maximumf %130, %131 : vector<8x64xf32>
    %c161_94 = arith.constant 161 : index
    %c0_95 = arith.constant 0 : index
    %133 = vector.load %arg9[%c161_94, %c0_95] : memref<210x64xf32, #tpu.memory_space<vmem>>, vector<8x64xf32>
    tpu.vector_store %arg9[%c161_94, %c0_95], %132 {strides = array<i32>} : memref<210x64xf32, #tpu.memory_space<vmem>>, vector<8x64xf32>,
    %c448 = arith.constant 448 : index
    %c0_96 = arith.constant 0 : index
    %134 = tpu.strided_load %arg8[%c448, %c0_96] {strides = array<i32: 2, 1>} : memref<512x64xf32, #tpu.memory_space<vmem>>, vector<8x64xf32>
    %c449 = arith.constant 449 : index
    %c0_97 = arith.constant 0 : index
    %135 = tpu.strided_load %arg8[%c449, %c0_97] {strides = array<i32: 2, 1>} : memref<512x64xf32, #tpu.memory_space<vmem>>, vector<8x64xf32>
    %c464 = arith.constant 464 : index
    %c0_98 = arith.constant 0 : index
    %136 = tpu.strided_load %arg8[%c464, %c0_98] {strides = array<i32: 2, 1>} : memref<512x64xf32, #tpu.memory_space<vmem>>, vector<8x64xf32>
    %c465 = arith.constant 465 : index
    %c0_99 = arith.constant 0 : index
    %137 = tpu.strided_load %arg8[%c465, %c0_99] {strides = array<i32: 2, 1>} : memref<512x64xf32, #tpu.memory_space<vmem>>, vector<8x64xf32>
    %138 = arith.maximumf %134, %135 : vector<8x64xf32>
    %139 = arith.maximumf %136, %137 : vector<8x64xf32>
    %140 = arith.maximumf %138, %139 : vector<8x64xf32>
    %c171 = arith.constant 171 : index
    %c0_100 = arith.constant 0 : index
    %141 = vector.load %arg9[%c171, %c0_100] : memref<210x64xf32, #tpu.memory_space<vmem>>, vector<8x64xf32>
    tpu.vector_store %arg9[%c171, %c0_100], %140 {strides = array<i32>} : memref<210x64xf32, #tpu.memory_space<vmem>>, vector<8x64xf32>,
    %c480 = arith.constant 480 : index
    %c0_101 = arith.constant 0 : index
    %142 = tpu.strided_load %arg8[%c480, %c0_101] {strides = array<i32: 2, 1>} : memref<512x64xf32, #tpu.memory_space<vmem>>, vector<8x64xf32>
    %c481 = arith.constant 481 : index
    %c0_102 = arith.constant 0 : index
    %143 = tpu.strided_load %arg8[%c481, %c0_102] {strides = array<i32: 2, 1>} : memref<512x64xf32, #tpu.memory_space<vmem>>, vector<8x64xf32>
    %c496 = arith.constant 496 : index
    %c0_103 = arith.constant 0 : index
    %144 = tpu.strided_load %arg8[%c496, %c0_103] {strides = array<i32: 2, 1>} : memref<512x64xf32, #tpu.memory_space<vmem>>, vector<8x64xf32>
    %c497 = arith.constant 497 : index
    %c0_104 = arith.constant 0 : index
    %145 = tpu.strided_load %arg8[%c497, %c0_104] {strides = array<i32: 2, 1>} : memref<512x64xf32, #tpu.memory_space<vmem>>, vector<8x64xf32>
    %146 = arith.maximumf %142, %143 : vector<8x64xf32>
    %147 = arith.maximumf %144, %145 : vector<8x64xf32>
    %148 = arith.maximumf %146, %147 : vector<8x64xf32>
    %c181 = arith.constant 181 : index
    %c0_105 = arith.constant 0 : index
    %149 = vector.load %arg9[%c181, %c0_105] : memref<210x64xf32, #tpu.memory_space<vmem>>, vector<8x64xf32>
    tpu.vector_store %arg9[%c181, %c0_105], %148 {strides = array<i32>} : memref<210x64xf32, #tpu.memory_space<vmem>>, vector<8x64xf32>,
    %c1_106 = arith.constant 1 : index
    %c0_107 = arith.constant 0 : index
    %150 = vector.load %arg6[%c1_106, %c0_107] : memref<4x64xf32, #tpu.memory_space<vmem>>, vector<1x64xf32>
    %cst_108 = arith.constant 0.000000e+00 : f32
    %151 = vector.broadcast %cst_108 : f32 to vector<180x64xf32>
    %c0_109 = arith.constant 0 : index
    %c0_110 = arith.constant 0 : index
    %152 = vector.load %arg9[%c0_109, %c0_110] : memref<210x64xf32, #tpu.memory_space<vmem>>, vector<180x64xf32>
    %153 = arith.truncf %152 : vector<180x64xf32> to vector<180x64xbf16>
    %c0_111 = arith.constant 0 : index
    %c0_112 = arith.constant 0 : index
    %c0_113 = arith.constant 0 : index
    %154 = vector.load %arg3[%c0_111, %c0_112, %c0_113] : memref<9x64x64xbf16, #tpu.memory_space<vmem>>, vector<1x64x64xbf16>
    %155 = vector.shape_cast %154 : vector<1x64x64xbf16> to vector<64x64xbf16>
    %cst_114 = arith.constant dense<0.000000e+00> : vector<180x64xf32>
    %156 = tpu.matmul %153, %155, %cst_114 {dimension_numbers = #tpu.dot_dimension_numbers<[1], [0], [0], [1], [0, 0, 1, 1], [], []>} : vector<180x64xbf16>, vector<64x64xbf16>, vector<180x64xf32> -> vector<180x64xf32>
    %157 = arith.addf %151, %156 : vector<180x64xf32>
    %c1_115 = arith.constant 1 : index
    %c0_116 = arith.constant 0 : index
    %158 = vector.load %arg9[%c1_115, %c0_116] : memref<210x64xf32, #tpu.memory_space<vmem>>, vector<180x64xf32>
    %159 = arith.truncf %158 : vector<180x64xf32> to vector<180x64xbf16>
    %c1_117 = arith.constant 1 : index
    %c0_118 = arith.constant 0 : index
    %c0_119 = arith.constant 0 : index
    %160 = vector.load %arg3[%c1_117, %c0_118, %c0_119] : memref<9x64x64xbf16, #tpu.memory_space<vmem>>, vector<1x64x64xbf16>
    %161 = vector.shape_cast %160 : vector<1x64x64xbf16> to vector<64x64xbf16>
    %cst_120 = arith.constant dense<0.000000e+00> : vector<180x64xf32>
    %162 = tpu.matmul %159, %161, %cst_120 {dimension_numbers = #tpu.dot_dimension_numbers<[1], [0], [0], [1], [0, 0, 1, 1], [], []>} : vector<180x64xbf16>, vector<64x64xbf16>, vector<180x64xf32> -> vector<180x64xf32>
    %163 = arith.addf %157, %162 : vector<180x64xf32>
    %c2 = arith.constant 2 : index
    %c0_121 = arith.constant 0 : index
    %164 = vector.load %arg9[%c2, %c0_121] : memref<210x64xf32, #tpu.memory_space<vmem>>, vector<180x64xf32>
    %165 = arith.truncf %164 : vector<180x64xf32> to vector<180x64xbf16>
    %c2_122 = arith.constant 2 : index
    %c0_123 = arith.constant 0 : index
    %c0_124 = arith.constant 0 : index
    %166 = vector.load %arg3[%c2_122, %c0_123, %c0_124] : memref<9x64x64xbf16, #tpu.memory_space<vmem>>, vector<1x64x64xbf16>
    %167 = vector.shape_cast %166 : vector<1x64x64xbf16> to vector<64x64xbf16>
    %cst_125 = arith.constant dense<0.000000e+00> : vector<180x64xf32>
    %168 = tpu.matmul %165, %167, %cst_125 {dimension_numbers = #tpu.dot_dimension_numbers<[1], [0], [0], [1], [0, 0, 1, 1], [], []>} : vector<180x64xbf16>, vector<64x64xbf16>, vector<180x64xf32> -> vector<180x64xf32>
    %169 = arith.addf %163, %168 : vector<180x64xf32>
    %c10 = arith.constant 10 : index
    %c0_126 = arith.constant 0 : index
    %170 = vector.load %arg9[%c10, %c0_126] : memref<210x64xf32, #tpu.memory_space<vmem>>, vector<180x64xf32>
    %171 = arith.truncf %170 : vector<180x64xf32> to vector<180x64xbf16>
    %c3 = arith.constant 3 : index
    %c0_127 = arith.constant 0 : index
    %c0_128 = arith.constant 0 : index
    %172 = vector.load %arg3[%c3, %c0_127, %c0_128] : memref<9x64x64xbf16, #tpu.memory_space<vmem>>, vector<1x64x64xbf16>
    %173 = vector.shape_cast %172 : vector<1x64x64xbf16> to vector<64x64xbf16>
    %cst_129 = arith.constant dense<0.000000e+00> : vector<180x64xf32>
    %174 = tpu.matmul %171, %173, %cst_129 {dimension_numbers = #tpu.dot_dimension_numbers<[1], [0], [0], [1], [0, 0, 1, 1], [], []>} : vector<180x64xbf16>, vector<64x64xbf16>, vector<180x64xf32> -> vector<180x64xf32>
    %175 = arith.addf %169, %174 : vector<180x64xf32>
    %c11_130 = arith.constant 11 : index
    %c0_131 = arith.constant 0 : index
    %176 = vector.load %arg9[%c11_130, %c0_131] : memref<210x64xf32, #tpu.memory_space<vmem>>, vector<180x64xf32>
    %177 = arith.truncf %176 : vector<180x64xf32> to vector<180x64xbf16>
    %c4 = arith.constant 4 : index
    %c0_132 = arith.constant 0 : index
    %c0_133 = arith.constant 0 : index
    %178 = vector.load %arg3[%c4, %c0_132, %c0_133] : memref<9x64x64xbf16, #tpu.memory_space<vmem>>, vector<1x64x64xbf16>
    %179 = vector.shape_cast %178 : vector<1x64x64xbf16> to vector<64x64xbf16>
    %cst_134 = arith.constant dense<0.000000e+00> : vector<180x64xf32>
    %180 = tpu.matmul %177, %179, %cst_134 {dimension_numbers = #tpu.dot_dimension_numbers<[1], [0], [0], [1], [0, 0, 1, 1], [], []>} : vector<180x64xbf16>, vector<64x64xbf16>, vector<180x64xf32> -> vector<180x64xf32>
    %181 = arith.addf %175, %180 : vector<180x64xf32>
    %c12 = arith.constant 12 : index
    %c0_135 = arith.constant 0 : index
    %182 = vector.load %arg9[%c12, %c0_135] : memref<210x64xf32, #tpu.memory_space<vmem>>, vector<180x64xf32>
    %183 = arith.truncf %182 : vector<180x64xf32> to vector<180x64xbf16>
    %c5 = arith.constant 5 : index
    %c0_136 = arith.constant 0 : index
    %c0_137 = arith.constant 0 : index
    %184 = vector.load %arg3[%c5, %c0_136, %c0_137] : memref<9x64x64xbf16, #tpu.memory_space<vmem>>, vector<1x64x64xbf16>
    %185 = vector.shape_cast %184 : vector<1x64x64xbf16> to vector<64x64xbf16>
    %cst_138 = arith.constant dense<0.000000e+00> : vector<180x64xf32>
    %186 = tpu.matmul %183, %185, %cst_138 {dimension_numbers = #tpu.dot_dimension_numbers<[1], [0], [0], [1], [0, 0, 1, 1], [], []>} : vector<180x64xbf16>, vector<64x64xbf16>, vector<180x64xf32> -> vector<180x64xf32>
    %187 = arith.addf %181, %186 : vector<180x64xf32>
    %c20 = arith.constant 20 : index
    %c0_139 = arith.constant 0 : index
    %188 = vector.load %arg9[%c20, %c0_139] : memref<210x64xf32, #tpu.memory_space<vmem>>, vector<180x64xf32>
    %189 = arith.truncf %188 : vector<180x64xf32> to vector<180x64xbf16>
    %c6 = arith.constant 6 : index
    %c0_140 = arith.constant 0 : index
    %c0_141 = arith.constant 0 : index
    %190 = vector.load %arg3[%c6, %c0_140, %c0_141] : memref<9x64x64xbf16, #tpu.memory_space<vmem>>, vector<1x64x64xbf16>
    %191 = vector.shape_cast %190 : vector<1x64x64xbf16> to vector<64x64xbf16>
    %cst_142 = arith.constant dense<0.000000e+00> : vector<180x64xf32>
    %192 = tpu.matmul %189, %191, %cst_142 {dimension_numbers = #tpu.dot_dimension_numbers<[1], [0], [0], [1], [0, 0, 1, 1], [], []>} : vector<180x64xbf16>, vector<64x64xbf16>, vector<180x64xf32> -> vector<180x64xf32>
    %193 = arith.addf %187, %192 : vector<180x64xf32>
    %c21_143 = arith.constant 21 : index
    %c0_144 = arith.constant 0 : index
    %194 = vector.load %arg9[%c21_143, %c0_144] : memref<210x64xf32, #tpu.memory_space<vmem>>, vector<180x64xf32>
    %195 = arith.truncf %194 : vector<180x64xf32> to vector<180x64xbf16>
    %c7 = arith.constant 7 : index
    %c0_145 = arith.constant 0 : index
    %c0_146 = arith.constant 0 : index
    %196 = vector.load %arg3[%c7, %c0_145, %c0_146] : memref<9x64x64xbf16, #tpu.memory_space<vmem>>, vector<1x64x64xbf16>
    %197 = vector.shape_cast %196 : vector<1x64x64xbf16> to vector<64x64xbf16>
    %cst_147 = arith.constant dense<0.000000e+00> : vector<180x64xf32>
    %198 = tpu.matmul %195, %197, %cst_147 {dimension_numbers = #tpu.dot_dimension_numbers<[1], [0], [0], [1], [0, 0, 1, 1], [], []>} : vector<180x64xbf16>, vector<64x64xbf16>, vector<180x64xf32> -> vector<180x64xf32>
    %199 = arith.addf %193, %198 : vector<180x64xf32>
    %c22 = arith.constant 22 : index
    %c0_148 = arith.constant 0 : index
    %200 = vector.load %arg9[%c22, %c0_148] : memref<210x64xf32, #tpu.memory_space<vmem>>, vector<180x64xf32>
    %201 = arith.truncf %200 : vector<180x64xf32> to vector<180x64xbf16>
    %c8 = arith.constant 8 : index
    %c0_149 = arith.constant 0 : index
    %c0_150 = arith.constant 0 : index
    %202 = vector.load %arg3[%c8, %c0_149, %c0_150] : memref<9x64x64xbf16, #tpu.memory_space<vmem>>, vector<1x64x64xbf16>
    %203 = vector.shape_cast %202 : vector<1x64x64xbf16> to vector<64x64xbf16>
    %cst_151 = arith.constant dense<0.000000e+00> : vector<180x64xf32>
    %204 = tpu.matmul %201, %203, %cst_151 {dimension_numbers = #tpu.dot_dimension_numbers<[1], [0], [0], [1], [0, 0, 1, 1], [], []>} : vector<180x64xbf16>, vector<64x64xbf16>, vector<180x64xf32> -> vector<180x64xf32>
    %205 = arith.addf %199, %204 : vector<180x64xf32>
    %206 = vector.broadcast %150 : vector<1x64xf32> to vector<180x64xf32>
    %207 = arith.addf %205, %206 : vector<180x64xf32>
    %cst_152 = arith.constant 0.000000e+00 : f32
    %208 = vector.broadcast %cst_152 : f32 to vector<180x64xf32>
    %209 = arith.maximumf %207, %208 : vector<180x64xf32>
    %c0_153 = arith.constant 0 : index
    %c0_154 = arith.constant 0 : index
    %210 = vector.load %arg10[%c0_153, %c0_154] : memref<180x64xf32, #tpu.memory_space<vmem>>, vector<180x64xf32>
    tpu.vector_store %arg10[%c0_153, %c0_154], %209 {strides = array<i32>} : memref<180x64xf32, #tpu.memory_space<vmem>>, vector<180x64xf32>,
    %c0_155 = arith.constant 0 : index
    %c0_156 = arith.constant 0 : index
    %211 = tpu.strided_load %arg10[%c0_155, %c0_156] {strides = array<i32: 2, 1>} : memref<180x64xf32, #tpu.memory_space<vmem>>, vector<4x64xf32>
    %c1_157 = arith.constant 1 : index
    %c0_158 = arith.constant 0 : index
    %212 = tpu.strided_load %arg10[%c1_157, %c0_158] {strides = array<i32: 2, 1>} : memref<180x64xf32, #tpu.memory_space<vmem>>, vector<4x64xf32>
    %c10_159 = arith.constant 10 : index
    %c0_160 = arith.constant 0 : index
    %213 = tpu.strided_load %arg10[%c10_159, %c0_160] {strides = array<i32: 2, 1>} : memref<180x64xf32, #tpu.memory_space<vmem>>, vector<4x64xf32>
    %c11_161 = arith.constant 11 : index
    %c0_162 = arith.constant 0 : index
    %214 = tpu.strided_load %arg10[%c11_161, %c0_162] {strides = array<i32: 2, 1>} : memref<180x64xf32, #tpu.memory_space<vmem>>, vector<4x64xf32>
    %215 = arith.maximumf %211, %212 : vector<4x64xf32>
    %216 = arith.maximumf %213, %214 : vector<4x64xf32>
    %217 = arith.maximumf %215, %216 : vector<4x64xf32>
    %c7_163 = arith.constant 7 : index
    %c0_164 = arith.constant 0 : index
    %218 = vector.load %arg11[%c7_163, %c0_164] : memref<78x64xf32, #tpu.memory_space<vmem>>, vector<4x64xf32>
    tpu.vector_store %arg11[%c7_163, %c0_164], %217 {strides = array<i32>} : memref<78x64xf32, #tpu.memory_space<vmem>>, vector<4x64xf32>,
    %c20_165 = arith.constant 20 : index
    %c0_166 = arith.constant 0 : index
    %219 = tpu.strided_load %arg10[%c20_165, %c0_166] {strides = array<i32: 2, 1>} : memref<180x64xf32, #tpu.memory_space<vmem>>, vector<4x64xf32>
    %c21_167 = arith.constant 21 : index
    %c0_168 = arith.constant 0 : index
    %220 = tpu.strided_load %arg10[%c21_167, %c0_168] {strides = array<i32: 2, 1>} : memref<180x64xf32, #tpu.memory_space<vmem>>, vector<4x64xf32>
    %c30 = arith.constant 30 : index
    %c0_169 = arith.constant 0 : index
    %221 = tpu.strided_load %arg10[%c30, %c0_169] {strides = array<i32: 2, 1>} : memref<180x64xf32, #tpu.memory_space<vmem>>, vector<4x64xf32>
    %c31_170 = arith.constant 31 : index
    %c0_171 = arith.constant 0 : index
    %222 = tpu.strided_load %arg10[%c31_170, %c0_171] {strides = array<i32: 2, 1>} : memref<180x64xf32, #tpu.memory_space<vmem>>, vector<4x64xf32>
    %223 = arith.maximumf %219, %220 : vector<4x64xf32>
    %224 = arith.maximumf %221, %222 : vector<4x64xf32>
    %225 = arith.maximumf %223, %224 : vector<4x64xf32>
    %c13 = arith.constant 13 : index
    %c0_172 = arith.constant 0 : index
    %226 = vector.load %arg11[%c13, %c0_172] : memref<78x64xf32, #tpu.memory_space<vmem>>, vector<4x64xf32>
    tpu.vector_store %arg11[%c13, %c0_172], %225 {strides = array<i32>} : memref<78x64xf32, #tpu.memory_space<vmem>>, vector<4x64xf32>,
    %c40 = arith.constant 40 : index
    %c0_173 = arith.constant 0 : index
    %227 = tpu.strided_load %arg10[%c40, %c0_173] {strides = array<i32: 2, 1>} : memref<180x64xf32, #tpu.memory_space<vmem>>, vector<4x64xf32>
    %c41_174 = arith.constant 41 : index
    %c0_175 = arith.constant 0 : index
    %228 = tpu.strided_load %arg10[%c41_174, %c0_175] {strides = array<i32: 2, 1>} : memref<180x64xf32, #tpu.memory_space<vmem>>, vector<4x64xf32>
    %c50 = arith.constant 50 : index
    %c0_176 = arith.constant 0 : index
    %229 = tpu.strided_load %arg10[%c50, %c0_176] {strides = array<i32: 2, 1>} : memref<180x64xf32, #tpu.memory_space<vmem>>, vector<4x64xf32>
    %c51_177 = arith.constant 51 : index
    %c0_178 = arith.constant 0 : index
    %230 = tpu.strided_load %arg10[%c51_177, %c0_178] {strides = array<i32: 2, 1>} : memref<180x64xf32, #tpu.memory_space<vmem>>, vector<4x64xf32>
    %231 = arith.maximumf %227, %228 : vector<4x64xf32>
    %232 = arith.maximumf %229, %230 : vector<4x64xf32>
    %233 = arith.maximumf %231, %232 : vector<4x64xf32>
    %c19 = arith.constant 19 : index
    %c0_179 = arith.constant 0 : index
    %234 = vector.load %arg11[%c19, %c0_179] : memref<78x64xf32, #tpu.memory_space<vmem>>, vector<4x64xf32>
    tpu.vector_store %arg11[%c19, %c0_179], %233 {strides = array<i32>} : memref<78x64xf32, #tpu.memory_space<vmem>>, vector<4x64xf32>,
    %c60 = arith.constant 60 : index
    %c0_180 = arith.constant 0 : index
    %235 = tpu.strided_load %arg10[%c60, %c0_180] {strides = array<i32: 2, 1>} : memref<180x64xf32, #tpu.memory_space<vmem>>, vector<4x64xf32>
    %c61_181 = arith.constant 61 : index
    %c0_182 = arith.constant 0 : index
    %236 = tpu.strided_load %arg10[%c61_181, %c0_182] {strides = array<i32: 2, 1>} : memref<180x64xf32, #tpu.memory_space<vmem>>, vector<4x64xf32>
    %c70 = arith.constant 70 : index
    %c0_183 = arith.constant 0 : index
    %237 = tpu.strided_load %arg10[%c70, %c0_183] {strides = array<i32: 2, 1>} : memref<180x64xf32, #tpu.memory_space<vmem>>, vector<4x64xf32>
    %c71_184 = arith.constant 71 : index
    %c0_185 = arith.constant 0 : index
    %238 = tpu.strided_load %arg10[%c71_184, %c0_185] {strides = array<i32: 2, 1>} : memref<180x64xf32, #tpu.memory_space<vmem>>, vector<4x64xf32>
    %239 = arith.maximumf %235, %236 : vector<4x64xf32>
    %240 = arith.maximumf %237, %238 : vector<4x64xf32>
    %241 = arith.maximumf %239, %240 : vector<4x64xf32>
    %c25 = arith.constant 25 : index
    %c0_186 = arith.constant 0 : index
    %242 = vector.load %arg11[%c25, %c0_186] : memref<78x64xf32, #tpu.memory_space<vmem>>, vector<4x64xf32>
    tpu.vector_store %arg11[%c25, %c0_186], %241 {strides = array<i32>} : memref<78x64xf32, #tpu.memory_space<vmem>>, vector<4x64xf32>,
    %c100 = arith.constant 100 : index
    %c0_187 = arith.constant 0 : index
    %243 = tpu.strided_load %arg10[%c100, %c0_187] {strides = array<i32: 2, 1>} : memref<180x64xf32, #tpu.memory_space<vmem>>, vector<4x64xf32>
    %c101 = arith.constant 101 : index
    %c0_188 = arith.constant 0 : index
    %244 = tpu.strided_load %arg10[%c101, %c0_188] {strides = array<i32: 2, 1>} : memref<180x64xf32, #tpu.memory_space<vmem>>, vector<4x64xf32>
    %c110 = arith.constant 110 : index
    %c0_189 = arith.constant 0 : index
    %245 = tpu.strided_load %arg10[%c110, %c0_189] {strides = array<i32: 2, 1>} : memref<180x64xf32, #tpu.memory_space<vmem>>, vector<4x64xf32>
    %c111_190 = arith.constant 111 : index
    %c0_191 = arith.constant 0 : index
    %246 = tpu.strided_load %arg10[%c111_190, %c0_191] {strides = array<i32: 2, 1>} : memref<180x64xf32, #tpu.memory_space<vmem>>, vector<4x64xf32>
    %247 = arith.maximumf %243, %244 : vector<4x64xf32>
    %248 = arith.maximumf %245, %246 : vector<4x64xf32>
    %249 = arith.maximumf %247, %248 : vector<4x64xf32>
    %c43 = arith.constant 43 : index
    %c0_192 = arith.constant 0 : index
    %250 = vector.load %arg11[%c43, %c0_192] : memref<78x64xf32, #tpu.memory_space<vmem>>, vector<4x64xf32>
    tpu.vector_store %arg11[%c43, %c0_192], %249 {strides = array<i32>} : memref<78x64xf32, #tpu.memory_space<vmem>>, vector<4x64xf32>,
    %c120 = arith.constant 120 : index
    %c0_193 = arith.constant 0 : index
    %251 = tpu.strided_load %arg10[%c120, %c0_193] {strides = array<i32: 2, 1>} : memref<180x64xf32, #tpu.memory_space<vmem>>, vector<4x64xf32>
    %c121_194 = arith.constant 121 : index
    %c0_195 = arith.constant 0 : index
    %252 = tpu.strided_load %arg10[%c121_194, %c0_195] {strides = array<i32: 2, 1>} : memref<180x64xf32, #tpu.memory_space<vmem>>, vector<4x64xf32>
    %c130 = arith.constant 130 : index
    %c0_196 = arith.constant 0 : index
    %253 = tpu.strided_load %arg10[%c130, %c0_196] {strides = array<i32: 2, 1>} : memref<180x64xf32, #tpu.memory_space<vmem>>, vector<4x64xf32>
    %c131_197 = arith.constant 131 : index
    %c0_198 = arith.constant 0 : index
    %254 = tpu.strided_load %arg10[%c131_197, %c0_198] {strides = array<i32: 2, 1>} : memref<180x64xf32, #tpu.memory_space<vmem>>, vector<4x64xf32>
    %255 = arith.maximumf %251, %252 : vector<4x64xf32>
    %256 = arith.maximumf %253, %254 : vector<4x64xf32>
    %257 = arith.maximumf %255, %256 : vector<4x64xf32>
    %c49_199 = arith.constant 49 : index
    %c0_200 = arith.constant 0 : index
    %258 = vector.load %arg11[%c49_199, %c0_200] : memref<78x64xf32, #tpu.memory_space<vmem>>, vector<4x64xf32>
    tpu.vector_store %arg11[%c49_199, %c0_200], %257 {strides = array<i32>} : memref<78x64xf32, #tpu.memory_space<vmem>>, vector<4x64xf32>,
    %c140 = arith.constant 140 : index
    %c0_201 = arith.constant 0 : index
    %259 = tpu.strided_load %arg10[%c140, %c0_201] {strides = array<i32: 2, 1>} : memref<180x64xf32, #tpu.memory_space<vmem>>, vector<4x64xf32>
    %c141_202 = arith.constant 141 : index
    %c0_203 = arith.constant 0 : index
    %260 = tpu.strided_load %arg10[%c141_202, %c0_203] {strides = array<i32: 2, 1>} : memref<180x64xf32, #tpu.memory_space<vmem>>, vector<4x64xf32>
    %c150 = arith.constant 150 : index
    %c0_204 = arith.constant 0 : index
    %261 = tpu.strided_load %arg10[%c150, %c0_204] {strides = array<i32: 2, 1>} : memref<180x64xf32, #tpu.memory_space<vmem>>, vector<4x64xf32>
    %c151_205 = arith.constant 151 : index
    %c0_206 = arith.constant 0 : index
    %262 = tpu.strided_load %arg10[%c151_205, %c0_206] {strides = array<i32: 2, 1>} : memref<180x64xf32, #tpu.memory_space<vmem>>, vector<4x64xf32>
    %263 = arith.maximumf %259, %260 : vector<4x64xf32>
    %264 = arith.maximumf %261, %262 : vector<4x64xf32>
    %265 = arith.maximumf %263, %264 : vector<4x64xf32>
    %c55 = arith.constant 55 : index
    %c0_207 = arith.constant 0 : index
    %266 = vector.load %arg11[%c55, %c0_207] : memref<78x64xf32, #tpu.memory_space<vmem>>, vector<4x64xf32>
    tpu.vector_store %arg11[%c55, %c0_207], %265 {strides = array<i32>} : memref<78x64xf32, #tpu.memory_space<vmem>>, vector<4x64xf32>,
    %c160_208 = arith.constant 160 : index
    %c0_209 = arith.constant 0 : index
    %267 = tpu.strided_load %arg10[%c160_208, %c0_209] {strides = array<i32: 2, 1>} : memref<180x64xf32, #tpu.memory_space<vmem>>, vector<4x64xf32>
    %c161_210 = arith.constant 161 : index
    %c0_211 = arith.constant 0 : index
    %268 = tpu.strided_load %arg10[%c161_210, %c0_211] {strides = array<i32: 2, 1>} : memref<180x64xf32, #tpu.memory_space<vmem>>, vector<4x64xf32>
    %c170 = arith.constant 170 : index
    %c0_212 = arith.constant 0 : index
    %269 = tpu.strided_load %arg10[%c170, %c0_212] {strides = array<i32: 2, 1>} : memref<180x64xf32, #tpu.memory_space<vmem>>, vector<4x64xf32>
    %c171_213 = arith.constant 171 : index
    %c0_214 = arith.constant 0 : index
    %270 = tpu.strided_load %arg10[%c171_213, %c0_214] {strides = array<i32: 2, 1>} : memref<180x64xf32, #tpu.memory_space<vmem>>, vector<4x64xf32>
    %271 = arith.maximumf %267, %268 : vector<4x64xf32>
    %272 = arith.maximumf %269, %270 : vector<4x64xf32>
    %273 = arith.maximumf %271, %272 : vector<4x64xf32>
    %c61_215 = arith.constant 61 : index
    %c0_216 = arith.constant 0 : index
    %274 = vector.load %arg11[%c61_215, %c0_216] : memref<78x64xf32, #tpu.memory_space<vmem>>, vector<4x64xf32>
    tpu.vector_store %arg11[%c61_215, %c0_216], %273 {strides = array<i32>} : memref<78x64xf32, #tpu.memory_space<vmem>>, vector<4x64xf32>,
    %c2_217 = arith.constant 2 : index
    %c0_218 = arith.constant 0 : index
    %275 = vector.load %arg6[%c2_217, %c0_218] : memref<4x64xf32, #tpu.memory_space<vmem>>, vector<1x64xf32>
    %cst_219 = arith.constant 0.000000e+00 : f32
    %276 = vector.broadcast %cst_219 : f32 to vector<60x64xf32>
    %c0_220 = arith.constant 0 : index
    %c0_221 = arith.constant 0 : index
    %277 = vector.load %arg11[%c0_220, %c0_221] : memref<78x64xf32, #tpu.memory_space<vmem>>, vector<60x64xf32>
    %278 = arith.truncf %277 : vector<60x64xf32> to vector<60x64xbf16>
    %c0_222 = arith.constant 0 : index
    %c0_223 = arith.constant 0 : index
    %c0_224 = arith.constant 0 : index
    %279 = vector.load %arg4[%c0_222, %c0_223, %c0_224] : memref<9x64x64xbf16, #tpu.memory_space<vmem>>, vector<1x64x64xbf16>
    %280 = vector.shape_cast %279 : vector<1x64x64xbf16> to vector<64x64xbf16>
    %cst_225 = arith.constant dense<0.000000e+00> : vector<60x64xf32>
    %281 = tpu.matmul %278, %280, %cst_225 {dimension_numbers = #tpu.dot_dimension_numbers<[1], [0], [0], [1], [0, 0, 1, 1], [], []>} : vector<60x64xbf16>, vector<64x64xbf16>, vector<60x64xf32> -> vector<60x64xf32>
    %282 = arith.addf %276, %281 : vector<60x64xf32>
    %c1_226 = arith.constant 1 : index
    %c0_227 = arith.constant 0 : index
    %283 = vector.load %arg11[%c1_226, %c0_227] : memref<78x64xf32, #tpu.memory_space<vmem>>, vector<60x64xf32>
    %284 = arith.truncf %283 : vector<60x64xf32> to vector<60x64xbf16>
    %c1_228 = arith.constant 1 : index
    %c0_229 = arith.constant 0 : index
    %c0_230 = arith.constant 0 : index
    %285 = vector.load %arg4[%c1_228, %c0_229, %c0_230] : memref<9x64x64xbf16, #tpu.memory_space<vmem>>, vector<1x64x64xbf16>
    %286 = vector.shape_cast %285 : vector<1x64x64xbf16> to vector<64x64xbf16>
    %cst_231 = arith.constant dense<0.000000e+00> : vector<60x64xf32>
    %287 = tpu.matmul %284, %286, %cst_231 {dimension_numbers = #tpu.dot_dimension_numbers<[1], [0], [0], [1], [0, 0, 1, 1], [], []>} : vector<60x64xbf16>, vector<64x64xbf16>, vector<60x64xf32> -> vector<60x64xf32>
    %288 = arith.addf %282, %287 : vector<60x64xf32>
    %c2_232 = arith.constant 2 : index
    %c0_233 = arith.constant 0 : index
    %289 = vector.load %arg11[%c2_232, %c0_233] : memref<78x64xf32, #tpu.memory_space<vmem>>, vector<60x64xf32>
    %290 = arith.truncf %289 : vector<60x64xf32> to vector<60x64xbf16>
    %c2_234 = arith.constant 2 : index
    %c0_235 = arith.constant 0 : index
    %c0_236 = arith.constant 0 : index
    %291 = vector.load %arg4[%c2_234, %c0_235, %c0_236] : memref<9x64x64xbf16, #tpu.memory_space<vmem>>, vector<1x64x64xbf16>
    %292 = vector.shape_cast %291 : vector<1x64x64xbf16> to vector<64x64xbf16>
    %cst_237 = arith.constant dense<0.000000e+00> : vector<60x64xf32>
    %293 = tpu.matmul %290, %292, %cst_237 {dimension_numbers = #tpu.dot_dimension_numbers<[1], [0], [0], [1], [0, 0, 1, 1], [], []>} : vector<60x64xbf16>, vector<64x64xbf16>, vector<60x64xf32> -> vector<60x64xf32>
    %294 = arith.addf %288, %293 : vector<60x64xf32>
    %c6_238 = arith.constant 6 : index
    %c0_239 = arith.constant 0 : index
    %295 = vector.load %arg11[%c6_238, %c0_239] : memref<78x64xf32, #tpu.memory_space<vmem>>, vector<60x64xf32>
    %296 = arith.truncf %295 : vector<60x64xf32> to vector<60x64xbf16>
    %c3_240 = arith.constant 3 : index
    %c0_241 = arith.constant 0 : index
    %c0_242 = arith.constant 0 : index
    %297 = vector.load %arg4[%c3_240, %c0_241, %c0_242] : memref<9x64x64xbf16, #tpu.memory_space<vmem>>, vector<1x64x64xbf16>
    %298 = vector.shape_cast %297 : vector<1x64x64xbf16> to vector<64x64xbf16>
    %cst_243 = arith.constant dense<0.000000e+00> : vector<60x64xf32>
    %299 = tpu.matmul %296, %298, %cst_243 {dimension_numbers = #tpu.dot_dimension_numbers<[1], [0], [0], [1], [0, 0, 1, 1], [], []>} : vector<60x64xbf16>, vector<64x64xbf16>, vector<60x64xf32> -> vector<60x64xf32>
    %300 = arith.addf %294, %299 : vector<60x64xf32>
    %c7_244 = arith.constant 7 : index
    %c0_245 = arith.constant 0 : index
    %301 = vector.load %arg11[%c7_244, %c0_245] : memref<78x64xf32, #tpu.memory_space<vmem>>, vector<60x64xf32>
    %302 = arith.truncf %301 : vector<60x64xf32> to vector<60x64xbf16>
    %c4_246 = arith.constant 4 : index
    %c0_247 = arith.constant 0 : index
    %c0_248 = arith.constant 0 : index
    %303 = vector.load %arg4[%c4_246, %c0_247, %c0_248] : memref<9x64x64xbf16, #tpu.memory_space<vmem>>, vector<1x64x64xbf16>
    %304 = vector.shape_cast %303 : vector<1x64x64xbf16> to vector<64x64xbf16>
    %cst_249 = arith.constant dense<0.000000e+00> : vector<60x64xf32>
    %305 = tpu.matmul %302, %304, %cst_249 {dimension_numbers = #tpu.dot_dimension_numbers<[1], [0], [0], [1], [0, 0, 1, 1], [], []>} : vector<60x64xbf16>, vector<64x64xbf16>, vector<60x64xf32> -> vector<60x64xf32>
    %306 = arith.addf %300, %305 : vector<60x64xf32>
    %c8_250 = arith.constant 8 : index
    %c0_251 = arith.constant 0 : index
    %307 = vector.load %arg11[%c8_250, %c0_251] : memref<78x64xf32, #tpu.memory_space<vmem>>, vector<60x64xf32>
    %308 = arith.truncf %307 : vector<60x64xf32> to vector<60x64xbf16>
    %c5_252 = arith.constant 5 : index
    %c0_253 = arith.constant 0 : index
    %c0_254 = arith.constant 0 : index
    %309 = vector.load %arg4[%c5_252, %c0_253, %c0_254] : memref<9x64x64xbf16, #tpu.memory_space<vmem>>, vector<1x64x64xbf16>
    %310 = vector.shape_cast %309 : vector<1x64x64xbf16> to vector<64x64xbf16>
    %cst_255 = arith.constant dense<0.000000e+00> : vector<60x64xf32>
    %311 = tpu.matmul %308, %310, %cst_255 {dimension_numbers = #tpu.dot_dimension_numbers<[1], [0], [0], [1], [0, 0, 1, 1], [], []>} : vector<60x64xbf16>, vector<64x64xbf16>, vector<60x64xf32> -> vector<60x64xf32>
    %312 = arith.addf %306, %311 : vector<60x64xf32>
    %c12_256 = arith.constant 12 : index
    %c0_257 = arith.constant 0 : index
    %313 = vector.load %arg11[%c12_256, %c0_257] : memref<78x64xf32, #tpu.memory_space<vmem>>, vector<60x64xf32>
    %314 = arith.truncf %313 : vector<60x64xf32> to vector<60x64xbf16>
    %c6_258 = arith.constant 6 : index
    %c0_259 = arith.constant 0 : index
    %c0_260 = arith.constant 0 : index
    %315 = vector.load %arg4[%c6_258, %c0_259, %c0_260] : memref<9x64x64xbf16, #tpu.memory_space<vmem>>, vector<1x64x64xbf16>
    %316 = vector.shape_cast %315 : vector<1x64x64xbf16> to vector<64x64xbf16>
    %cst_261 = arith.constant dense<0.000000e+00> : vector<60x64xf32>
    %317 = tpu.matmul %314, %316, %cst_261 {dimension_numbers = #tpu.dot_dimension_numbers<[1], [0], [0], [1], [0, 0, 1, 1], [], []>} : vector<60x64xbf16>, vector<64x64xbf16>, vector<60x64xf32> -> vector<60x64xf32>
    %318 = arith.addf %312, %317 : vector<60x64xf32>
    %c13_262 = arith.constant 13 : index
    %c0_263 = arith.constant 0 : index
    %319 = vector.load %arg11[%c13_262, %c0_263] : memref<78x64xf32, #tpu.memory_space<vmem>>, vector<60x64xf32>
    %320 = arith.truncf %319 : vector<60x64xf32> to vector<60x64xbf16>
    %c7_264 = arith.constant 7 : index
    %c0_265 = arith.constant 0 : index
    %c0_266 = arith.constant 0 : index
    %321 = vector.load %arg4[%c7_264, %c0_265, %c0_266] : memref<9x64x64xbf16, #tpu.memory_space<vmem>>, vector<1x64x64xbf16>
    %322 = vector.shape_cast %321 : vector<1x64x64xbf16> to vector<64x64xbf16>
    %cst_267 = arith.constant dense<0.000000e+00> : vector<60x64xf32>
    %323 = tpu.matmul %320, %322, %cst_267 {dimension_numbers = #tpu.dot_dimension_numbers<[1], [0], [0], [1], [0, 0, 1, 1], [], []>} : vector<60x64xbf16>, vector<64x64xbf16>, vector<60x64xf32> -> vector<60x64xf32>
    %324 = arith.addf %318, %323 : vector<60x64xf32>
    %c14 = arith.constant 14 : index
    %c0_268 = arith.constant 0 : index
    %325 = vector.load %arg11[%c14, %c0_268] : memref<78x64xf32, #tpu.memory_space<vmem>>, vector<60x64xf32>
    %326 = arith.truncf %325 : vector<60x64xf32> to vector<60x64xbf16>
    %c8_269 = arith.constant 8 : index
    %c0_270 = arith.constant 0 : index
    %c0_271 = arith.constant 0 : index
    %327 = vector.load %arg4[%c8_269, %c0_270, %c0_271] : memref<9x64x64xbf16, #tpu.memory_space<vmem>>, vector<1x64x64xbf16>
    %328 = vector.shape_cast %327 : vector<1x64x64xbf16> to vector<64x64xbf16>
    %cst_272 = arith.constant dense<0.000000e+00> : vector<60x64xf32>
    %329 = tpu.matmul %326, %328, %cst_272 {dimension_numbers = #tpu.dot_dimension_numbers<[1], [0], [0], [1], [0, 0, 1, 1], [], []>} : vector<60x64xbf16>, vector<64x64xbf16>, vector<60x64xf32> -> vector<60x64xf32>
    %330 = arith.addf %324, %329 : vector<60x64xf32>
    %331 = vector.broadcast %275 : vector<1x64xf32> to vector<60x64xf32>
    %332 = arith.addf %330, %331 : vector<60x64xf32>
    %cst_273 = arith.constant 0.000000e+00 : f32
    %333 = vector.broadcast %cst_273 : f32 to vector<60x64xf32>
    %334 = arith.maximumf %332, %333 : vector<60x64xf32>
    %c0_274 = arith.constant 0 : index
    %c0_275 = arith.constant 0 : index
    %335 = vector.load %arg12[%c0_274, %c0_275] : memref<60x64xf32, #tpu.memory_space<vmem>>, vector<60x64xf32>
    tpu.vector_store %arg12[%c0_274, %c0_275], %334 {strides = array<i32>} : memref<60x64xf32, #tpu.memory_space<vmem>>, vector<60x64xf32>,
    %c0_276 = arith.constant 0 : index
    %c0_277 = arith.constant 0 : index
    %336 = tpu.strided_load %arg12[%c0_276, %c0_277] {strides = array<i32: 2, 1>} : memref<60x64xf32, #tpu.memory_space<vmem>>, vector<2x64xf32>
    %c1_278 = arith.constant 1 : index
    %c0_279 = arith.constant 0 : index
    %337 = tpu.strided_load %arg12[%c1_278, %c0_279] {strides = array<i32: 2, 1>} : memref<60x64xf32, #tpu.memory_space<vmem>>, vector<2x64xf32>
    %c6_280 = arith.constant 6 : index
    %c0_281 = arith.constant 0 : index
    %338 = tpu.strided_load %arg12[%c6_280, %c0_281] {strides = array<i32: 2, 1>} : memref<60x64xf32, #tpu.memory_space<vmem>>, vector<2x64xf32>
    %c7_282 = arith.constant 7 : index
    %c0_283 = arith.constant 0 : index
    %339 = tpu.strided_load %arg12[%c7_282, %c0_283] {strides = array<i32: 2, 1>} : memref<60x64xf32, #tpu.memory_space<vmem>>, vector<2x64xf32>
    %340 = arith.maximumf %336, %337 : vector<2x64xf32>
    %341 = arith.maximumf %338, %339 : vector<2x64xf32>
    %342 = arith.maximumf %340, %341 : vector<2x64xf32>
    %c5_284 = arith.constant 5 : index
    %c0_285 = arith.constant 0 : index
    %343 = vector.load %arg13[%c5_284, %c0_285] : memref<36x64xf32, #tpu.memory_space<vmem>>, vector<2x64xf32>
    tpu.vector_store %arg13[%c5_284, %c0_285], %342 {strides = array<i32>} : memref<36x64xf32, #tpu.memory_space<vmem>>, vector<2x64xf32>,
    %c12_286 = arith.constant 12 : index
    %c0_287 = arith.constant 0 : index
    %344 = tpu.strided_load %arg12[%c12_286, %c0_287] {strides = array<i32: 2, 1>} : memref<60x64xf32, #tpu.memory_space<vmem>>, vector<2x64xf32>
    %c13_288 = arith.constant 13 : index
    %c0_289 = arith.constant 0 : index
    %345 = tpu.strided_load %arg12[%c13_288, %c0_289] {strides = array<i32: 2, 1>} : memref<60x64xf32, #tpu.memory_space<vmem>>, vector<2x64xf32>
    %c18 = arith.constant 18 : index
    %c0_290 = arith.constant 0 : index
    %346 = tpu.strided_load %arg12[%c18, %c0_290] {strides = array<i32: 2, 1>} : memref<60x64xf32, #tpu.memory_space<vmem>>, vector<2x64xf32>
    %c19_291 = arith.constant 19 : index
    %c0_292 = arith.constant 0 : index
    %347 = tpu.strided_load %arg12[%c19_291, %c0_292] {strides = array<i32: 2, 1>} : memref<60x64xf32, #tpu.memory_space<vmem>>, vector<2x64xf32>
    %348 = arith.maximumf %344, %345 : vector<2x64xf32>
    %349 = arith.maximumf %346, %347 : vector<2x64xf32>
    %350 = arith.maximumf %348, %349 : vector<2x64xf32>
    %c9 = arith.constant 9 : index
    %c0_293 = arith.constant 0 : index
    %351 = vector.load %arg13[%c9, %c0_293] : memref<36x64xf32, #tpu.memory_space<vmem>>, vector<2x64xf32>
    tpu.vector_store %arg13[%c9, %c0_293], %350 {strides = array<i32>} : memref<36x64xf32, #tpu.memory_space<vmem>>, vector<2x64xf32>,
    %c36 = arith.constant 36 : index
    %c0_294 = arith.constant 0 : index
    %352 = tpu.strided_load %arg12[%c36, %c0_294] {strides = array<i32: 2, 1>} : memref<60x64xf32, #tpu.memory_space<vmem>>, vector<2x64xf32>
    %c37 = arith.constant 37 : index
    %c0_295 = arith.constant 0 : index
    %353 = tpu.strided_load %arg12[%c37, %c0_295] {strides = array<i32: 2, 1>} : memref<60x64xf32, #tpu.memory_space<vmem>>, vector<2x64xf32>
    %c42 = arith.constant 42 : index
    %c0_296 = arith.constant 0 : index
    %354 = tpu.strided_load %arg12[%c42, %c0_296] {strides = array<i32: 2, 1>} : memref<60x64xf32, #tpu.memory_space<vmem>>, vector<2x64xf32>
    %c43_297 = arith.constant 43 : index
    %c0_298 = arith.constant 0 : index
    %355 = tpu.strided_load %arg12[%c43_297, %c0_298] {strides = array<i32: 2, 1>} : memref<60x64xf32, #tpu.memory_space<vmem>>, vector<2x64xf32>
    %356 = arith.maximumf %352, %353 : vector<2x64xf32>
    %357 = arith.maximumf %354, %355 : vector<2x64xf32>
    %358 = arith.maximumf %356, %357 : vector<2x64xf32>
    %c21_299 = arith.constant 21 : index
    %c0_300 = arith.constant 0 : index
    %359 = vector.load %arg13[%c21_299, %c0_300] : memref<36x64xf32, #tpu.memory_space<vmem>>, vector<2x64xf32>
    tpu.vector_store %arg13[%c21_299, %c0_300], %358 {strides = array<i32>} : memref<36x64xf32, #tpu.memory_space<vmem>>, vector<2x64xf32>,
    %c48_301 = arith.constant 48 : index
    %c0_302 = arith.constant 0 : index
    %360 = tpu.strided_load %arg12[%c48_301, %c0_302] {strides = array<i32: 2, 1>} : memref<60x64xf32, #tpu.memory_space<vmem>>, vector<2x64xf32>
    %c49_303 = arith.constant 49 : index
    %c0_304 = arith.constant 0 : index
    %361 = tpu.strided_load %arg12[%c49_303, %c0_304] {strides = array<i32: 2, 1>} : memref<60x64xf32, #tpu.memory_space<vmem>>, vector<2x64xf32>
    %c54 = arith.constant 54 : index
    %c0_305 = arith.constant 0 : index
    %362 = tpu.strided_load %arg12[%c54, %c0_305] {strides = array<i32: 2, 1>} : memref<60x64xf32, #tpu.memory_space<vmem>>, vector<2x64xf32>
    %c55_306 = arith.constant 55 : index
    %c0_307 = arith.constant 0 : index
    %363 = tpu.strided_load %arg12[%c55_306, %c0_307] {strides = array<i32: 2, 1>} : memref<60x64xf32, #tpu.memory_space<vmem>>, vector<2x64xf32>
    %364 = arith.maximumf %360, %361 : vector<2x64xf32>
    %365 = arith.maximumf %362, %363 : vector<2x64xf32>
    %366 = arith.maximumf %364, %365 : vector<2x64xf32>
    %c25_308 = arith.constant 25 : index
    %c0_309 = arith.constant 0 : index
    %367 = vector.load %arg13[%c25_308, %c0_309] : memref<36x64xf32, #tpu.memory_space<vmem>>, vector<2x64xf32>
    tpu.vector_store %arg13[%c25_308, %c0_309], %366 {strides = array<i32>} : memref<36x64xf32, #tpu.memory_space<vmem>>, vector<2x64xf32>,
    %368 = tpu.iota {dimensions = array<i32: 0>} : vector<8x1xi32>
    %c4_i32 = arith.constant 4 : i32
    %c0_i32 = arith.constant 0 : i32
    %369 = arith.cmpi eq, %c4_i32, %c0_i32 : i32
    %c1_i32 = arith.constant 1 : i32
    %370 = arith.select %369, %c1_i32, %c4_i32 : i32
    %371 = vector.broadcast %370 : i32 to vector<8x1xi32>
    %372 = arith.remsi %368, %371 : vector<8x1xi32>
    %c0_i32_310 = arith.constant 0 : i32
    %373 = vector.broadcast %c0_i32_310 : i32 to vector<8x1xi32>
    %374 = arith.cmpi ne, %372, %373 : vector<8x1xi32>
    %c0_i32_311 = arith.constant 0 : i32
    %375 = vector.broadcast %c0_i32_311 : i32 to vector<8x1xi32>
    %376 = arith.cmpi slt, %372, %375 : vector<8x1xi32>
    %c0_i32_312 = arith.constant 0 : i32
    %377 = arith.cmpi slt, %370, %c0_i32_312 : i32
    %378 = vector.broadcast %377 : i1 to vector<8x1xi1>
    %379 = vector.broadcast %378 : vector<8x1xi1> to vector<8x1xi1>
    %380 = arith.xori %376, %379 : vector<8x1xi1>
    %381 = arith.andi %380, %374 : vector<8x1xi1>
    %382 = vector.broadcast %370 : i32 to vector<8x1xi32>
    %383 = arith.addi %372, %382 : vector<8x1xi32>
    %384 = arith.select %381, %383, %372 : vector<8x1xi1>, vector<8x1xi32>
    %c2_i32 = arith.constant 2 : i32
    %385 = vector.broadcast %c2_i32 : i32 to vector<8x1xi32>
    %386 = arith.cmpi slt, %384, %385 : vector<8x1xi32>
    %387 = arith.extui %386 : vector<8x1xi1> to vector<8x1xi32>
    %388 = arith.sitofp %387 : vector<8x1xi32> to vector<8x1xf32>
    %c3_313 = arith.constant 3 : index
    %c0_314 = arith.constant 0 : index
    %389 = vector.load %arg6[%c3_313, %c0_314] : memref<4x64xf32, #tpu.memory_space<vmem>>, vector<1x64xf32>
    %cst_315 = arith.constant 0.000000e+00 : f32
    %390 = vector.broadcast %cst_315 : f32 to vector<8x64xf32>
    %c0_316 = arith.constant 0 : index
    %c0_317 = arith.constant 0 : index
    %391 = vector.load %arg13[%c0_316, %c0_317] : memref<36x64xf32, #tpu.memory_space<vmem>>, vector<8x64xf32>
    %392 = arith.truncf %391 : vector<8x64xf32> to vector<8x64xbf16>
    %c0_318 = arith.constant 0 : index
    %c0_319 = arith.constant 0 : index
    %c0_320 = arith.constant 0 : index
    %393 = vector.load %arg5[%c0_318, %c0_319, %c0_320] : memref<9x64x64xbf16, #tpu.memory_space<vmem>>, vector<1x64x64xbf16>
    %394 = vector.shape_cast %393 : vector<1x64x64xbf16> to vector<64x64xbf16>
    %cst_321 = arith.constant dense<0.000000e+00> : vector<8x64xf32>
    %395 = tpu.matmul %392, %394, %cst_321 {dimension_numbers = #tpu.dot_dimension_numbers<[1], [0], [0], [1], [0, 0, 1, 1], [], []>} : vector<8x64xbf16>, vector<64x64xbf16>, vector<8x64xf32> -> vector<8x64xf32>
    %396 = arith.addf %390, %395 : vector<8x64xf32>
    %c1_322 = arith.constant 1 : index
    %c0_323 = arith.constant 0 : index
    %397 = vector.load %arg13[%c1_322, %c0_323] : memref<36x64xf32, #tpu.memory_space<vmem>>, vector<8x64xf32>
    %398 = arith.truncf %397 : vector<8x64xf32> to vector<8x64xbf16>
    %c1_324 = arith.constant 1 : index
    %c0_325 = arith.constant 0 : index
    %c0_326 = arith.constant 0 : index
    %399 = vector.load %arg5[%c1_324, %c0_325, %c0_326] : memref<9x64x64xbf16, #tpu.memory_space<vmem>>, vector<1x64x64xbf16>
    %400 = vector.shape_cast %399 : vector<1x64x64xbf16> to vector<64x64xbf16>
    %cst_327 = arith.constant dense<0.000000e+00> : vector<8x64xf32>
    %401 = tpu.matmul %398, %400, %cst_327 {dimension_numbers = #tpu.dot_dimension_numbers<[1], [0], [0], [1], [0, 0, 1, 1], [], []>} : vector<8x64xbf16>, vector<64x64xbf16>, vector<8x64xf32> -> vector<8x64xf32>
    %402 = arith.addf %396, %401 : vector<8x64xf32>
    %c2_328 = arith.constant 2 : index
    %c0_329 = arith.constant 0 : index
    %403 = vector.load %arg13[%c2_328, %c0_329] : memref<36x64xf32, #tpu.memory_space<vmem>>, vector<8x64xf32>
    %404 = arith.truncf %403 : vector<8x64xf32> to vector<8x64xbf16>
    %c2_330 = arith.constant 2 : index
    %c0_331 = arith.constant 0 : index
    %c0_332 = arith.constant 0 : index
    %405 = vector.load %arg5[%c2_330, %c0_331, %c0_332] : memref<9x64x64xbf16, #tpu.memory_space<vmem>>, vector<1x64x64xbf16>
    %406 = vector.shape_cast %405 : vector<1x64x64xbf16> to vector<64x64xbf16>
    %cst_333 = arith.constant dense<0.000000e+00> : vector<8x64xf32>
    %407 = tpu.matmul %404, %406, %cst_333 {dimension_numbers = #tpu.dot_dimension_numbers<[1], [0], [0], [1], [0, 0, 1, 1], [], []>} : vector<8x64xbf16>, vector<64x64xbf16>, vector<8x64xf32> -> vector<8x64xf32>
    %408 = arith.addf %402, %407 : vector<8x64xf32>
    %c4_334 = arith.constant 4 : index
    %c0_335 = arith.constant 0 : index
    %409 = vector.load %arg13[%c4_334, %c0_335] : memref<36x64xf32, #tpu.memory_space<vmem>>, vector<8x64xf32>
    %410 = arith.truncf %409 : vector<8x64xf32> to vector<8x64xbf16>
    %c3_336 = arith.constant 3 : index
    %c0_337 = arith.constant 0 : index
    %c0_338 = arith.constant 0 : index
    %411 = vector.load %arg5[%c3_336, %c0_337, %c0_338] : memref<9x64x64xbf16, #tpu.memory_space<vmem>>, vector<1x64x64xbf16>
    %412 = vector.shape_cast %411 : vector<1x64x64xbf16> to vector<64x64xbf16>
    %cst_339 = arith.constant dense<0.000000e+00> : vector<8x64xf32>
    %413 = tpu.matmul %410, %412, %cst_339 {dimension_numbers = #tpu.dot_dimension_numbers<[1], [0], [0], [1], [0, 0, 1, 1], [], []>} : vector<8x64xbf16>, vector<64x64xbf16>, vector<8x64xf32> -> vector<8x64xf32>
    %414 = arith.addf %408, %413 : vector<8x64xf32>
    %c5_340 = arith.constant 5 : index
    %c0_341 = arith.constant 0 : index
    %415 = vector.load %arg13[%c5_340, %c0_341] : memref<36x64xf32, #tpu.memory_space<vmem>>, vector<8x64xf32>
    %416 = arith.truncf %415 : vector<8x64xf32> to vector<8x64xbf16>
    %c4_342 = arith.constant 4 : index
    %c0_343 = arith.constant 0 : index
    %c0_344 = arith.constant 0 : index
    %417 = vector.load %arg5[%c4_342, %c0_343, %c0_344] : memref<9x64x64xbf16, #tpu.memory_space<vmem>>, vector<1x64x64xbf16>
    %418 = vector.shape_cast %417 : vector<1x64x64xbf16> to vector<64x64xbf16>
    %cst_345 = arith.constant dense<0.000000e+00> : vector<8x64xf32>
    %419 = tpu.matmul %416, %418, %cst_345 {dimension_numbers = #tpu.dot_dimension_numbers<[1], [0], [0], [1], [0, 0, 1, 1], [], []>} : vector<8x64xbf16>, vector<64x64xbf16>, vector<8x64xf32> -> vector<8x64xf32>
    %420 = arith.addf %414, %419 : vector<8x64xf32>
    %c6_346 = arith.constant 6 : index
    %c0_347 = arith.constant 0 : index
    %421 = vector.load %arg13[%c6_346, %c0_347] : memref<36x64xf32, #tpu.memory_space<vmem>>, vector<8x64xf32>
    %422 = arith.truncf %421 : vector<8x64xf32> to vector<8x64xbf16>
    %c5_348 = arith.constant 5 : index
    %c0_349 = arith.constant 0 : index
    %c0_350 = arith.constant 0 : index
    %423 = vector.load %arg5[%c5_348, %c0_349, %c0_350] : memref<9x64x64xbf16, #tpu.memory_space<vmem>>, vector<1x64x64xbf16>
    %424 = vector.shape_cast %423 : vector<1x64x64xbf16> to vector<64x64xbf16>
    %cst_351 = arith.constant dense<0.000000e+00> : vector<8x64xf32>
    %425 = tpu.matmul %422, %424, %cst_351 {dimension_numbers = #tpu.dot_dimension_numbers<[1], [0], [0], [1], [0, 0, 1, 1], [], []>} : vector<8x64xbf16>, vector<64x64xbf16>, vector<8x64xf32> -> vector<8x64xf32>
    %426 = arith.addf %420, %425 : vector<8x64xf32>
    %c8_352 = arith.constant 8 : index
    %c0_353 = arith.constant 0 : index
    %427 = vector.load %arg13[%c8_352, %c0_353] : memref<36x64xf32, #tpu.memory_space<vmem>>, vector<8x64xf32>
    %428 = arith.truncf %427 : vector<8x64xf32> to vector<8x64xbf16>
    %c6_354 = arith.constant 6 : index
    %c0_355 = arith.constant 0 : index
    %c0_356 = arith.constant 0 : index
    %429 = vector.load %arg5[%c6_354, %c0_355, %c0_356] : memref<9x64x64xbf16, #tpu.memory_space<vmem>>, vector<1x64x64xbf16>
    %430 = vector.shape_cast %429 : vector<1x64x64xbf16> to vector<64x64xbf16>
    %cst_357 = arith.constant dense<0.000000e+00> : vector<8x64xf32>
    %431 = tpu.matmul %428, %430, %cst_357 {dimension_numbers = #tpu.dot_dimension_numbers<[1], [0], [0], [1], [0, 0, 1, 1], [], []>} : vector<8x64xbf16>, vector<64x64xbf16>, vector<8x64xf32> -> vector<8x64xf32>
    %432 = arith.addf %426, %431 : vector<8x64xf32>
    %c9_358 = arith.constant 9 : index
    %c0_359 = arith.constant 0 : index
    %433 = vector.load %arg13[%c9_358, %c0_359] : memref<36x64xf32, #tpu.memory_space<vmem>>, vector<8x64xf32>
    %434 = arith.truncf %433 : vector<8x64xf32> to vector<8x64xbf16>
    %c7_360 = arith.constant 7 : index
    %c0_361 = arith.constant 0 : index
    %c0_362 = arith.constant 0 : index
    %435 = vector.load %arg5[%c7_360, %c0_361, %c0_362] : memref<9x64x64xbf16, #tpu.memory_space<vmem>>, vector<1x64x64xbf16>
    %436 = vector.shape_cast %435 : vector<1x64x64xbf16> to vector<64x64xbf16>
    %cst_363 = arith.constant dense<0.000000e+00> : vector<8x64xf32>
    %437 = tpu.matmul %434, %436, %cst_363 {dimension_numbers = #tpu.dot_dimension_numbers<[1], [0], [0], [1], [0, 0, 1, 1], [], []>} : vector<8x64xbf16>, vector<64x64xbf16>, vector<8x64xf32> -> vector<8x64xf32>
    %438 = arith.addf %432, %437 : vector<8x64xf32>
    %c10_364 = arith.constant 10 : index
    %c0_365 = arith.constant 0 : index
    %439 = vector.load %arg13[%c10_364, %c0_365] : memref<36x64xf32, #tpu.memory_space<vmem>>, vector<8x64xf32>
    %440 = arith.truncf %439 : vector<8x64xf32> to vector<8x64xbf16>
    %c8_366 = arith.constant 8 : index
    %c0_367 = arith.constant 0 : index
    %c0_368 = arith.constant 0 : index
    %441 = vector.load %arg5[%c8_366, %c0_367, %c0_368] : memref<9x64x64xbf16, #tpu.memory_space<vmem>>, vector<1x64x64xbf16>
    %442 = vector.shape_cast %441 : vector<1x64x64xbf16> to vector<64x64xbf16>
    %cst_369 = arith.constant dense<0.000000e+00> : vector<8x64xf32>
    %443 = tpu.matmul %440, %442, %cst_369 {dimension_numbers = #tpu.dot_dimension_numbers<[1], [0], [0], [1], [0, 0, 1, 1], [], []>} : vector<8x64xbf16>, vector<64x64xbf16>, vector<8x64xf32> -> vector<8x64xf32>
    %444 = arith.addf %438, %443 : vector<8x64xf32>
    %445 = vector.broadcast %389 : vector<1x64xf32> to vector<8x64xf32>
    %446 = arith.addf %444, %445 : vector<8x64xf32>
    %cst_370 = arith.constant 0.000000e+00 : f32
    %447 = vector.broadcast %cst_370 : f32 to vector<8x64xf32>
    %448 = arith.maximumf %446, %447 : vector<8x64xf32>
    %449 = vector.broadcast %388 : vector<8x1xf32> to vector<8x64xf32>
    %450 = arith.mulf %448, %449 : vector<8x64xf32>
    %cst_371 = arith.constant dense<0.000000e+00> : vector<64xf32>
    %451 = vector.multi_reduction <add>, %450, %cst_371 [0] : vector<8x64xf32> to vector<64xf32>
    %452 = vector.shape_cast %451 : vector<64xf32> to vector<1x64xf32>
    %cst_372 = arith.constant 2.500000e-01 : f32
    %453 = vector.broadcast %cst_372 : f32 to vector<1x64xf32>
    %454 = arith.mulf %452, %453 : vector<1x64xf32>
    %c0_373 = arith.constant 0 : index
    %c0_374 = arith.constant 0 : index
    %455 = vector.load %arg7[%c0_373, %c0_374] : memref<2x64xf32, #tpu.memory_space<vmem>>, vector<1x64xf32>
    tpu.vector_store %arg7[%c0_373, %c0_374], %454 {strides = array<i32>} : memref<2x64xf32, #tpu.memory_space<vmem>>, vector<1x64xf32>,
    %cst_375 = arith.constant 0.000000e+00 : f32
    %456 = vector.broadcast %cst_375 : f32 to vector<8x64xf32>
    %c16_376 = arith.constant 16 : index
    %c0_377 = arith.constant 0 : index
    %457 = vector.load %arg13[%c16_376, %c0_377] : memref<36x64xf32, #tpu.memory_space<vmem>>, vector<8x64xf32>
    %458 = arith.truncf %457 : vector<8x64xf32> to vector<8x64xbf16>
    %c0_378 = arith.constant 0 : index
    %c0_379 = arith.constant 0 : index
    %c0_380 = arith.constant 0 : index
    %459 = vector.load %arg5[%c0_378, %c0_379, %c0_380] : memref<9x64x64xbf16, #tpu.memory_space<vmem>>, vector<1x64x64xbf16>
    %460 = vector.shape_cast %459 : vector<1x64x64xbf16> to vector<64x64xbf16>
    %cst_381 = arith.constant dense<0.000000e+00> : vector<8x64xf32>
    %461 = tpu.matmul %458, %460, %cst_381 {dimension_numbers = #tpu.dot_dimension_numbers<[1], [0], [0], [1], [0, 0, 1, 1], [], []>} : vector<8x64xbf16>, vector<64x64xbf16>, vector<8x64xf32> -> vector<8x64xf32>
    %462 = arith.addf %456, %461 : vector<8x64xf32>
    %c17_382 = arith.constant 17 : index
    %c0_383 = arith.constant 0 : index
    %463 = vector.load %arg13[%c17_382, %c0_383] : memref<36x64xf32, #tpu.memory_space<vmem>>, vector<8x64xf32>
    %464 = arith.truncf %463 : vector<8x64xf32> to vector<8x64xbf16>
    %c1_384 = arith.constant 1 : index
    %c0_385 = arith.constant 0 : index
    %c0_386 = arith.constant 0 : index
    %465 = vector.load %arg5[%c1_384, %c0_385, %c0_386] : memref<9x64x64xbf16, #tpu.memory_space<vmem>>, vector<1x64x64xbf16>
    %466 = vector.shape_cast %465 : vector<1x64x64xbf16> to vector<64x64xbf16>
    %cst_387 = arith.constant dense<0.000000e+00> : vector<8x64xf32>
    %467 = tpu.matmul %464, %466, %cst_387 {dimension_numbers = #tpu.dot_dimension_numbers<[1], [0], [0], [1], [0, 0, 1, 1], [], []>} : vector<8x64xbf16>, vector<64x64xbf16>, vector<8x64xf32> -> vector<8x64xf32>
    %468 = arith.addf %462, %467 : vector<8x64xf32>
    %c18_388 = arith.constant 18 : index
    %c0_389 = arith.constant 0 : index
    %469 = vector.load %arg13[%c18_388, %c0_389] : memref<36x64xf32, #tpu.memory_space<vmem>>, vector<8x64xf32>
    %470 = arith.truncf %469 : vector<8x64xf32> to vector<8x64xbf16>
    %c2_390 = arith.constant 2 : index
    %c0_391 = arith.constant 0 : index
    %c0_392 = arith.constant 0 : index
    %471 = vector.load %arg5[%c2_390, %c0_391, %c0_392] : memref<9x64x64xbf16, #tpu.memory_space<vmem>>, vector<1x64x64xbf16>
    %472 = vector.shape_cast %471 : vector<1x64x64xbf16> to vector<64x64xbf16>
    %cst_393 = arith.constant dense<0.000000e+00> : vector<8x64xf32>
    %473 = tpu.matmul %470, %472, %cst_393 {dimension_numbers = #tpu.dot_dimension_numbers<[1], [0], [0], [1], [0, 0, 1, 1], [], []>} : vector<8x64xbf16>, vector<64x64xbf16>, vector<8x64xf32> -> vector<8x64xf32>
    %474 = arith.addf %468, %473 : vector<8x64xf32>
    %c20_394 = arith.constant 20 : index
    %c0_395 = arith.constant 0 : index
    %475 = vector.load %arg13[%c20_394, %c0_395] : memref<36x64xf32, #tpu.memory_space<vmem>>, vector<8x64xf32>
    %476 = arith.truncf %475 : vector<8x64xf32> to vector<8x64xbf16>
    %c3_396 = arith.constant 3 : index
    %c0_397 = arith.constant 0 : index
    %c0_398 = arith.constant 0 : index
    %477 = vector.load %arg5[%c3_396, %c0_397, %c0_398] : memref<9x64x64xbf16, #tpu.memory_space<vmem>>, vector<1x64x64xbf16>
    %478 = vector.shape_cast %477 : vector<1x64x64xbf16> to vector<64x64xbf16>
    %cst_399 = arith.constant dense<0.000000e+00> : vector<8x64xf32>
    %479 = tpu.matmul %476, %478, %cst_399 {dimension_numbers = #tpu.dot_dimension_numbers<[1], [0], [0], [1], [0, 0, 1, 1], [], []>} : vector<8x64xbf16>, vector<64x64xbf16>, vector<8x64xf32> -> vector<8x64xf32>
    %480 = arith.addf %474, %479 : vector<8x64xf32>
    %c21_400 = arith.constant 21 : index
    %c0_401 = arith.constant 0 : index
    %481 = vector.load %arg13[%c21_400, %c0_401] : memref<36x64xf32, #tpu.memory_space<vmem>>, vector<8x64xf32>
    %482 = arith.truncf %481 : vector<8x64xf32> to vector<8x64xbf16>
    %c4_402 = arith.constant 4 : index
    %c0_403 = arith.constant 0 : index
    %c0_404 = arith.constant 0 : index
    %483 = vector.load %arg5[%c4_402, %c0_403, %c0_404] : memref<9x64x64xbf16, #tpu.memory_space<vmem>>, vector<1x64x64xbf16>
    %484 = vector.shape_cast %483 : vector<1x64x64xbf16> to vector<64x64xbf16>
    %cst_405 = arith.constant dense<0.000000e+00> : vector<8x64xf32>
    %485 = tpu.matmul %482, %484, %cst_405 {dimension_numbers = #tpu.dot_dimension_numbers<[1], [0], [0], [1], [0, 0, 1, 1], [], []>} : vector<8x64xbf16>, vector<64x64xbf16>, vector<8x64xf32> -> vector<8x64xf32>
    %486 = arith.addf %480, %485 : vector<8x64xf32>
    %c22_406 = arith.constant 22 : index
    %c0_407 = arith.constant 0 : index
    %487 = vector.load %arg13[%c22_406, %c0_407] : memref<36x64xf32, #tpu.memory_space<vmem>>, vector<8x64xf32>
    %488 = arith.truncf %487 : vector<8x64xf32> to vector<8x64xbf16>
    %c5_408 = arith.constant 5 : index
    %c0_409 = arith.constant 0 : index
    %c0_410 = arith.constant 0 : index
    %489 = vector.load %arg5[%c5_408, %c0_409, %c0_410] : memref<9x64x64xbf16, #tpu.memory_space<vmem>>, vector<1x64x64xbf16>
    %490 = vector.shape_cast %489 : vector<1x64x64xbf16> to vector<64x64xbf16>
    %cst_411 = arith.constant dense<0.000000e+00> : vector<8x64xf32>
    %491 = tpu.matmul %488, %490, %cst_411 {dimension_numbers = #tpu.dot_dimension_numbers<[1], [0], [0], [1], [0, 0, 1, 1], [], []>} : vector<8x64xbf16>, vector<64x64xbf16>, vector<8x64xf32> -> vector<8x64xf32>
    %492 = arith.addf %486, %491 : vector<8x64xf32>
    %c24 = arith.constant 24 : index
    %c0_412 = arith.constant 0 : index
    %493 = vector.load %arg13[%c24, %c0_412] : memref<36x64xf32, #tpu.memory_space<vmem>>, vector<8x64xf32>
    %494 = arith.truncf %493 : vector<8x64xf32> to vector<8x64xbf16>
    %c6_413 = arith.constant 6 : index
    %c0_414 = arith.constant 0 : index
    %c0_415 = arith.constant 0 : index
    %495 = vector.load %arg5[%c6_413, %c0_414, %c0_415] : memref<9x64x64xbf16, #tpu.memory_space<vmem>>, vector<1x64x64xbf16>
    %496 = vector.shape_cast %495 : vector<1x64x64xbf16> to vector<64x64xbf16>
    %cst_416 = arith.constant dense<0.000000e+00> : vector<8x64xf32>
    %497 = tpu.matmul %494, %496, %cst_416 {dimension_numbers = #tpu.dot_dimension_numbers<[1], [0], [0], [1], [0, 0, 1, 1], [], []>} : vector<8x64xbf16>, vector<64x64xbf16>, vector<8x64xf32> -> vector<8x64xf32>
    %498 = arith.addf %492, %497 : vector<8x64xf32>
    %c25_417 = arith.constant 25 : index
    %c0_418 = arith.constant 0 : index
    %499 = vector.load %arg13[%c25_417, %c0_418] : memref<36x64xf32, #tpu.memory_space<vmem>>, vector<8x64xf32>
    %500 = arith.truncf %499 : vector<8x64xf32> to vector<8x64xbf16>
    %c7_419 = arith.constant 7 : index
    %c0_420 = arith.constant 0 : index
    %c0_421 = arith.constant 0 : index
    %501 = vector.load %arg5[%c7_419, %c0_420, %c0_421] : memref<9x64x64xbf16, #tpu.memory_space<vmem>>, vector<1x64x64xbf16>
    %502 = vector.shape_cast %501 : vector<1x64x64xbf16> to vector<64x64xbf16>
    %cst_422 = arith.constant dense<0.000000e+00> : vector<8x64xf32>
    %503 = tpu.matmul %500, %502, %cst_422 {dimension_numbers = #tpu.dot_dimension_numbers<[1], [0], [0], [1], [0, 0, 1, 1], [], []>} : vector<8x64xbf16>, vector<64x64xbf16>, vector<8x64xf32> -> vector<8x64xf32>
    %504 = arith.addf %498, %503 : vector<8x64xf32>
    %c26 = arith.constant 26 : index
    %c0_423 = arith.constant 0 : index
    %505 = vector.load %arg13[%c26, %c0_423] : memref<36x64xf32, #tpu.memory_space<vmem>>, vector<8x64xf32>
    %506 = arith.truncf %505 : vector<8x64xf32> to vector<8x64xbf16>
    %c8_424 = arith.constant 8 : index
    %c0_425 = arith.constant 0 : index
    %c0_426 = arith.constant 0 : index
    %507 = vector.load %arg5[%c8_424, %c0_425, %c0_426] : memref<9x64x64xbf16, #tpu.memory_space<vmem>>, vector<1x64x64xbf16>
    %508 = vector.shape_cast %507 : vector<1x64x64xbf16> to vector<64x64xbf16>
    %cst_427 = arith.constant dense<0.000000e+00> : vector<8x64xf32>
    %509 = tpu.matmul %506, %508, %cst_427 {dimension_numbers = #tpu.dot_dimension_numbers<[1], [0], [0], [1], [0, 0, 1, 1], [], []>} : vector<8x64xbf16>, vector<64x64xbf16>, vector<8x64xf32> -> vector<8x64xf32>
    %510 = arith.addf %504, %509 : vector<8x64xf32>
    %511 = vector.broadcast %389 : vector<1x64xf32> to vector<8x64xf32>
    %512 = arith.addf %510, %511 : vector<8x64xf32>
    %cst_428 = arith.constant 0.000000e+00 : f32
    %513 = vector.broadcast %cst_428 : f32 to vector<8x64xf32>
    %514 = arith.maximumf %512, %513 : vector<8x64xf32>
    %515 = vector.broadcast %388 : vector<8x1xf32> to vector<8x64xf32>
    %516 = arith.mulf %514, %515 : vector<8x64xf32>
    %cst_429 = arith.constant dense<0.000000e+00> : vector<64xf32>
    %517 = vector.multi_reduction <add>, %516, %cst_429 [0] : vector<8x64xf32> to vector<64xf32>
    %518 = vector.shape_cast %517 : vector<64xf32> to vector<1x64xf32>
    %cst_430 = arith.constant 2.500000e-01 : f32
    %519 = vector.broadcast %cst_430 : f32 to vector<1x64xf32>
    %520 = arith.mulf %518, %519 : vector<1x64xf32>
    %c1_431 = arith.constant 1 : index
    %c0_432 = arith.constant 0 : index
    %521 = vector.load %arg7[%c1_431, %c0_432] : memref<2x64xf32, #tpu.memory_space<vmem>>, vector<1x64xf32>
    tpu.vector_store %arg7[%c1_431, %c0_432], %520 {strides = array<i32>} : memref<2x64xf32, #tpu.memory_space<vmem>>, vector<1x64xf32>,
    return
  }
  func.func @transform_0(%arg0: i32) -> (i32, i32) {
    %c0_i32 = arith.constant 0 : i32
    %c0_i32_0 = arith.constant 0 : i32
    return %arg0, %c0_i32 : i32, i32
  }
  func.func @transform_1(%arg0: i32) -> (i32, i32) {
    %c0_i32 = arith.constant 0 : i32
    %c0_i32_0 = arith.constant 0 : i32
    %c0_i32_1 = arith.constant 0 : i32
    return %c0_i32, %c0_i32_0 : i32, i32
  }
  func.func @transform_2(%arg0: i32) -> (i32, i32, i32) {
    %c0_i32 = arith.constant 0 : i32
    %c0_i32_0 = arith.constant 0 : i32
    %c0_i32_1 = arith.constant 0 : i32
    %c0_i32_2 = arith.constant 0 : i32
    return %c0_i32, %c0_i32_0, %c0_i32_1 : i32, i32, i32
  }
  func.func @transform_3(%arg0: i32) -> (i32, i32, i32) {
    %c0_i32 = arith.constant 0 : i32
    %c0_i32_0 = arith.constant 0 : i32
    %c0_i32_1 = arith.constant 0 : i32
    %c0_i32_2 = arith.constant 0 : i32
    return %c0_i32, %c0_i32_0, %c0_i32_1 : i32, i32, i32
  }
  func.func @transform_4(%arg0: i32) -> (i32, i32, i32) {
    %c0_i32 = arith.constant 0 : i32
    %c0_i32_0 = arith.constant 0 : i32
    %c0_i32_1 = arith.constant 0 : i32
    %c0_i32_2 = arith.constant 0 : i32
    return %c0_i32, %c0_i32_0, %c0_i32_1 : i32, i32, i32
  }
  func.func @transform_5(%arg0: i32) -> (i32, i32) {
    %c0_i32 = arith.constant 0 : i32
    %c0_i32_0 = arith.constant 0 : i32
    %c0_i32_1 = arith.constant 0 : i32
    return %c0_i32, %c0_i32_0 : i32, i32
  }
  func.func @transform_6(%arg0: i32) -> (i32, i32) {
    %c0_i32 = arith.constant 0 : i32
    %c0_i32_0 = arith.constant 0 : i32
    return %arg0, %c0_i32 : i32, i32
  }
}

</mosaic_0001>

<bundles_post_ra>
// kernel: convnet_forward.1
= control target key start
LH: loop header
LB: loop body
LE: loop exit
PB: predicated region body
PF: predicated region fallthrough
CT: control target
= control target key end

     0   :  { %s7589_s0 = inlined_call_operand.vmem [shape: bf16[512,32], index: 0, kind: input, shape index: {}]   ;;  %s7590_s1 = inlined_call_operand.vmem [shape: bf16[32,64], index: 1, kind: input, shape index: {}]   ;;  %s7591_s2 = inlined_call_operand.vmem [shape: bf16[9,64,64], index: 2, kind: input, shape index: {}]   ;;  %s7592_s3 = inlined_call_operand.vmem [shape: bf16[9,64,64], index: 3, kind: input, shape index: {}]   ;;  %s7593_s4 = inlined_call_operand.vmem [shape: bf16[9,64,64], index: 4, kind: input, shape index: {}]   ;;  %s7594_s5 = inlined_call_operand.vmem [shape: f32[4,64], index: 5, kind: input, shape index: {}]   ;;  %s7595_s6 = inlined_call_operand.hbm [shape: f32[2,64], index: 6, kind: output, shape index: {}]  }
   0x1   :  { %v5829_v0 = vld [vmem:[%s7590_s1 + $0x8] sm:$0xff]  ;;  %v5828_v1 = vld [vmem:[%s7590_s1] sm:$0xff] }
   0x2   :  { %256 = vmatpush.bf16.msra.mxu0 %v5829_v0  ;;  %569 = vmatpush.bf16.msra.mxu1 %v5829_v0 }
   0x3   :  { %11 = vsyncpa [#allocation9], 0  ;;  %v5830_v2 = vld [vmem:[%s7589_s0] sm:$0xff]  ;;  %vm201_vm0 = vcmask 261120   ;;  %v5831_v4 = vld [vmem:[%s7589_s0 + $0x8] sm:$0xff]  ;;  %vm25_vm1 = vcmask 523264  }
   0x4   :  { %v5846_v3 = vld [vmem:[%s7589_s0 + $0x80] sm:$0xff]  ;;  %v5847_v5 = vld [vmem:[%s7589_s0 + $0x88] sm:$0xff]  ;;  %v5832_v6 = vld [vmem:[%s7589_s0 + $0x10] sm:$0xff]  ;;  %v7596_v33 = vmov 0.0   ;;  %vm69_vm2 = vcmask 519168   ;;  %vm63_vm3 = vcmask 521216  }
   0x5   :  { %v5848_v7 = vld [vmem:[%s7589_s0 + $0x90] sm:$0xff]  ;;  %v5833_v8 = vld [vmem:[%s7589_s0 + $0x18] sm:$0xff]  ;;  %v5834_v10 = vld [vmem:[%s7589_s0 + $0x20] sm:$0xff]  ;;  %26 = vst.msk [vmem:[#allocation3] sm:$0xff] %vm25_vm1, %v7596_v33  ;;  %vm52_vm4 = vcmask 517120   ;;  %vm4178_vm6 = vcmask 516096  }
   0x6   :  { %257 = vmatpush.bf16.msra.mxu0 %v5828_v1  ;;  %570 = vmatpush.bf16.msra.mxu1 %v5828_v1  ;;  %v5849_v9 = vld [vmem:[%s7589_s0 + $0x98] sm:$0xff]  ;;  %v5850_v11 = vld [vmem:[%s7589_s0 + $0xa0] sm:$0xff]  ;;  %v5835_v12 = vld [vmem:[%s7589_s0 + $0x28] sm:$0xff]  ;;  %27 = vst.msk [vmem:[#allocation3 + $0x8] sm:$0xff] %vm25_vm1, %v7596_v33  ;;  %s4656_s14 = sshll.u32 %s7595_s6, 4  ;;  %s4657_s14 = int_to_ptr.hbm [resolvable:$true] %s4656_s14 }
   0x7   :  { %v5851_v13 = vld [vmem:[%s7589_s0 + $0xa8] sm:$0xff]  ;;  %v5836_v14 = vld [vmem:[%s7589_s0 + $0x30] sm:$0xff]  ;;  %v5837_v16 = vld [vmem:[%s7589_s0 + $0x38] sm:$0xff]  ;;  %28 = vst.msk [vmem:[#allocation3 + $0x10] sm:$0xff] %vm25_vm1, %v7596_v33 }
   0x8   :  { %v5852_v15 = vld [vmem:[%s7589_s0 + $0xb0] sm:$0xff]  ;;  %v5853_v17 = vld [vmem:[%s7589_s0 + $0xb8] sm:$0xff]  ;;  %v6149_v18 = vld [vmem:[%s7594_s5] ss:$0 sm:$0xff]  ;;  %29 = vst.msk [vmem:[#allocation3 + $0x18] sm:$0xff] %vm25_vm1, %v7596_v33 }
   0x9   :  { %4737 = vmatmul.msk.bf16.vlgmr.msra.gmra.mxu0 %vm201_vm0, %v5830_v2  ;;  %4817 = vmatmul.msk.bf16.vlgmr.msra.gmra.mxu1 %vm201_vm0, %v5846_v3  ;;  %v5838_v19 = vld [vmem:[%s7589_s0 + $0x40] sm:$0xff]  ;;  %v5869_v25 = vld [vmem:[%s7591_s2 + $0x38] sm:$0xff]  ;;  %v5868_v29 = vld [vmem:[%s7591_s2 + $0x30] sm:$0xff]  ;;  %30 = vst.msk [vmem:[#allocation3 + $0x20] sm:$0xff] %vm25_vm1, %v7596_v33 }
   0xa   :  { %v5854_v20 = vld [vmem:[%s7589_s0 + $0xc0] sm:$0xff]  ;;  %v5865_v26 = vld [vmem:[%s7591_s2 + $0x18] sm:$0xff]  ;;  %1059 = vmatpush.bf16.msra.mxu2 %v5869_v25  ;;  %v5864_v30 = vld [vmem:[%s7591_s2 + $0x10] sm:$0xff]  ;;  %31 = vst.msk [vmem:[#allocation3 + $0x28] sm:$0xff] %vm25_vm1, %v7596_v33 }
   0xb   :  { %1187 = vmatpush.bf16.msra.mxu3 %v5865_v26  ;;  %v5867_v36 = vld [vmem:[%s7591_s2 + $0x28] sm:$0xff]  ;;  %v5866_v40 = vld [vmem:[%s7591_s2 + $0x20] sm:$0xff]  ;;  %32 = vst.msk [vmem:[#allocation3 + $0x30] sm:$0xff] %vm25_vm1, %v7596_v33  ;;  %v5840_v56 = vld [vmem:[%s7589_s0 + $0x50] sm:$0xff] }
   0xc   :  { %v5863_v37 = vld [vmem:[%s7591_s2 + $0x8] sm:$0xff]  ;;  %v5862_v41 = vld [vmem:[%s7591_s2] sm:$0xff]  ;;  %33 = vst.msk [vmem:[#allocation3 + $0x38] sm:$0xff] %vm25_vm1, %v7596_v33  ;;  %v5856_v57 = vld [vmem:[%s7589_s0 + $0xd0] sm:$0xff] }
   0xd   :  { %v5839_v42 = vld [vmem:[%s7589_s0 + $0x48] sm:$0xff]  ;;  %34 = vst.msk [vmem:[#allocation3 + $0x40] sm:$0xff] %vm25_vm1, %v7596_v33 }
   0xe   :  { %1060 = vmatpush.bf16.msra.mxu2 %v5868_v29  ;;  %v5855_v43 = vld [vmem:[%s7589_s0 + $0xc8] sm:$0xff]  ;;  %35 = vst.msk [vmem:[#allocation3 + $0x48] sm:$0xff] %vm25_vm1, %v7596_v33 }
   0xf   :  { %1188 = vmatpush.bf16.msra.mxu3 %v5864_v30  ;;  %36 = vst.msk [vmem:[#allocation3 + $0x50] sm:$0xff] %vm25_vm1, %v7596_v33 }
  0x10   :  { %37 = vst.msk [vmem:[#allocation3 + $0x58] sm:$0xff] %vm25_vm1, %v7596_v33 }
  0x11   :  { %38 = vst.msk [vmem:[#allocation3 + $0x60] sm:$0xff] %vm25_vm1, %v7596_v33 }
  0x12   :  { %1061 = vmatpush.bf16.msra.mxu2 %v5867_v36  ;;  %39 = vst.msk [vmem:[#allocation3 + $0x68] sm:$0xff] %vm25_vm1, %v7596_v33 }
  0x13   :  { %1189 = vmatpush.bf16.msra.mxu3 %v5863_v37  ;;  %40 = vst.msk [vmem:[#allocation3 + $0x70] sm:$0xff] %vm25_vm1, %v7596_v33 }
  0x14   :  { %41 = vst.msk [vmem:[#allocation3 + $0x78] sm:$0xff] %vm25_vm1, %v7596_v33 }
  0x15   :  { %42 = vst.msk [vmem:[#allocation3 + $0x80] sm:$0xff] %vm25_vm1, %v7596_v33 }
  0x16   :  { %1062 = vmatpush.bf16.msra.mxu2 %v5866_v40  ;;  %43 = vst.msk [vmem:[#allocation3 + $0x88] sm:$0xff] %vm25_vm1, %v7596_v33 }
  0x17   :  { %1190 = vmatpush.bf16.msra.mxu3 %v5862_v41  ;;  %44 = vst.msk [vmem:[#allocation3 + $0x90] sm:$0xff] %vm25_vm1, %v7596_v33 }
  0x18   :  { %45 = vst.msk [vmem:[#allocation3 + $0x98] sm:$0xff] %vm25_vm1, %v7596_v33 }
  0x19   :  { %4738 = vmatmul.msk.bf16.gmra.mxu0 %vm201_vm0, %v5831_v4  ;;  %4818 = vmatmul.msk.bf16.gmra.mxu1 %vm201_vm0, %v5847_v5  ;;  %46 = vst.msk [vmem:[#allocation3 + $0xa0] sm:$0xff] %vm25_vm1, %v7596_v33 }
  0x1a   :  { %47 = vst.msk [vmem:[#allocation3 + $0xa8] sm:$0xff] %vm25_vm1, %v7596_v33 }
  0x1b   :  { %48 = vst.msk [vmem:[#allocation3 + $0xb0] sm:$0xff] %vm25_vm1, %v7596_v33 }
  0x1c   :  { %49 = vst.msk [vmem:[#allocation3 + $0xb8] sm:$0xff] %vm25_vm1, %v7596_v33 }
  0x1d   :  { %50 = vst.msk [vmem:[#allocation3 + $0xc0] sm:$0xff] %vm25_vm1, %v7596_v33 }
  0x1e   :  { %51 = vst.msk [vmem:[#allocation3 + $0xc8] sm:$0xff] %vm25_vm1, %v7596_v33 }
  0x1f   :  { %54 = vst.msk [vmem:[#allocation5] sm:$0xff] %vm25_vm1, %v7596_v33 }
  0x20   :  { %55 = vst.msk [vmem:[#allocation5 + $0x8] sm:$0xff] %vm25_vm1, %v7596_v33 }
  0x21   :  { %56 = vst.msk [vmem:[#allocation5 + $0x10] sm:$0xff] %vm25_vm1, %v7596_v33 }
  0x22   :  { %57 = vst.msk [vmem:[#allocation5 + $0x18] sm:$0xff] %vm25_vm1, %v7596_v33 }
  0x23   :  { %58 = vst.msk [vmem:[#allocation5 + $0x20] sm:$0xff] %vm25_vm1, %v7596_v33 }
  0x24   :  { %59 = vst.msk [vmem:[#allocation5 + $0x28] sm:$0xff] %vm25_vm1, %v7596_v33 }
  0x25   :  { %60 = vst.msk [vmem:[#allocation5 + $0x30] sm:$0xff] %vm25_vm1, %v7596_v33 }
  0x26   :  { %61 = vst.msk [vmem:[#allocation5 + $0x38] sm:$0xff] %vm25_vm1, %v7596_v33 }
  0x27   :  { %62 = vst.msk [vmem:[#allocation5 + $0x40] sm:$0xff] %vm25_vm1, %v7596_v33 }
  0x28   :  { %65 = vst.msk [vmem:[#allocation7] sm:$0xff] %vm25_vm1, %v7596_v33 }
  0x29   :  { %4739 = vmatmul.msk.bf16.gmra.mxu0 %vm201_vm0, %v5832_v6  ;;  %4819 = vmatmul.msk.bf16.gmra.mxu1 %vm201_vm0, %v5848_v7  ;;  %66 = vst.msk [vmem:[#allocation7 + $0x8] sm:$0xff] %vm25_vm1, %v7596_v33 }
  0x2a   :  { %67 = vst.msk [vmem:[#allocation7 + $0x10] sm:$0xff] %vm25_vm1, %v7596_v33 }
  0x2b   :  { %68 = vst.msk [vmem:[#allocation7 + $0x18] sm:$0xff] %vm25_vm1, %v7596_v33 }
  0x39   :  { %4740 = vmatmul.msk.bf16.gmra.mxu0 %vm201_vm0, %v5833_v8  ;;  %4820 = vmatmul.msk.bf16.gmra.mxu1 %vm201_vm0, %v5849_v9 }
  0x49   :  { %4741 = vmatmul.msk.bf16.gmra.mxu0 %vm201_vm0, %v5834_v10  ;;  %4821 = vmatmul.msk.bf16.gmra.mxu1 %vm201_vm0, %v5850_v11 }
  0x59   :  { %4742 = vmatmul.msk.bf16.gmra.mxu0 %vm201_vm0, %v5835_v12  ;;  %4822 = vmatmul.msk.bf16.gmra.mxu1 %vm201_vm0, %v5851_v13  ;;  %v951_v13 = vld [vmem:[#allocation3 + $0x1] sm:$0xff] }
  0x69   :  { %4743 = vmatmul.msk.bf16.gmra.mxu0 %vm201_vm0, %v5836_v14  ;;  %4823 = vmatmul.msk.bf16.gmra.mxu1 %vm201_vm0, %v5852_v15  ;;  %v908_v14 = vld [vmem:[#allocation3] sm:$0xff] }
  0x79   :  { %4744 = vmatmul.msk.bf16.gmra.mxu0 %vm201_vm0, %v5837_v16  ;;  %4824 = vmatmul.msk.bf16.gmra.mxu1 %vm201_vm0, %v5853_v17  ;;  %v5841_v16 = vld [vmem:[%s7589_s0 + $0x58] sm:$0xff] }
  0x7a   :  { %v5857_v17 = vld [vmem:[%s7589_s0 + $0xd8] sm:$0xff] }
  0x86   :  { %v259_v21 = vpop.f32.mrf.mxu0  ;;  %v572_v22 = vpop.f32.mrf.mxu1 }
  0x87   :  { %v260_v23 = vadd.f32 %v6149_v18, %v259_v21  ;;  %v573_v24 = vadd.f32 %v6149_v18, %v572_v22 }
  0x89   :  { %v339_v27 = vmax.f32 %v260_v23, 0.0  ;;  %v652_v28 = vmax.f32 %v573_v24, 0.0  ;;  %4745 = vmatmul.msk.bf16.gmra.mxu0 %vm201_vm0, %v5838_v19  ;;  %4825 = vmatmul.msk.bf16.gmra.mxu1 %vm201_vm0, %v5854_v20 }
  0x8b   :  { %371 = vst.msk [vmem:[#allocation2] sm:$0xff] %vm25_vm1, %v339_v27 }
  0x8c   :  { %684 = vst.msk [vmem:[#allocation2 + $0x100] sm:$0xff] %vm25_vm1, %v652_v28 }
  0x8e   :  { %v261_v31 = vpop.f32.mrf.mxu0  ;;  %v574_v32 = vpop.f32.mrf.mxu1 }
  0x8f   :  { %v262_v34 = vadd.f32 %v6149_v18, %v261_v31  ;;  %v575_v35 = vadd.f32 %v6149_v18, %v574_v32 }
  0x91   :  { %v340_v38 = vmax.f32 %v262_v34, 0.0  ;;  %v653_v39 = vmax.f32 %v575_v35, 0.0 }
  0x93   :  { %372 = vst.msk [vmem:[#allocation2 + $0x8] sm:$0xff] %vm25_vm1, %v340_v38 }
  0x94   :  { %685 = vst.msk [vmem:[#allocation2 + $0x108] sm:$0xff] %vm25_vm1, %v653_v39 }
  0x96   :  { %v264_v44 = vpop.f32.mrf.mxu0  ;;  %v577_v45 = vpop.f32.mrf.mxu1 }
  0x97   :  { %v265_v46 = vadd.f32 %v6149_v18, %v264_v44  ;;  %v578_v47 = vadd.f32 %v6149_v18, %v577_v45 }
  0x99   :  { %v341_v48 = vmax.f32 %v265_v46, 0.0  ;;  %v654_v49 = vmax.f32 %v578_v47, 0.0  ;;  %4746 = vmatmul.msk.bf16.gmra.mxu0 %vm201_vm0, %v5839_v42  ;;  %4826 = vmatmul.msk.bf16.gmra.mxu1 %vm201_vm0, %v5855_v43  ;;  %v5842_v42 = vld [vmem:[%s7589_s0 + $0x60] sm:$0xff] }
  0x9a   :  { %v716_v62 = vld [vmem:[#allocation2] ss:$2 sm:$0xff]  ;;  %v718_v63 = vld [vmem:[#allocation2 + $0x1] ss:$2 sm:$0xff] }
  0x9b   :  { %373 = vst.msk [vmem:[#allocation2 + $0x10] sm:$0xff] %vm25_vm1, %v341_v48  ;;  %v723_v4 = vmax.f32 %v716_v62, %v718_v63  ;;  %v812_v15 = vld [vmem:[#allocation2 + $0x100] ss:$2 sm:$0xff]  ;;  %v814_v19 = vld [vmem:[#allocation2 + $0x101] ss:$2 sm:$0xff] }
  0x9c   :  { %686 = vst.msk [vmem:[#allocation2 + $0x110] sm:$0xff] %vm25_vm1, %v654_v49  ;;  %v819_v32 = vmax.f32 %v812_v15, %v814_v19  ;;  %v5858_v43 = vld [vmem:[%s7589_s0 + $0xe0] sm:$0xff]  ;;  %v5885_v15 = vld [vmem:[%s7591_s2 + $0xb8] sm:$0xff] }
  0x9d   :  { %1944 = vmatpush.bf16.msrb.mxu1 %v5885_v15 }
  0x9e   :  { %v266_v50 = vpop.f32.mrf.mxu0  ;;  %v579_v51 = vpop.f32.mrf.mxu1 }
  0x9f   :  { %v267_v52 = vadd.f32 %v6149_v18, %v266_v50  ;;  %v580_v53 = vadd.f32 %v6149_v18, %v579_v51 }
  0xa1   :  { %v342_v54 = vmax.f32 %v267_v52, 0.0  ;;  %v655_v55 = vmax.f32 %v580_v53, 0.0 }
  0xa3   :  { %374 = vst.msk [vmem:[#allocation2 + $0x18] sm:$0xff] %vm25_vm1, %v342_v54 }
  0xa4   :  { %687 = vst.msk [vmem:[#allocation2 + $0x118] sm:$0xff] %vm25_vm1, %v655_v55 }
  0xa6   :  { %v269_v58 = vpop.f32.mrf.mxu0  ;;  %v582_v59 = vpop.f32.mrf.mxu1 }
  0xa7   :  { %v270_v60 = vadd.f32 %v6149_v18, %v269_v58  ;;  %v583_v61 = vadd.f32 %v6149_v18, %v582_v59 }
  0xa9   :  { %v343_v0 = vmax.f32 %v270_v60, 0.0  ;;  %v656_v1 = vmax.f32 %v583_v61, 0.0  ;;  %4747 = vmatmul.msk.bf16.gmra.mxu0 %vm201_vm0, %v5840_v56  ;;  %4827 = vmatmul.msk.bf16.gmra.mxu1 %vm201_vm0, %v5856_v57 }
  0xaa   :  { %v720_v2 = vld [vmem:[#allocation2 + $0x10] ss:$2 sm:$0xff]  ;;  %v722_v3 = vld [vmem:[#allocation2 + $0x11] ss:$2 sm:$0xff] }
  0xab   :  { %v724_v5 = vmax.f32 %v720_v2, %v722_v3  ;;  %375 = vst.msk [vmem:[#allocation2 + $0x20] sm:$0xff] %vm25_vm1, %v343_v0  ;;  %v816_v24 = vld [vmem:[#allocation2 + $0x110] ss:$2 sm:$0xff]  ;;  %v818_v25 = vld [vmem:[#allocation2 + $0x111] ss:$2 sm:$0xff] }
  0xac   :  { %688 = vst.msk [vmem:[#allocation2 + $0x120] sm:$0xff] %vm25_vm1, %v656_v1  ;;  %v820_v34 = vmax.f32 %v816_v24, %v818_v25  ;;  %v5879_v25 = vld [vmem:[%s7591_s2 + $0x88] sm:$0xff] }
  0xad   :  { %v725_v6 = vmax.f32 %v723_v4, %v724_v5 }
  0xae   :  { %v271_v7 = vpop.f32.mrf.mxu0  ;;  %v584_v8 = vpop.f32.mrf.mxu1  ;;  %v821_v35 = vmax.f32 %v819_v32, %v820_v34 }
  0xaf   :  { %v272_v9 = vadd.f32 %v6149_v18, %v271_v7  ;;  %v585_v10 = vadd.f32 %v6149_v18, %v584_v8  ;;  %726 = vst.msk [vmem:[#allocation3 + $0xb] sm:$0xff] %vm25_vm1, %v725_v6  ;;  %v5843_v6 = vld [vmem:[%s7589_s0 + $0x68] sm:$0xff] }
  0xb0   :  { %822 = vst.msk [vmem:[#allocation3 + $0x6f] sm:$0xff] %vm25_vm1, %v821_v35  ;;  %v5859_v7 = vld [vmem:[%s7589_s0 + $0xe8] sm:$0xff] }
  0xb1   :  { %v344_v11 = vmax.f32 %v272_v9, 0.0  ;;  %v657_v12 = vmax.f32 %v585_v10, 0.0 }
  0xb3   :  { %376 = vst.msk [vmem:[#allocation2 + $0x28] sm:$0xff] %vm25_vm1, %v344_v11 }
  0xb4   :  { %689 = vst.msk [vmem:[#allocation2 + $0x128] sm:$0xff] %vm25_vm1, %v657_v12 }
  0xb6   :  { %v274_v20 = vpop.f32.mrf.mxu0  ;;  %v587_v21 = vpop.f32.mrf.mxu1  ;;  %v952_v22 = vld [vmem:[#allocation3 + $0x9] sm:$0xff] }
  0xb7   :  { %v909_v23 = vld [vmem:[#allocation3 + $0x8] sm:$0xff]  ;;  %v275_v26 = vadd.f32 %v6149_v18, %v274_v20  ;;  %v588_v27 = vadd.f32 %v6149_v18, %v587_v21  ;;  %v974_v28 = vpack.c.bf16 %v952_v22, %v951_v13 }
  0xb8   :  { %v931_v29 = vpack.c.bf16 %v909_v23, %v908_v14  ;;  %v5881_v14 = vld [vmem:[%s7591_s2 + $0x98] sm:$0xff] }
  0xb9   :  { %v345_v30 = vmax.f32 %v275_v26, 0.0  ;;  %v658_v31 = vmax.f32 %v588_v27, 0.0  ;;  %4748 = vmatmul.msk.bf16.gmra.mxu0 %vm201_vm0, %v5841_v16  ;;  %4828 = vmatmul.msk.bf16.gmra.mxu1 %vm201_vm0, %v5857_v17  ;;  %v5880_v16 = vld [vmem:[%s7591_s2 + $0x90] sm:$0xff]  ;;  %v5883_v26 = vld [vmem:[%s7591_s2 + $0xa8] sm:$0xff] }
  0xba   :  { %4857 = vmatmul.msk.bf16.vlgmr.msra.gmra.mxu2 %vm25_vm1, %v974_v28  ;;  %4885 = vmatmul.msk.bf16.vlgmr.msra.gmra.mxu3 %vm25_vm1, %v931_v29  ;;  %v728_v50 = vld [vmem:[#allocation2 + $0x20] ss:$2 sm:$0xff]  ;;  %v730_v51 = vld [vmem:[#allocation2 + $0x21] ss:$2 sm:$0xff]  ;;  %v5884_v17 = vld [vmem:[%s7591_s2 + $0xb0] sm:$0xff] }
  0xbb   :  { %377 = vst.msk [vmem:[#allocation2 + $0x30] sm:$0xff] %vm25_vm1, %v345_v30  ;;  %v824_v46 = vld [vmem:[#allocation2 + $0x120] ss:$2 sm:$0xff]  ;;  %v826_v47 = vld [vmem:[#allocation2 + $0x121] ss:$2 sm:$0xff]  ;;  %v735_v57 = vmax.f32 %v728_v50, %v730_v51  ;;  %1749 = vmatpush.bf16.msrb.mxu0 %v5881_v14  ;;  %1945 = vmatpush.bf16.msrb.mxu1 %v5884_v17  ;;  %v5844_v27 = vld [vmem:[%s7589_s0 + $0x70] sm:$0xff] }
  0xbc   :  { %690 = vst.msk [vmem:[#allocation2 + $0x130] sm:$0xff] %vm25_vm1, %v658_v31  ;;  %v831_v54 = vmax.f32 %v824_v46, %v826_v47  ;;  %v5860_v28 = vld [vmem:[%s7589_s0 + $0xf0] sm:$0xff]  ;;  %v5878_v29 = vld [vmem:[%s7591_s2 + $0x80] sm:$0xff] }
  0xbd   :  { %v5882_v30 = vld [vmem:[%s7591_s2 + $0xa0] sm:$0xff] }
  0xbe   :  { %v276_v36 = vpop.f32.mrf.mxu0  ;;  %v589_v37 = vpop.f32.mrf.mxu1 }
  0xbf   :  { %v277_v38 = vadd.f32 %v6149_v18, %v276_v36  ;;  %v590_v39 = vadd.f32 %v6149_v18, %v589_v37  ;;  %1750 = vmatpush.bf16.msrb.mxu0 %v5880_v16  ;;  %1946 = vmatpush.bf16.msrb.mxu1 %v5883_v26 }
  0xc1   :  { %v346_v40 = vmax.f32 %v277_v38, 0.0  ;;  %v659_v41 = vmax.f32 %v590_v39, 0.0 }
  0xc3   :  { %378 = vst.msk [vmem:[#allocation2 + $0x38] sm:$0xff] %vm25_vm1, %v346_v40  ;;  %1751 = vmatpush.bf16.msrb.mxu0 %v5879_v25  ;;  %1947 = vmatpush.bf16.msrb.mxu1 %v5882_v30 }
  0xc4   :  { %691 = vst.msk [vmem:[#allocation2 + $0x138] sm:$0xff] %vm25_vm1, %v659_v41 }
  0xc6   :  { %v279_v44 = vpop.f32.mrf.mxu0  ;;  %v592_v45 = vpop.f32.mrf.mxu1 }
  0xc7   :  { %v280_v48 = vadd.f32 %v6149_v18, %v279_v44  ;;  %v593_v49 = vadd.f32 %v6149_v18, %v592_v45  ;;  %1752 = vmatpush.bf16.msrb.mxu0 %v5878_v29 }
  0xc9   :  { %v347_v52 = vmax.f32 %v280_v48, 0.0  ;;  %v660_v53 = vmax.f32 %v593_v49, 0.0  ;;  %4749 = vmatmul.msk.bf16.gmra.mxu0 %vm201_vm0, %v5842_v42  ;;  %4829 = vmatmul.msk.bf16.gmra.mxu1 %vm201_vm0, %v5858_v43 }
  0xca   :  { %v732_v55 = vld [vmem:[#allocation2 + $0x30] ss:$2 sm:$0xff]  ;;  %v734_v56 = vld [vmem:[#allocation2 + $0x31] ss:$2 sm:$0xff] }
  0xcb   :  { %v736_v58 = vmax.f32 %v732_v55, %v734_v56  ;;  %v828_v59 = vld [vmem:[#allocation2 + $0x130] ss:$2 sm:$0xff]  ;;  %v830_v60 = vld [vmem:[#allocation2 + $0x131] ss:$2 sm:$0xff]  ;;  %379 = vst.msk [vmem:[#allocation2 + $0x40] sm:$0xff] %vm25_vm1, %v347_v52 }
  0xcc   :  { %v832_v61 = vmax.f32 %v828_v59, %v830_v60  ;;  %692 = vst.msk [vmem:[#allocation2 + $0x140] sm:$0xff] %vm25_vm1, %v660_v53  ;;  %v5861_v59 = vld [vmem:[%s7589_s0 + $0xf8] sm:$0xff] }
  0xcd   :  { %v737_v62 = vmax.f32 %v735_v57, %v736_v58  ;;  %v5845_v58 = vld [vmem:[%s7589_s0 + $0x78] sm:$0xff] }
  0xce   :  { %v833_v63 = vmax.f32 %v831_v54, %v832_v61  ;;  %v281_v0 = vpop.f32.mrf.mxu0  ;;  %v594_v1 = vpop.f32.mrf.mxu1 }
  0xcf   :  { %738 = vst.msk [vmem:[#allocation3 + $0x15] sm:$0xff] %vm25_vm1, %v737_v62  ;;  %v282_v2 = vadd.f32 %v6149_v18, %v281_v0  ;;  %v595_v3 = vadd.f32 %v6149_v18, %v594_v1 }
  0xd0   :  { %834 = vst.msk [vmem:[#allocation3 + $0x79] sm:$0xff] %vm25_vm1, %v833_v63 }
  0xd1   :  { %v348_v4 = vmax.f32 %v282_v2, 0.0  ;;  %v661_v5 = vmax.f32 %v595_v3, 0.0 }
  0xd3   :  { %380 = vst.msk [vmem:[#allocation2 + $0x48] sm:$0xff] %vm25_vm1, %v348_v4 }
  0xd4   :  { %693 = vst.msk [vmem:[#allocation2 + $0x148] sm:$0xff] %vm25_vm1, %v661_v5 }
  0xd6   :  { %v284_v8 = vpop.f32.mrf.mxu0  ;;  %v597_v9 = vpop.f32.mrf.mxu1  ;;  %v953_v60 = vld [vmem:[#allocation3 + $0x11] sm:$0xff] }
  0xd7   :  { %v285_v10 = vadd.f32 %v6149_v18, %v284_v8  ;;  %v598_v11 = vadd.f32 %v6149_v18, %v597_v9  ;;  %v910_v0 = vld [vmem:[#allocation3 + $0x10] sm:$0xff] }
  0xd8   :  { %v1642_v14 = vld [vmem:[#allocation3 + $0x13] sm:$0xff] }
  0xd9   :  { %v349_v12 = vmax.f32 %v285_v10, 0.0  ;;  %v662_v13 = vmax.f32 %v598_v11, 0.0  ;;  %4750 = vmatmul.msk.bf16.gmra.mxu0 %vm201_vm0, %v5843_v6  ;;  %4830 = vmatmul.msk.bf16.gmra.mxu1 %vm201_vm0, %v5859_v7  ;;  %v1837_v15 = vld [vmem:[#allocation3 + $0x14] sm:$0xff] }
  0xda   :  { %v740_v38 = vld [vmem:[#allocation2 + $0x40] ss:$2 sm:$0xff]  ;;  %v742_v39 = vld [vmem:[#allocation2 + $0x41] ss:$2 sm:$0xff] }
  0xdb   :  { %381 = vst.msk [vmem:[#allocation2 + $0x50] sm:$0xff] %vm25_vm1, %v349_v12  ;;  %v836_v34 = vld [vmem:[#allocation2 + $0x140] ss:$2 sm:$0xff]  ;;  %v838_v35 = vld [vmem:[#allocation2 + $0x141] ss:$2 sm:$0xff]  ;;  %v747_v45 = vmax.f32 %v740_v38, %v742_v39 }
  0xdc   :  { %694 = vst.msk [vmem:[#allocation2 + $0x150] sm:$0xff] %vm25_vm1, %v662_v13  ;;  %v843_v42 = vmax.f32 %v836_v34, %v838_v35 }
  0xde   :  { %v286_v19 = vpop.f32.mrf.mxu0  ;;  %v599_v20 = vpop.f32.mrf.mxu1 }
  0xdf   :  { %v287_v21 = vadd.f32 %v6149_v18, %v286_v19  ;;  %v600_v22 = vadd.f32 %v6149_v18, %v599_v20  ;;  %v1641_v19 = vld [vmem:[#allocation3 + $0xb] sm:$0xff] }
  0xe0   :  { %v1836_v20 = vld [vmem:[#allocation3 + $0xc] sm:$0xff]  ;;  %v1664_v25 = vpack.c.bf16 %v1642_v14, %v1641_v19 }
  0xe1   :  { %v350_v23 = vmax.f32 %v287_v21, 0.0  ;;  %v663_v24 = vmax.f32 %v600_v22, 0.0  ;;  %v1859_v26 = vpack.c.bf16 %v1837_v15, %v1836_v20 }
  0xe3   :  { %382 = vst.msk [vmem:[#allocation2 + $0x58] sm:$0xff] %vm25_vm1, %v350_v23 }
  0xe4   :  { %695 = vst.msk [vmem:[#allocation2 + $0x158] sm:$0xff] %vm25_vm1, %v663_v24 }
  0xe6   :  { %v289_v31 = vpop.f32.mrf.mxu0  ;;  %v602_v32 = vpop.f32.mrf.mxu1 }
  0xe7   :  { %v290_v36 = vadd.f32 %v6149_v18, %v289_v31  ;;  %v603_v37 = vadd.f32 %v6149_v18, %v602_v32 }
  0xe9   :  { %v351_v40 = vmax.f32 %v290_v36, 0.0  ;;  %v664_v41 = vmax.f32 %v603_v37, 0.0  ;;  %4751 = vmatmul.msk.bf16.gmra.mxu0 %vm201_vm0, %v5844_v27  ;;  %4831 = vmatmul.msk.bf16.gmra.mxu1 %vm201_vm0, %v5860_v28 }
  0xea   :  { %v744_v43 = vld [vmem:[#allocation2 + $0x50] ss:$2 sm:$0xff]  ;;  %v746_v44 = vld [vmem:[#allocation2 + $0x51] ss:$2 sm:$0xff] }
  0xeb   :  { %v748_v46 = vmax.f32 %v744_v43, %v746_v44  ;;  %v840_v47 = vld [vmem:[#allocation2 + $0x150] ss:$2 sm:$0xff]  ;;  %v842_v48 = vld [vmem:[#allocation2 + $0x151] ss:$2 sm:$0xff]  ;;  %383 = vst.msk [vmem:[#allocation2 + $0x60] sm:$0xff] %vm25_vm1, %v351_v40 }
  0xec   :  { %v844_v49 = vmax.f32 %v840_v47, %v842_v48  ;;  %696 = vst.msk [vmem:[#allocation2 + $0x160] sm:$0xff] %vm25_vm1, %v664_v41 }
  0xed   :  { %v749_v50 = vmax.f32 %v747_v45, %v748_v46 }
  0xee   :  { %v845_v51 = vmax.f32 %v843_v42, %v844_v49  ;;  %v291_v52 = vpop.f32.mrf.mxu0  ;;  %v604_v53 = vpop.f32.mrf.mxu1 }
  0xef   :  { %750 = vst.msk [vmem:[#allocation3 + $0x1f] sm:$0xff] %vm25_vm1, %v749_v50  ;;  %v292_v54 = vadd.f32 %v6149_v18, %v291_v52  ;;  %v605_v55 = vadd.f32 %v6149_v18, %v604_v53 }
  0xf0   :  { %846 = vst.msk [vmem:[#allocation3 + $0x83] sm:$0xff] %vm25_vm1, %v845_v51 }
  0xf1   :  { %v352_v56 = vmax.f32 %v292_v54, 0.0  ;;  %v665_v57 = vmax.f32 %v605_v55, 0.0 }
  0xf3   :  { %384 = vst.msk [vmem:[#allocation2 + $0x68] sm:$0xff] %vm25_vm1, %v352_v56 }
  0xf4   :  { %697 = vst.msk [vmem:[#allocation2 + $0x168] sm:$0xff] %vm25_vm1, %v665_v57 }
  0xf6   :  { %v294_v61 = vpop.f32.mrf.mxu0  ;;  %v607_v62 = vpop.f32.mrf.mxu1  ;;  %v954_v63 = vld [vmem:[#allocation3 + $0x19] sm:$0xff]  ;;  %v955_v48 = vld [vmem:[#allocation3 + $0x21] sm:$0xff] }
  0xf7   :  { %v911_v1 = vld [vmem:[#allocation3 + $0x18] sm:$0xff]  ;;  %v295_v2 = vadd.f32 %v6149_v18, %v294_v61  ;;  %v608_v3 = vadd.f32 %v6149_v18, %v607_v62  ;;  %v975_v4 = vpack.c.bf16 %v954_v63, %v953_v60  ;;  %v912_v49 = vld [vmem:[#allocation3 + $0x20] sm:$0xff] }
  0xf8   :  { %v932_v5 = vpack.c.bf16 %v911_v1, %v910_v0  ;;  %v1838_v60 = vld [vmem:[#allocation3 + $0x1c] sm:$0xff] }
  0xf9   :  { %v353_v6 = vmax.f32 %v295_v2, 0.0  ;;  %v666_v7 = vmax.f32 %v608_v3, 0.0  ;;  %4752 = vmatmul.msk.bf16.gmra.mxu0 %vm201_vm0, %v5845_v58  ;;  %4832 = vmatmul.msk.bf16.gmra.mxu1 %vm201_vm0, %v5861_v59  ;;  %v1643_v59 = vld [vmem:[#allocation3 + $0x1b] sm:$0xff] }
  0xfa   :  { %4858 = vmatmul.msk.bf16.gmra.mxu2 %vm25_vm1, %v975_v4  ;;  %4886 = vmatmul.msk.bf16.gmra.mxu3 %vm25_vm1, %v932_v5  ;;  %v752_v27 = vld [vmem:[#allocation2 + $0x60] ss:$2 sm:$0xff]  ;;  %v754_v28 = vld [vmem:[#allocation2 + $0x61] ss:$2 sm:$0xff] }
  0xfb   :  { %385 = vst.msk [vmem:[#allocation2 + $0x70] sm:$0xff] %vm25_vm1, %v353_v6  ;;  %v848_v21 = vld [vmem:[#allocation2 + $0x160] ss:$2 sm:$0xff]  ;;  %v850_v22 = vld [vmem:[#allocation2 + $0x161] ss:$2 sm:$0xff]  ;;  %v759_v35 = vmax.f32 %v752_v27, %v754_v28 }
  0xfc   :  { %698 = vst.msk [vmem:[#allocation2 + $0x170] sm:$0xff] %vm25_vm1, %v666_v7  ;;  %v855_v31 = vmax.f32 %v848_v21, %v850_v22 }
  0xfe   :  { %v296_v8 = vpop.f32.mrf.mxu0  ;;  %v609_v9 = vpop.f32.mrf.mxu1 }
  0xff   :  { %v297_v10 = vadd.f32 %v6149_v18, %v296_v8  ;;  %v610_v11 = vadd.f32 %v6149_v18, %v609_v9 }
 0x101   :  { %v354_v12 = vmax.f32 %v297_v10, 0.0  ;;  %v667_v13 = vmax.f32 %v610_v11, 0.0 }
 0x103   :  { %386 = vst.msk [vmem:[#allocation2 + $0x78] sm:$0xff] %vm25_vm1, %v354_v12 }
 0x104   :  { %699 = vst.msk [vmem:[#allocation2 + $0x178] sm:$0xff] %vm25_vm1, %v667_v13 }
 0x106   :  { %v299_v16 = vpop.f32.mrf.mxu0  ;;  %v612_v17 = vpop.f32.mrf.mxu1 }
 0x107   :  { %v300_v23 = vadd.f32 %v6149_v18, %v299_v16  ;;  %v613_v24 = vadd.f32 %v6149_v18, %v612_v17 }
 0x109   :  { %v355_v29 = vmax.f32 %v300_v23, 0.0  ;;  %v668_v30 = vmax.f32 %v613_v24, 0.0  ;;  %4993 = vmatmul.msk.bf16.vlgmr.msrb.gmra.mxu0 %vm25_vm1, %v1664_v25  ;;  %5029 = vmatmul.msk.bf16.vlgmr.msrb.gmra.mxu1 %vm25_vm1, %v1859_v26 }
 0x10a   :  { %v756_v32 = vld [vmem:[#allocation2 + $0x70] ss:$2 sm:$0xff]  ;;  %v758_v34 = vld [vmem:[#allocation2 + $0x71] ss:$2 sm:$0xff] }
 0x10b   :  { %v760_v36 = vmax.f32 %v756_v32, %v758_v34  ;;  %v852_v37 = vld [vmem:[#allocation2 + $0x170] ss:$2 sm:$0xff]  ;;  %v854_v38 = vld [vmem:[#allocation2 + $0x171] ss:$2 sm:$0xff]  ;;  %387 = vst.msk [vmem:[#allocation2 + $0x80] sm:$0xff] %vm25_vm1, %v355_v29 }
 0x10c   :  { %v856_v39 = vmax.f32 %v852_v37, %v854_v38  ;;  %700 = vst.msk [vmem:[#allocation2 + $0x180] sm:$0xff] %vm25_vm1, %v668_v30  ;;  %v5873_v34 = vld [vmem:[%s7591_s2 + $0x58] sm:$0xff] }
 0x10d   :  { %v761_v40 = vmax.f32 %v759_v35, %v760_v36  ;;  %v5877_v35 = vld [vmem:[%s7591_s2 + $0x78] sm:$0xff]  ;;  %1359 = vmatpush.bf16.msrb.mxu2 %v5873_v34 }
 0x10e   :  { %v857_v41 = vmax.f32 %v855_v31, %v856_v39  ;;  %v301_v42 = vpop.f32.mrf.mxu0  ;;  %v614_v43 = vpop.f32.mrf.mxu1  ;;  %1554 = vmatpush.bf16.msrb.mxu3 %v5877_v35  ;;  %v5872_v35 = vld [vmem:[%s7591_s2 + $0x50] sm:$0xff] }
 0x10f   :  { %762 = vst.msk [vmem:[#allocation3 + $0x29] sm:$0xff] %vm25_vm1, %v761_v40  ;;  %v302_v44 = vadd.f32 %v6149_v18, %v301_v42  ;;  %v615_v45 = vadd.f32 %v6149_v18, %v614_v43 }
 0x110   :  { %858 = vst.msk [vmem:[#allocation3 + $0x8d] sm:$0xff] %vm25_vm1, %v857_v41 }
 0x111   :  { %v356_v46 = vmax.f32 %v302_v44, 0.0  ;;  %v669_v47 = vmax.f32 %v615_v45, 0.0  ;;  %1360 = vmatpush.bf16.msrb.mxu2 %v5872_v35 }
 0x113   :  { %388 = vst.msk [vmem:[#allocation2 + $0x88] sm:$0xff] %vm25_vm1, %v356_v46 }
 0x114   :  { %701 = vst.msk [vmem:[#allocation2 + $0x188] sm:$0xff] %vm25_vm1, %v669_v47 }
 0x116   :  { %v304_v50 = vpop.f32.mrf.mxu0  ;;  %v617_v51 = vpop.f32.mrf.mxu1  ;;  %v956_v52 = vld [vmem:[#allocation3 + $0x29] sm:$0xff] }
 0x117   :  { %v913_v53 = vld [vmem:[#allocation3 + $0x28] sm:$0xff]  ;;  %v305_v55 = vadd.f32 %v6149_v18, %v304_v50  ;;  %v618_v56 = vadd.f32 %v6149_v18, %v617_v51  ;;  %v976_v57 = vpack.c.bf16 %v956_v52, %v955_v48 }
 0x118   :  { %v1644_v54 = vld [vmem:[#allocation3 + $0x23] sm:$0xff]  ;;  %v933_v58 = vpack.c.bf16 %v913_v53, %v912_v49  ;;  %v1645_v38 = vld [vmem:[#allocation3 + $0x2b] sm:$0xff] }
 0x119   :  { %v1839_v61 = vld [vmem:[#allocation3 + $0x24] sm:$0xff]  ;;  %v1665_v62 = vpack.c.bf16 %v1644_v54, %v1643_v59  ;;  %v357_v0 = vmax.f32 %v305_v55, 0.0  ;;  %v670_v1 = vmax.f32 %v618_v56, 0.0  ;;  %4859 = vmatmul.msk.bf16.gmra.mxu2 %vm25_vm1, %v976_v57 }
 0x11a   :  { %v1860_v63 = vpack.c.bf16 %v1839_v61, %v1838_v60  ;;  %4887 = vmatmul.msk.bf16.gmra.mxu3 %vm25_vm1, %v933_v58  ;;  %v764_v14 = vld [vmem:[#allocation2 + $0x80] ss:$2 sm:$0xff]  ;;  %v766_v15 = vld [vmem:[#allocation2 + $0x81] ss:$2 sm:$0xff] }
 0x11b   :  { %4994 = vmatmul.msk.bf16.gmra.mxu0 %vm25_vm1, %v1665_v62  ;;  %389 = vst.msk [vmem:[#allocation2 + $0x90] sm:$0xff] %vm25_vm1, %v357_v0  ;;  %v860_v10 = vld [vmem:[#allocation2 + $0x180] ss:$2 sm:$0xff]  ;;  %v862_v11 = vld [vmem:[#allocation2 + $0x181] ss:$2 sm:$0xff]  ;;  %v771_v22 = vmax.f32 %v764_v14, %v766_v15 }
 0x11c   :  { %5030 = vmatmul.msk.bf16.gmra.mxu1 %vm25_vm1, %v1860_v63  ;;  %702 = vst.msk [vmem:[#allocation2 + $0x190] sm:$0xff] %vm25_vm1, %v670_v1  ;;  %v867_v19 = vmax.f32 %v860_v10, %v862_v11 }
 0x11e   :  { %v306_v2 = vpop.f32.mrf.mxu0  ;;  %v619_v3 = vpop.f32.mrf.mxu1 }
 0x11f   :  { %v307_v4 = vadd.f32 %v6149_v18, %v306_v2  ;;  %v620_v5 = vadd.f32 %v6149_v18, %v619_v3 }
 0x121   :  { %v358_v6 = vmax.f32 %v307_v4, 0.0  ;;  %v671_v7 = vmax.f32 %v620_v5, 0.0 }
 0x123   :  { %390 = vst.msk [vmem:[#allocation2 + $0x98] sm:$0xff] %vm25_vm1, %v358_v6 }
 0x124   :  { %703 = vst.msk [vmem:[#allocation2 + $0x198] sm:$0xff] %vm25_vm1, %v671_v7 }
 0x126   :  { %v309_v8 = vpop.f32.mrf.mxu0  ;;  %v622_v9 = vpop.f32.mrf.mxu1 }
 0x127   :  { %v310_v12 = vadd.f32 %v6149_v18, %v309_v8  ;;  %v623_v13 = vadd.f32 %v6149_v18, %v622_v9 }
 0x129   :  { %v359_v16 = vmax.f32 %v310_v12, 0.0  ;;  %v672_v17 = vmax.f32 %v623_v13, 0.0 }
 0x12a   :  { %v768_v20 = vld [vmem:[#allocation2 + $0x90] ss:$2 sm:$0xff]  ;;  %v770_v21 = vld [vmem:[#allocation2 + $0x91] ss:$2 sm:$0xff] }
 0x12b   :  { %v772_v23 = vmax.f32 %v768_v20, %v770_v21  ;;  %v864_v24 = vld [vmem:[#allocation2 + $0x190] ss:$2 sm:$0xff]  ;;  %v866_v25 = vld [vmem:[#allocation2 + $0x191] ss:$2 sm:$0xff]  ;;  %391 = vst.msk [vmem:[#allocation2 + $0xa0] sm:$0xff] %vm25_vm1, %v359_v16 }
 0x12c   :  { %v868_v26 = vmax.f32 %v864_v24, %v866_v25  ;;  %704 = vst.msk [vmem:[#allocation2 + $0x1a0] sm:$0xff] %vm25_vm1, %v672_v17 }
 0x12d   :  { %v773_v27 = vmax.f32 %v771_v22, %v772_v23 }
 0x12e   :  { %v869_v28 = vmax.f32 %v867_v19, %v868_v26  ;;  %v311_v29 = vpop.f32.mrf.mxu0  ;;  %v624_v30 = vpop.f32.mrf.mxu1 }
 0x12f   :  { %774 = vst.msk [vmem:[#allocation3 + $0x33] sm:$0xff] %vm25_vm1, %v773_v27  ;;  %v312_v31 = vadd.f32 %v6149_v18, %v311_v29  ;;  %v625_v32 = vadd.f32 %v6149_v18, %v624_v30 }
 0x130   :  { %870 = vst.msk [vmem:[#allocation3 + $0x97] sm:$0xff] %vm25_vm1, %v869_v28 }
 0x131   :  { %v360_v36 = vmax.f32 %v312_v31, 0.0  ;;  %v673_v37 = vmax.f32 %v625_v32, 0.0 }
 0x133   :  { %392 = vst.msk [vmem:[#allocation2 + $0xa8] sm:$0xff] %vm25_vm1, %v360_v36  ;;  %v5876_v36 = vld [vmem:[%s7591_s2 + $0x70] sm:$0xff] }
 0x134   :  { %705 = vst.msk [vmem:[#allocation2 + $0x1a8] sm:$0xff] %vm25_vm1, %v673_v37  ;;  %1555 = vmatpush.bf16.msrb.mxu3 %v5876_v36 }
 0x136   :  { %v314_v39 = vpop.f32.mrf.mxu0  ;;  %v627_v40 = vpop.f32.mrf.mxu1  ;;  %v1646_v41 = vld [vmem:[#allocation3 + $0x33] sm:$0xff] }
 0x137   :  { %v1840_v42 = vld [vmem:[#allocation3 + $0x2c] sm:$0xff]  ;;  %v1841_v43 = vld [vmem:[#allocation3 + $0x34] sm:$0xff]  ;;  %v315_v44 = vadd.f32 %v6149_v18, %v314_v39  ;;  %v628_v45 = vadd.f32 %v6149_v18, %v627_v40  ;;  %v1666_v46 = vpack.c.bf16 %v1646_v41, %v1645_v38 }
 0x138   :  { %v1861_v47 = vpack.c.bf16 %v1841_v43, %v1840_v42  ;;  %v957_v22 = vld [vmem:[#allocation3 + $0x31] sm:$0xff] }
 0x139   :  { %v361_v48 = vmax.f32 %v315_v44, 0.0  ;;  %v674_v49 = vmax.f32 %v628_v45, 0.0  ;;  %4995 = vmatmul.msk.bf16.gmra.mxu0 %vm25_vm1, %v1666_v46  ;;  %v914_v26 = vld [vmem:[#allocation3 + $0x30] sm:$0xff] }
 0x13a   :  { %5031 = vmatmul.msk.bf16.gmra.mxu1 %vm25_vm1, %v1861_v47  ;;  %v776_v1 = vld [vmem:[#allocation2 + $0xa0] ss:$2 sm:$0xff]  ;;  %v778_v2 = vld [vmem:[#allocation2 + $0xa1] ss:$2 sm:$0xff] }
 0x13b   :  { %393 = vst.msk [vmem:[#allocation2 + $0xb0] sm:$0xff] %vm25_vm1, %v361_v48  ;;  %v872_v61 = vld [vmem:[#allocation2 + $0x1a0] ss:$2 sm:$0xff]  ;;  %v874_v62 = vld [vmem:[#allocation2 + $0x1a1] ss:$2 sm:$0xff]  ;;  %v783_v8 = vmax.f32 %v776_v1, %v778_v2 }
 0x13c   :  { %706 = vst.msk [vmem:[#allocation2 + $0x1b0] sm:$0xff] %vm25_vm1, %v674_v49  ;;  %v879_v5 = vmax.f32 %v872_v61, %v874_v62  ;;  %v6012_v1 = vld [vmem:[%s7594_s5] ss:$0 sm:$0xff] }
 0x13d   :  { %v1064_v50 = vpop.f32.mrf.mxu2  ;;  %v1192_v51 = vpop.f32.mrf.mxu3 }
 0x13e   :  { %v6461_v52 = vadd.f32 %v1192_v51, %v1064_v50  ;;  %v316_v53 = vpop.f32.mrf.mxu0  ;;  %v629_v54 = vpop.f32.mrf.mxu1 }
 0x13f   :  { %v317_v55 = vadd.f32 %v6149_v18, %v316_v53  ;;  %v630_v56 = vadd.f32 %v6149_v18, %v629_v54 }
 0x141   :  { %v362_v57 = vmax.f32 %v317_v55, 0.0  ;;  %v675_v58 = vmax.f32 %v630_v56, 0.0 }
 0x143   :  { %394 = vst.msk [vmem:[#allocation2 + $0xb8] sm:$0xff] %vm25_vm1, %v362_v57 }
 0x144   :  { %707 = vst.msk [vmem:[#allocation2 + $0x1b8] sm:$0xff] %vm25_vm1, %v675_v58 }
 0x146   :  { %v319_v59 = vpop.f32.mrf.mxu0  ;;  %v632_v60 = vpop.f32.mrf.mxu1 }
 0x147   :  { %v320_v63 = vadd.f32 %v6149_v18, %v319_v59  ;;  %v633_v0 = vadd.f32 %v6149_v18, %v632_v60 }
 0x149   :  { %v363_v3 = vmax.f32 %v320_v63, 0.0  ;;  %v676_v4 = vmax.f32 %v633_v0, 0.0 }
 0x14a   :  { %v780_v6 = vld [vmem:[#allocation2 + $0xb0] ss:$2 sm:$0xff]  ;;  %v782_v7 = vld [vmem:[#allocation2 + $0xb1] ss:$2 sm:$0xff] }
 0x14b   :  { %v784_v9 = vmax.f32 %v780_v6, %v782_v7  ;;  %v876_v10 = vld [vmem:[#allocation2 + $0x1b0] ss:$2 sm:$0xff]  ;;  %v878_v11 = vld [vmem:[#allocation2 + $0x1b1] ss:$2 sm:$0xff]  ;;  %395 = vst.msk [vmem:[#allocation2 + $0xc0] sm:$0xff] %vm25_vm1, %v363_v3  ;;  %v6504_v6 = vpop.f32.mrf.mxu2  ;;  %v6506_v7 = vpop.f32.mrf.mxu3 }
 0x14c   :  { %v880_v12 = vmax.f32 %v876_v10, %v878_v11  ;;  %708 = vst.msk [vmem:[#allocation2 + $0x1c0] sm:$0xff] %vm25_vm1, %v676_v4 }
 0x14d   :  { %v785_v13 = vmax.f32 %v783_v8, %v784_v9 }
 0x14e   :  { %v881_v14 = vmax.f32 %v879_v5, %v880_v12  ;;  %v321_v15 = vpop.f32.mrf.mxu0  ;;  %v634_v16 = vpop.f32.mrf.mxu1 }
 0x14f   :  { %786 = vst.msk [vmem:[#allocation3 + $0x3d] sm:$0xff] %vm25_vm1, %v785_v13  ;;  %v322_v17 = vadd.f32 %v6149_v18, %v321_v15  ;;  %v635_v19 = vadd.f32 %v6149_v18, %v634_v16 }
 0x150   :  { %882 = vst.msk [vmem:[#allocation3 + $0xa1] sm:$0xff] %vm25_vm1, %v881_v14 }
 0x151   :  { %v364_v20 = vmax.f32 %v322_v17, 0.0  ;;  %v677_v21 = vmax.f32 %v635_v19, 0.0 }
 0x153   :  { %396 = vst.msk [vmem:[#allocation2 + $0xc8] sm:$0xff] %vm25_vm1, %v364_v20 }
 0x154   :  { %709 = vst.msk [vmem:[#allocation2 + $0x1c8] sm:$0xff] %vm25_vm1, %v677_v21 }
 0x156   :  { %v324_v23 = vpop.f32.mrf.mxu0  ;;  %v637_v24 = vpop.f32.mrf.mxu1  ;;  %v958_v25 = vld [vmem:[#allocation3 + $0x39] sm:$0xff] }
 0x157   :  { %v915_v27 = vld [vmem:[#allocation3 + $0x38] sm:$0xff]  ;;  %v325_v28 = vadd.f32 %v6149_v18, %v324_v23  ;;  %v638_v29 = vadd.f32 %v6149_v18, %v637_v24  ;;  %v977_v30 = vpack.c.bf16 %v958_v25, %v957_v22 }
 0x158   :  { %v934_v31 = vpack.c.bf16 %v915_v27, %v914_v26  ;;  %v1647_v8 = vld [vmem:[#allocation3 + $0x3b] sm:$0xff] }
 0x159   :  { %v365_v32 = vmax.f32 %v325_v28, 0.0  ;;  %v678_v34 = vmax.f32 %v638_v29, 0.0  ;;  %4860 = vmatmul.msk.bf16.gmra.mxu2 %vm25_vm1, %v977_v30  ;;  %v1842_v9 = vld [vmem:[#allocation3 + $0x3c] sm:$0xff] }
 0x15a   :  { %4888 = vmatmul.msk.bf16.gmra.mxu3 %vm25_vm1, %v934_v31  ;;  %v788_v49 = vld [vmem:[#allocation2 + $0xc0] ss:$2 sm:$0xff]  ;;  %v790_v50 = vld [vmem:[#allocation2 + $0xc1] ss:$2 sm:$0xff] }
 0x15b   :  { %397 = vst.msk [vmem:[#allocation2 + $0xd0] sm:$0xff] %vm25_vm1, %v365_v32  ;;  %v884_v45 = vld [vmem:[#allocation2 + $0x1c0] ss:$2 sm:$0xff]  ;;  %v886_v46 = vld [vmem:[#allocation2 + $0x1c1] ss:$2 sm:$0xff]  ;;  %v795_v57 = vmax.f32 %v788_v49, %v790_v50 }
 0x15c   :  { %710 = vst.msk [vmem:[#allocation2 + $0x1d0] sm:$0xff] %vm25_vm1, %v678_v34  ;;  %v891_v54 = vmax.f32 %v884_v45, %v886_v46  ;;  %v5875_v49 = vld [vmem:[%s7591_s2 + $0x68] sm:$0xff] }
 0x15d   :  { %1556 = vmatpush.bf16.msrb.mxu3 %v5875_v49 }
 0x15e   :  { %v326_v37 = vpop.f32.mrf.mxu0  ;;  %v639_v38 = vpop.f32.mrf.mxu1 }
 0x15f   :  { %v327_v39 = vadd.f32 %v6149_v18, %v326_v37  ;;  %v640_v40 = vadd.f32 %v6149_v18, %v639_v38 }
 0x161   :  { %v366_v41 = vmax.f32 %v327_v39, 0.0  ;;  %v679_v42 = vmax.f32 %v640_v40, 0.0 }
 0x163   :  { %398 = vst.msk [vmem:[#allocation2 + $0xd8] sm:$0xff] %vm25_vm1, %v366_v41  ;;  %v5871_v41 = vld [vmem:[%s7591_s2 + $0x48] sm:$0xff] }
 0x164   :  { %711 = vst.msk [vmem:[#allocation2 + $0x1d8] sm:$0xff] %vm25_vm1, %v679_v42  ;;  %1361 = vmatpush.bf16.msrb.mxu2 %v5871_v41  ;;  %v1655_v41 = vld [vmem:[#allocation3 + $0x7b] sm:$0xff] }
 0x166   :  { %v329_v43 = vpop.f32.mrf.mxu0  ;;  %v642_v44 = vpop.f32.mrf.mxu1 }
 0x167   :  { %v330_v47 = vadd.f32 %v6149_v18, %v329_v43  ;;  %v643_v48 = vadd.f32 %v6149_v18, %v642_v44 }
 0x169   :  { %v367_v51 = vmax.f32 %v330_v47, 0.0  ;;  %v680_v53 = vmax.f32 %v643_v48, 0.0 }
 0x16a   :  { %v792_v55 = vld [vmem:[#allocation2 + $0xd0] ss:$2 sm:$0xff]  ;;  %v794_v56 = vld [vmem:[#allocation2 + $0xd1] ss:$2 sm:$0xff] }
 0x16b   :  { %v796_v58 = vmax.f32 %v792_v55, %v794_v56  ;;  %v888_v59 = vld [vmem:[#allocation2 + $0x1d0] ss:$2 sm:$0xff]  ;;  %v890_v60 = vld [vmem:[#allocation2 + $0x1d1] ss:$2 sm:$0xff]  ;;  %399 = vst.msk [vmem:[#allocation2 + $0xe0] sm:$0xff] %vm25_vm1, %v367_v51 }
 0x16c   :  { %v892_v61 = vmax.f32 %v888_v59, %v890_v60  ;;  %712 = vst.msk [vmem:[#allocation2 + $0x1e0] sm:$0xff] %vm25_vm1, %v680_v53  ;;  %v962_v56 = vld [vmem:[#allocation3 + $0x59] sm:$0xff] }
 0x16d   :  { %v797_v62 = vmax.f32 %v795_v57, %v796_v58 }
 0x16e   :  { %v893_v63 = vmax.f32 %v891_v54, %v892_v61  ;;  %v331_v0 = vpop.f32.mrf.mxu0  ;;  %v644_v18 = vpop.f32.mrf.mxu1 }
 0x16f   :  { %798 = vst.msk [vmem:[#allocation3 + $0x47] sm:$0xff] %vm25_vm1, %v797_v62  ;;  %v332_v2 = vadd.f32 %v6012_v1, %v331_v0  ;;  %v645_v3 = vadd.f32 %v6012_v1, %v644_v18 }
 0x170   :  { %894 = vst.msk [vmem:[#allocation3 + $0xab] sm:$0xff] %vm25_vm1, %v893_v63 }
 0x171   :  { %v368_v4 = vmax.f32 %v332_v2, 0.0  ;;  %v681_v5 = vmax.f32 %v645_v3, 0.0 }
 0x173   :  { %400 = vst.msk [vmem:[#allocation2 + $0xe8] sm:$0xff] %vm25_vm1, %v368_v4 }
 0x174   :  { %713 = vst.msk [vmem:[#allocation2 + $0x1e8] sm:$0xff] %vm25_vm1, %v681_v5 }
 0x176   :  { %v334_v10 = vpop.f32.mrf.mxu0  ;;  %v647_v11 = vpop.f32.mrf.mxu1  ;;  %v959_v12 = vld [vmem:[#allocation3 + $0x41] sm:$0xff]  ;;  %v960_v13 = vld [vmem:[#allocation3 + $0x49] sm:$0xff] }
 0x177   :  { %v916_v14 = vld [vmem:[#allocation3 + $0x40] sm:$0xff]  ;;  %v335_v15 = vadd.f32 %v6012_v1, %v334_v10  ;;  %v648_v16 = vadd.f32 %v6012_v1, %v647_v11  ;;  %v978_v17 = vpack.c.bf16 %v960_v13, %v959_v12  ;;  %v917_v19 = vld [vmem:[#allocation3 + $0x48] sm:$0xff] }
 0x178   :  { %v1648_v20 = vld [vmem:[#allocation3 + $0x43] sm:$0xff]  ;;  %v935_v22 = vpack.c.bf16 %v917_v19, %v916_v14  ;;  %v1651_v10 = vld [vmem:[#allocation3 + $0x5b] sm:$0xff] }
 0x179   :  { %v1843_v21 = vld [vmem:[#allocation3 + $0x44] sm:$0xff]  ;;  %v1667_v23 = vpack.c.bf16 %v1648_v20, %v1647_v8  ;;  %v369_v25 = vmax.f32 %v335_v15, 0.0  ;;  %v682_v26 = vmax.f32 %v648_v16, 0.0  ;;  %4861 = vmatmul.msk.bf16.gmra.mxu2 %vm25_vm1, %v978_v17  ;;  %v6536_v16 = vld [vmem:[#allocation3 + $0x5c] sm:$0xff] }
 0x17a   :  { %v1862_v24 = vpack.c.bf16 %v1843_v21, %v1842_v9  ;;  %4889 = vmatmul.msk.bf16.gmra.mxu3 %vm25_vm1, %v935_v22  ;;  %v800_v39 = vld [vmem:[#allocation2 + $0xe0] ss:$2 sm:$0xff]  ;;  %v802_v40 = vld [vmem:[#allocation2 + $0xe1] ss:$2 sm:$0xff]  ;;  %v965_v21 = vld [vmem:[#allocation3 + $0x71] sm:$0xff] }
 0x17b   :  { %4996 = vmatmul.msk.bf16.gmra.mxu0 %vm25_vm1, %v1667_v23  ;;  %401 = vst.msk [vmem:[#allocation2 + $0xf0] sm:$0xff] %vm25_vm1, %v369_v25  ;;  %v896_v37 = vld [vmem:[#allocation2 + $0x1e0] ss:$2 sm:$0xff]  ;;  %v898_v38 = vld [vmem:[#allocation2 + $0x1e1] ss:$2 sm:$0xff]  ;;  %v807_v45 = vmax.f32 %v800_v39, %v802_v40  ;;  %v922_v23 = vld [vmem:[#allocation3 + $0x70] sm:$0xff] }
 0x17c   :  { %5032 = vmatmul.msk.bf16.gmra.mxu1 %vm25_vm1, %v1862_v24  ;;  %714 = vst.msk [vmem:[#allocation2 + $0x1f0] sm:$0xff] %vm25_vm1, %v682_v26  ;;  %v903_v42 = vmax.f32 %v896_v37, %v898_v38  ;;  %v963_v8 = vld [vmem:[#allocation3 + $0x61] sm:$0xff]  ;;  %v964_v9 = vld [vmem:[#allocation3 + $0x69] sm:$0xff]  ;;  %v966_v22 = vld [vmem:[#allocation3 + $0x79] sm:$0xff] }
 0x17d   :  { %v1069_v27 = vpop.f32.mrf.mxu2  ;;  %v1197_v28 = vpop.f32.mrf.mxu3  ;;  %v1652_v11 = vld [vmem:[#allocation3 + $0x63] sm:$0xff]  ;;  %v980_v17 = vpack.c.bf16 %v964_v9, %v963_v8  ;;  %v923_v24 = vld [vmem:[#allocation3 + $0x78] sm:$0xff]  ;;  %v1653_v25 = vld [vmem:[#allocation3 + $0x6b] sm:$0xff] }
 0x17e   :  { %v6514_v29 = vadd.f32 %v1197_v28, %v1069_v27  ;;  %v336_v30 = vpop.f32.mrf.mxu0  ;;  %v649_v31 = vpop.f32.mrf.mxu1  ;;  %v920_v12 = vld [vmem:[#allocation3 + $0x60] sm:$0xff]  ;;  %v921_v13 = vld [vmem:[#allocation3 + $0x68] sm:$0xff]  ;;  %v1669_v15 = vpack.c.bf16 %v1652_v11, %v1651_v10  ;;  %v1654_v26 = vld [vmem:[#allocation3 + $0x73] sm:$0xff] }
 0x17f   :  { %v337_v32 = vadd.f32 %v6012_v1, %v336_v30  ;;  %v650_v34 = vadd.f32 %v6012_v1, %v649_v31  ;;  %v1847_v14 = vld [vmem:[#allocation3 + $0x64] sm:$0xff]  ;;  %v937_v19 = vpack.c.bf16 %v921_v13, %v920_v12  ;;  %v6543_v27 = vld [vmem:[#allocation3 + $0x6c] sm:$0xff]  ;;  %v1849_v28 = vld [vmem:[#allocation3 + $0x74] sm:$0xff]  ;;  %v981_v30 = vpack.c.bf16 %v966_v22, %v965_v21 }
 0x180   :  { %v1864_v20 = vpack.c.bf16 %v1847_v14, %v6536_v16  ;;  %v938_v31 = vpack.c.bf16 %v923_v24, %v922_v23  ;;  %v924_v37 = vld [vmem:[#allocation3 + $0x80] sm:$0xff]  ;;  %v968_v39 = vld [vmem:[#allocation3 + $0x89] sm:$0xff]  ;;  %v5889_v24 = vld [vmem:[%s7591_s2 + $0xd8] sm:$0xff] }
 0x181   :  { %v370_v35 = vmax.f32 %v337_v32, 0.0  ;;  %v683_v36 = vmax.f32 %v650_v34, 0.0  ;;  %v1670_v32 = vpack.c.bf16 %v1654_v26, %v1653_v25  ;;  %v1865_v34 = vpack.c.bf16 %v1849_v28, %v6543_v27  ;;  %v967_v38 = vld [vmem:[#allocation3 + $0x81] sm:$0xff]  ;;  %v972_v11 = vld [vmem:[#allocation3 + $0xa9] sm:$0xff]  ;;  %v5897_v25 = vld [vmem:[%s7591_s2 + $0x118] sm:$0xff] }
 0x182   :  { %v925_v40 = vld [vmem:[#allocation3 + $0x88] sm:$0xff]  ;;  %v928_v12 = vld [vmem:[#allocation3 + $0xa0] sm:$0xff]  ;;  %v5893_v26 = vld [vmem:[%s7591_s2 + $0xf8] sm:$0xff]  ;;  %2529 = vmatpush.bf16.msra.mxu0 %v5897_v25 }
 0x183   :  { %402 = vst.msk [vmem:[#allocation2 + $0xf8] sm:$0xff] %vm25_vm1, %v370_v35  ;;  %v5870_v35 = vld [vmem:[%s7591_s2 + $0x40] sm:$0xff]  ;;  %v929_v13 = vld [vmem:[#allocation3 + $0xa8] sm:$0xff] }
 0x184   :  { %715 = vst.msk [vmem:[#allocation2 + $0x1f8] sm:$0xff] %vm25_vm1, %v683_v36  ;;  %1362 = vmatpush.bf16.msrb.mxu2 %v5870_v35  ;;  %v5874_v36 = vld [vmem:[%s7591_s2 + $0x60] sm:$0xff]  ;;  %v973_v35 = vld [vmem:[#allocation3 + $0xb1] sm:$0xf] }
 0x185   :  { %v6526_v54 = vpop.f32.mrf.mxu2  ;;  %v6528_v55 = vpop.f32.mrf.mxu3  ;;  %1557 = vmatpush.bf16.msrb.mxu3 %v5874_v36  ;;  %v971_v10 = vld [vmem:[#allocation3 + $0xa1] sm:$0xff]  ;;  %v930_v36 = vld [vmem:[#allocation3 + $0xb0] sm:$0xf] }
 0x186   :  { %v6563_v49 = vpop.f32.mrf.mxu0  ;;  %v1659_v14 = vld [vmem:[#allocation3 + $0x9b] sm:$0xff] }
 0x187   :  { %v6582_v22 = vld [vmem:[#allocation3 + $0x9c] sm:$0xff] }
 0x188   :  { %2139 = vmatpush.bf16.msra.mxu2 %v5889_v24  ;;  %v5892_v24 = vld [vmem:[%s7591_s2 + $0xf0] sm:$0xff] }
 0x189   :  { %2334 = vmatpush.bf16.msra.mxu3 %v5893_v26 }
 0x18a   :  { %v804_v43 = vld [vmem:[#allocation2 + $0xf0] ss:$2 sm:$0xff]  ;;  %v806_v44 = vld [vmem:[#allocation2 + $0xf1] ss:$2 sm:$0xff] }
 0x18b   :  { %v808_v46 = vmax.f32 %v804_v43, %v806_v44  ;;  %v900_v47 = vld [vmem:[#allocation2 + $0x1f0] ss:$2 sm:$0xff]  ;;  %v902_v48 = vld [vmem:[#allocation2 + $0x1f1] ss:$2 sm:$0xff]  ;;  %v1851_v43 = vld [vmem:[#allocation3 + $0x84] sm:$0xff]  ;;  %v982_v44 = vpack.c.bf16 %v968_v39, %v967_v38 }
 0x18c   :  { %v904_v50 = vmax.f32 %v900_v47, %v902_v48  ;;  %v6556_v47 = vld [vmem:[#allocation3 + $0x7c] sm:$0xff]  ;;  %v1661_v38 = vld [vmem:[#allocation3 + $0xab] sm:$0xff] }
 0x18d   :  { %v809_v51 = vmax.f32 %v807_v45, %v808_v46  ;;  %v939_v45 = vpack.c.bf16 %v925_v40, %v924_v37  ;;  %v1866_v48 = vpack.c.bf16 %v1851_v43, %v6556_v47  ;;  %v1856_v40 = vld [vmem:[#allocation3 + $0xac] sm:$0xff]  ;;  %v985_v43 = vpack.c.bf16 %v973_v35, %v973_v35  ;;  %2335 = vmatpush.bf16.msra.mxu3 %v5892_v24 }
 0x18e   :  { %v905_v53 = vmax.f32 %v903_v42, %v904_v50  ;;  %v1656_v42 = vld [vmem:[#allocation3 + $0x83] sm:$0xff]  ;;  %v969_v50 = vld [vmem:[#allocation3 + $0x91] sm:$0xff] }
 0x18f   :  { %810 = vst.msk [vmem:[#allocation3 + $0x51] sm:$0xff] %vm25_vm1, %v809_v51  ;;  %v1671_v46 = vpack.c.bf16 %v1656_v42, %v1655_v41  ;;  %v5894_v42 = vld [vmem:[%s7591_s2 + $0x100] sm:$0xff] }
 0x190   :  { %906 = vst.msk [vmem:[#allocation3 + $0xb5] sm:$0xff] %vm25_vm1, %v905_v53 }
 0x196   :  { %v961_v57 = vld [vmem:[#allocation3 + $0x51] sm:$0xff] }
 0x197   :  { %v918_v58 = vld [vmem:[#allocation3 + $0x50] sm:$0xff]  ;;  %v919_v59 = vld [vmem:[#allocation3 + $0x58] sm:$0xff]  ;;  %v979_v60 = vpack.c.bf16 %v962_v56, %v961_v57 }
 0x198   :  { %v936_v61 = vpack.c.bf16 %v919_v59, %v918_v58  ;;  %v1649_v62 = vld [vmem:[#allocation3 + $0x4b] sm:$0xff]  ;;  %v1650_v63 = vld [vmem:[#allocation3 + $0x53] sm:$0xff] }
 0x199   :  { %v1844_v0 = vld [vmem:[#allocation3 + $0x4c] sm:$0xff]  ;;  %v1668_v18 = vpack.c.bf16 %v1650_v63, %v1649_v62  ;;  %v1845_v1 = vld [vmem:[#allocation3 + $0x54] sm:$0xff]  ;;  %4862 = vmatmul.msk.bf16.gmra.mxu2 %vm25_vm1, %v979_v60  ;;  %v6569_v62 = vpop.f32.mrf.mxu0 }
 0x19a   :  { %4890 = vmatmul.msk.bf16.gmra.mxu3 %vm25_vm1, %v936_v61  ;;  %v1863_v2 = vpack.c.bf16 %v1845_v1, %v1844_v0  ;;  %v970_v56 = vld [vmem:[#allocation3 + $0x99] sm:$0xff]  ;;  %v926_v57 = vld [vmem:[#allocation3 + $0x90] sm:$0xff] }
 0x19b   :  { %4997 = vmatmul.msk.bf16.gmra.mxu0 %vm25_vm1, %v1668_v18  ;;  %v927_v58 = vld [vmem:[#allocation3 + $0x98] sm:$0xff]  ;;  %v1657_v59 = vld [vmem:[#allocation3 + $0x8b] sm:$0xff]  ;;  %v983_v63 = vpack.c.bf16 %v970_v56, %v969_v50 }
 0x19c   :  { %5033 = vmatmul.msk.bf16.gmra.mxu1 %vm25_vm1, %v1863_v2  ;;  %v1074_v3 = vpop.f32.mrf.mxu2  ;;  %v1658_v60 = vld [vmem:[#allocation3 + $0x93] sm:$0xff]  ;;  %v940_v0 = vpack.c.bf16 %v927_v58, %v926_v57  ;;  %v1663_v58 = vld [vmem:[#allocation3 + $0xbb] sm:$0xf] }
 0x19d   :  { %v1202_v4 = vpop.f32.mrf.mxu3  ;;  %v1853_v61 = vld [vmem:[#allocation3 + $0x94] sm:$0xff]  ;;  %v1672_v18 = vpack.c.bf16 %v1658_v60, %v1657_v59  ;;  %v6571_v1 = vld [vmem:[#allocation3 + $0x8c] sm:$0xff]  ;;  %v1251_v59 = vld [vmem:[#allocation3 + $0x2] sm:$0xff] }
 0x19e   :  { %v6534_v5 = vadd.f32 %v1202_v4, %v1074_v3  ;;  %v1867_v2 = vpack.c.bf16 %v1853_v61, %v6571_v1  ;;  %v1662_v39 = vld [vmem:[#allocation3 + $0xb3] sm:$0xff]  ;;  %v1252_v60 = vld [vmem:[#allocation3 + $0xa] sm:$0xff] }
 0x19f   :  { %v1857_v41 = vld [vmem:[#allocation3 + $0xb4] sm:$0xff] }
 0x1a0   :  { %v1447_v61 = vld [vmem:[#allocation3 + $0x12] sm:$0xff] }
 0x1a1   :  { %v6580_v9 = vpop.f32.mrf.mxu0 }
 0x1a4   :  { %v6565_v51 = vpop.f32.mrf.mxu2 }
 0x1a5   :  { %v6567_v53 = vpop.f32.mrf.mxu3 }
 0x1a9   :  { %4863 = vmatmul.msk.bf16.gmra.mxu2 %vm25_vm1, %v980_v17  ;;  %v1855_v17 = vld [vmem:[#allocation3 + $0xa4] sm:$0xff]  ;;  %v6597_v28 = vpop.f32.mrf.mxu0 }
 0x1aa   :  { %4891 = vmatmul.msk.bf16.gmra.mxu3 %vm25_vm1, %v937_v19  ;;  %v984_v19 = vpack.c.bf16 %v972_v11, %v971_v10  ;;  %v1868_v23 = vpack.c.bf16 %v1855_v17, %v6582_v22  ;;  %v1254_v11 = vld [vmem:[#allocation3 + $0x1a] sm:$0xff] }
 0x1ab   :  { %4998 = vmatmul.msk.bf16.gmra.mxu0 %vm25_vm1, %v1669_v15  ;;  %v1660_v15 = vld [vmem:[#allocation3 + $0xa3] sm:$0xff]  ;;  %v1275_v17 = vpack.c.bf16 %v1254_v11, %v1447_v61 }
 0x1ac   :  { %5034 = vmatmul.msk.bf16.gmra.mxu1 %vm25_vm1, %v1864_v20  ;;  %v941_v20 = vpack.c.bf16 %v929_v13, %v928_v12  ;;  %v1673_v21 = vpack.c.bf16 %v1660_v15, %v1659_v14  ;;  %v1449_v12 = vld [vmem:[#allocation3 + $0x22] sm:$0xff]  ;;  %v6634_v13 = vpop.f32.mrf.mxu1 }
 0x1ad   :  { %v2422_v14 = vld [vmem:[#allocation3 + $0x1e] sm:$0xff] }
 0x1b9   :  { %4864 = vmatmul.msk.bf16.gmra.mxu2 %vm25_vm1, %v981_v30  ;;  %v5896_v30 = vld [vmem:[%s7591_s2 + $0x110] sm:$0xff] }
 0x1ba   :  { %4892 = vmatmul.msk.bf16.gmra.mxu3 %vm25_vm1, %v938_v31  ;;  %2530 = vmatpush.bf16.msra.mxu0 %v5896_v30  ;;  %v5895_v31 = vld [vmem:[%s7591_s2 + $0x108] sm:$0xff]  ;;  %v6647_v30 = vpop.f32.mrf.mxu1 }
 0x1bb   :  { %4999 = vmatmul.msk.bf16.gmra.mxu0 %vm25_vm1, %v1670_v32  ;;  %v6606_v32 = vpop.f32.mrf.mxu0 }
 0x1bc   :  { %5035 = vmatmul.msk.bf16.gmra.mxu1 %vm25_vm1, %v1865_v34 }
 0x1be   :  { %2531 = vmatpush.bf16.msra.mxu0 %v5895_v31 }
 0x1c2   :  { %2532 = vmatpush.bf16.msra.mxu0 %v5894_v42 }
 0x1c3   :  { %v6619_v50 = vpop.f32.mrf.mxu0 }
 0x1c9   :  { %4865 = vmatmul.msk.bf16.gmra.mxu2 %vm25_vm1, %v982_v44  ;;  %v942_v44 = vpack.c.bf16 %v930_v36, %v930_v36 }
 0x1ca   :  { %4893 = vmatmul.msk.bf16.gmra.mxu3 %vm25_vm1, %v939_v45  ;;  %v1674_v45 = vpack.c.bf16 %v1662_v39, %v1661_v38  ;;  %v1256_v38 = vld [vmem:[#allocation3 + $0x2a] sm:$0xff]  ;;  %v1451_v39 = vld [vmem:[#allocation3 + $0x32] sm:$0xff] }
 0x1cb   :  { %5000 = vmatmul.msk.bf16.gmra.mxu0 %vm25_vm1, %v1671_v46  ;;  %v1869_v46 = vpack.c.bf16 %v1857_v41, %v1856_v40  ;;  %v2424_v40 = vld [vmem:[#allocation3 + $0x2e] sm:$0xff]  ;;  %v1276_v42 = vpack.c.bf16 %v1256_v38, %v1449_v12 }
 0x1cc   :  { %5036 = vmatmul.msk.bf16.gmra.mxu1 %vm25_vm1, %v1866_v48 }
 0x1d9   :  { %4866 = vmatmul.msk.bf16.gmra.mxu2 %vm25_vm1, %v983_v63 }
 0x1da   :  { %4894 = vmatmul.msk.bf16.gmra.mxu3 %vm25_vm1, %v940_v0  ;;  %v1675_v0 = vpack.c.bf16 %v1663_v58, %v1663_v58 }
 0x1db   :  { %5001 = vmatmul.msk.bf16.gmra.mxu0 %vm25_vm1, %v1672_v18  ;;  %v1274_v18 = vpack.c.bf16 %v1252_v60, %v1251_v59 }
 0x1dc   :  { %5037 = vmatmul.msk.bf16.gmra.mxu1 %vm25_vm1, %v1867_v2  ;;  %v1079_v3 = vpop.f32.mrf.mxu2  ;;  %v1469_v2 = vpack.c.bf16 %v1447_v61, %v1252_v60 }
 0x1dd   :  { %v1207_v4 = vpop.f32.mrf.mxu3 }
 0x1de   :  { %v6578_v8 = vadd.f32 %v1207_v4, %v1079_v3 }
 0x1e4   :  { %v6608_v34 = vpop.f32.mrf.mxu2 }
 0x1e5   :  { %v6610_v37 = vpop.f32.mrf.mxu3 }
 0x1e9   :  { %4867 = vmatmul.msk.bf16.gmra.mxu2 %vm25_vm1, %v984_v19  ;;  %v1470_v19 = vpack.c.bf16 %v1449_v12, %v1254_v11  ;;  %v2425_v12 = vld [vmem:[#allocation3 + $0x36] sm:$0xff] }
 0x1ea   :  { %4895 = vmatmul.msk.bf16.gmra.mxu3 %vm25_vm1, %v941_v20  ;;  %v2421_v20 = vld [vmem:[#allocation3 + $0x16] sm:$0xff] }
 0x1eb   :  { %5002 = vmatmul.msk.bf16.gmra.mxu0 %vm25_vm1, %v1673_v21  ;;  %v2444_v21 = vpack.c.bf16 %v2422_v14, %v2421_v20  ;;  %v2426_v14 = vld [vmem:[#allocation3 + $0x3e] sm:$0xff] }
 0x1ec   :  { %5038 = vmatmul.msk.bf16.gmra.mxu1 %vm25_vm1, %v1868_v23  ;;  %v5888_v23 = vld [vmem:[%s7591_s2 + $0xd0] sm:$0xff] }
 0x1ed   :  { %2140 = vmatpush.bf16.msra.mxu2 %v5888_v23 }
 0x1f8   :  { %v6623_v63 = vpop.f32.mrf.mxu0 }
 0x1f9   :  { %4868 = vmatmul.msk.bf16.gmra.mxu2 %vm25_vm1, %v985_v43  ;;  %v1471_v43 = vpack.c.bf16 %v1451_v39, %v1256_v38 }
 0x1fa   :  { %4896 = vmatmul.msk.bf16.gmra.mxu3 %vm25_vm1, %v942_v44  ;;  %v2423_v44 = vld [vmem:[#allocation3 + $0x26] sm:$0xff] }
 0x1fb   :  { %5003 = vmatmul.msk.bf16.gmra.mxu0 %vm25_vm1, %v1674_v45  ;;  %v2445_v45 = vpack.c.bf16 %v2424_v40, %v2423_v44  ;;  %v1260_v40 = vld [vmem:[#allocation3 + $0x4a] sm:$0xff] }
 0x1fc   :  { %5039 = vmatmul.msk.bf16.gmra.mxu1 %vm25_vm1, %v1869_v46  ;;  %v1084_v48 = vpop.f32.mrf.mxu2  ;;  %v6651_v46 = vpop.f32.mrf.mxu1 }
 0x1fd   :  { %v1212_v56 = vpop.f32.mrf.mxu3 }
 0x1fe   :  { %v6621_v57 = vadd.f32 %v1212_v56, %v1084_v48 }
 0x200   :  { %v6628_v3 = vpop.f32.mrf.mxu0 }
 0x204   :  { %v6630_v4 = vpop.f32.mrf.mxu2  ;;  %v6658_v60 = vpop.f32.mrf.mxu1 }
 0x205   :  { %v6632_v10 = vpop.f32.mrf.mxu3 }
 0x209   :  { %4921 = vmatmul.msk.bf16.vlgmr.msrb.gmra.mxu2 %vm25_vm1, %v1274_v18  ;;  %v1258_v18 = vld [vmem:[#allocation3 + $0x3a] sm:$0xff] }
 0x20a   :  { %4957 = vmatmul.msk.bf16.vlgmr.msrb.gmra.mxu3 %vm25_vm1, %v1469_v2  ;;  %v1453_v2 = vld [vmem:[#allocation3 + $0x42] sm:$0xff] }
 0x20b   :  { %5004 = vmatmul.msk.bf16.gmra.mxu0 %vm25_vm1, %v1675_v0  ;;  %v1472_v20 = vpack.c.bf16 %v1453_v2, %v1258_v18 }
 0x20c   :  { %v6667_v23 = vpop.f32.mrf.mxu1 }
 0x218   :  { %v6636_v15 = vpop.f32.mrf.mxu0 }
 0x219   :  { %7598 = vst [vmem:[#allocation11_spill] sm:$0xff] %v6636_v15  ;;  %4922 = vmatmul.msk.bf16.gmra.mxu2 %vm25_vm1, %v1275_v17 }
 0x21a   :  { %4958 = vmatmul.msk.bf16.gmra.mxu3 %vm25_vm1, %v1470_v19  ;;  %v1277_v19 = vpack.c.bf16 %v1258_v18, %v1451_v39  ;;  %v1455_v39 = vld [vmem:[#allocation3 + $0x52] sm:$0xff] }
 0x21b   :  { %5137 = vmatmul.msk.bf16.vlgmr.msra.gmra.mxu0 %vm25_vm1, %v2444_v21  ;;  %v2446_v21 = vpack.c.bf16 %v2426_v14, %v2425_v12 }
 0x21c   :  { %v1089_v25 = vpop.f32.mrf.mxu2 }
 0x21d   :  { %v1217_v26 = vpop.f32.mrf.mxu3 }
 0x220   :  { %v6649_v31 = vpop.f32.mrf.mxu0 }
 0x221   :  { %7599 = vst [vmem:[#allocation12_spill] sm:$0xff] %v6649_v31 }
 0x224   :  { %v1091_v35 = vpop.f32.mrf.mxu2 }
 0x225   :  { %v1219_v36 = vpop.f32.mrf.mxu3 }
 0x228   :  { %v1779_v41 = vpop.f32.mrf.mxu0 }
 0x229   :  { %4923 = vmatmul.msk.bf16.gmra.mxu2 %vm25_vm1, %v1276_v42  ;;  %v6673_v41 = vpop.f32.mrf.mxu1 }
 0x22a   :  { %4959 = vmatmul.msk.bf16.gmra.mxu3 %vm25_vm1, %v1471_v43  ;;  %v2428_v43 = vld [vmem:[#allocation3 + $0x4e] sm:$0xff] }
 0x22b   :  { %5138 = vmatmul.msk.bf16.gmra.mxu0 %vm25_vm1, %v2445_v45  ;;  %v1278_v45 = vpack.c.bf16 %v1260_v40, %v1453_v2 }
 0x22c   :  { %v1094_v48 = vpop.f32.mrf.mxu2 }
 0x22d   :  { %v1222_v56 = vpop.f32.mrf.mxu3 }
 0x22e   :  { %v6656_v58 = vadd.f32 %v1222_v56, %v1094_v48  ;;  %v1473_v48 = vpack.c.bf16 %v1455_v39, %v1260_v40  ;;  %v2427_v56 = vld [vmem:[#allocation3 + $0x46] sm:$0xff]  ;;  %v2429_v40 = vld [vmem:[#allocation3 + $0x56] sm:$0xff] }
 0x230   :  { %v1781_v59 = vpop.f32.mrf.mxu0 }
 0x231   :  { %v2447_v59 = vpack.c.bf16 %v2428_v43, %v2427_v56  ;;  %v6688_v12 = vpop.f32.mrf.mxu1  ;;  %v2430_v43 = vld [vmem:[#allocation3 + $0x5e] sm:$0xff] }
 0x234   :  { %v1096_v61 = vpop.f32.mrf.mxu2 }
 0x235   :  { %v1224_v0 = vpop.f32.mrf.mxu3 }
 0x236   :  { %v6660_v11 = vadd.f32 %v1224_v0, %v1096_v61  ;;  %v5887_v61 = vld [vmem:[%s7591_s2 + $0xc8] sm:$0xff] }
 0x237   :  { %v5891_v0 = vld [vmem:[%s7591_s2 + $0xe8] sm:$0xff]  ;;  %2141 = vmatpush.bf16.msra.mxu2 %v5887_v61 }
 0x238   :  { %v6662_v17 = vpop.f32.mrf.mxu0  ;;  %2336 = vmatpush.bf16.msra.mxu3 %v5891_v0 }
 0x239   :  { %7600 = vst [vmem:[#allocation13_spill] sm:$0xff] %v6662_v17  ;;  %4924 = vmatmul.msk.bf16.gmra.mxu2 %vm25_vm1, %v1277_v19  ;;  %v2434_v17 = vld [vmem:[#allocation3 + $0x7e] sm:$0xff] }
 0x23a   :  { %4960 = vmatmul.msk.bf16.gmra.mxu3 %vm25_vm1, %v1472_v20 }
 0x23b   :  { %5139 = vmatmul.msk.bf16.gmra.mxu0 %vm25_vm1, %v2446_v21 }
 0x23c   :  { %v1099_v24 = vpop.f32.mrf.mxu2 }
 0x23d   :  { %v1227_v25 = vpop.f32.mrf.mxu3 }
 0x23e   :  { %v6669_v26 = vadd.f32 %v1227_v25, %v1099_v24  ;;  %v1262_v24 = vld [vmem:[#allocation3 + $0x5a] sm:$0xff]  ;;  %v1457_v25 = vld [vmem:[#allocation3 + $0x62] sm:$0xff] }
 0x23f   :  { %v1279_v56 = vpack.c.bf16 %v1262_v24, %v1455_v39 }
 0x240   :  { %v6671_v35 = vpop.f32.mrf.mxu0 }
 0x241   :  { %7601 = vst [vmem:[#allocation14_spill] sm:$0xff] %v6671_v35  ;;  %v1461_v35 = vld [vmem:[#allocation3 + $0x82] sm:$0xff] }
 0x244   :  { %v1101_v36 = vpop.f32.mrf.mxu2 }
 0x245   :  { %v1229_v38 = vpop.f32.mrf.mxu3 }
 0x246   :  { %v6675_v42 = vadd.f32 %v1229_v38, %v1101_v36  ;;  %v1474_v38 = vpack.c.bf16 %v1457_v25, %v1262_v24  ;;  %v2431_v24 = vld [vmem:[#allocation3 + $0x66] sm:$0xff] }
 0x248   :  { %v6677_v44 = vpop.f32.mrf.mxu0 }
 0x249   :  { %7602 = vst [vmem:[#allocation15_spill] sm:$0xff] %v6677_v44  ;;  %4925 = vmatmul.msk.bf16.gmra.mxu2 %vm25_vm1, %v1278_v45  ;;  %v6696_v45 = vpop.f32.mrf.mxu1 }
 0x24a   :  { %4961 = vmatmul.msk.bf16.gmra.mxu3 %vm25_vm1, %v1473_v48  ;;  %7604 = vst [vmem:[#allocation17_spill] sm:$0xff] %v6696_v45 }
 0x24b   :  { %5140 = vmatmul.msk.bf16.gmra.mxu0 %vm25_vm1, %v2447_v59  ;;  %v2448_v59 = vpack.c.bf16 %v2430_v43, %v2429_v40  ;;  %v2432_v40 = vld [vmem:[#allocation3 + $0x6e] sm:$0xff] }
 0x24c   :  { %v1104_v18 = vpop.f32.mrf.mxu2 }
 0x24d   :  { %v1232_v2 = vpop.f32.mrf.mxu3 }
 0x24e   :  { %v6690_v14 = vadd.f32 %v1232_v2, %v1104_v18 }
 0x250   :  { %v6692_v19 = vpop.f32.mrf.mxu0 }
 0x251   :  { %7603 = vst [vmem:[#allocation16_spill] sm:$0xff] %v6692_v19  ;;  %v6705_v2 = vpop.f32.mrf.mxu1  ;;  %v1264_v19 = vld [vmem:[#allocation3 + $0x6a] sm:$0xff] }
 0x252   :  { %7606 = vst [vmem:[#allocation19_spill] sm:$0xff] %v6705_v2 }
 0x254   :  { %v1106_v20 = vpop.f32.mrf.mxu2 }
 0x255   :  { %v1234_v21 = vpop.f32.mrf.mxu3 }
 0x256   :  { %v6694_v36 = vadd.f32 %v1234_v21, %v1106_v20 }
 0x258   :  { %v6698_v48 = vpop.f32.mrf.mxu0 }
 0x259   :  { %7605 = vst [vmem:[#allocation18_spill] sm:$0xff] %v6698_v48  ;;  %4926 = vmatmul.msk.bf16.gmra.mxu2 %vm25_vm1, %v1279_v56  ;;  %v1459_v48 = vld [vmem:[#allocation3 + $0x72] sm:$0xff]  ;;  %v6713_v44 = vpop.f32.mrf.mxu1 }
 0x25a   :  { %4962 = vmatmul.msk.bf16.gmra.mxu3 %vm25_vm1, %v1474_v38  ;;  %v1280_v38 = vpack.c.bf16 %v1264_v19, %v1457_v25  ;;  %v1475_v56 = vpack.c.bf16 %v1459_v48, %v1264_v19  ;;  %7609 = vst [vmem:[#allocation22_spill] sm:$0xff] %v6713_v44 }
 0x25b   :  { %5141 = vmatmul.msk.bf16.gmra.mxu0 %vm25_vm1, %v2448_v59  ;;  %v2449_v59 = vpack.c.bf16 %v2432_v40, %v2431_v24  ;;  %v1266_v40 = vld [vmem:[#allocation3 + $0x7a] sm:$0xff] }
 0x25c   :  { %v1109_v61 = vpop.f32.mrf.mxu2  ;;  %v1476_v44 = vpack.c.bf16 %v1461_v35, %v1266_v40 }
 0x25d   :  { %v1237_v0 = vpop.f32.mrf.mxu3 }
 0x25e   :  { %v6703_v18 = vadd.f32 %v1237_v0, %v1109_v61  ;;  %v1858_v61 = vld [vmem:[#allocation3 + $0xbc] sm:$0xf] }
 0x25f   :  { %v1870_v0 = vpack.c.bf16 %v1858_v61, %v1858_v61  ;;  %v1281_v61 = vpack.c.bf16 %v1266_v40, %v1459_v48  ;;  %v1268_v40 = vld [vmem:[#allocation3 + $0x8a] sm:$0xff] }
 0x260   :  { %v6707_v20 = vpop.f32.mrf.mxu0  ;;  %v1282_v2 = vpack.c.bf16 %v1268_v40, %v1461_v35  ;;  %v1195_v35 = vadd.f32 %v6506_v7, %v6504_v6 }
 0x261   :  { %7607 = vst [vmem:[#allocation20_spill] sm:$0xff] %v6707_v20  ;;  %5040 = vmatmul.msk.bf16.gmra.mxu1 %vm25_vm1, %v1870_v0  ;;  %v1974_v19 = vpop.f32.mrf.mxu1  ;;  %v5890_v0 = vld [vmem:[%s7591_s2 + $0xe0] sm:$0xff] }
 0x262   :  { %2337 = vmatpush.bf16.msra.mxu3 %v5890_v0 }
 0x264   :  { %v1111_v21 = vpop.f32.mrf.mxu2 }
 0x265   :  { %v1239_v33 = vpop.f32.mrf.mxu3 }
 0x266   :  { %v6709_v39 = vadd.f32 %v1239_v33, %v1111_v21 }
 0x268   :  { %v6711_v43 = vpop.f32.mrf.mxu0 }
 0x269   :  { %7608 = vst [vmem:[#allocation21_spill] sm:$0xff] %v6711_v43  ;;  %4927 = vmatmul.msk.bf16.gmra.mxu2 %vm25_vm1, %v1280_v38  ;;  %v1976_v48 = vpop.f32.mrf.mxu1 }
 0x26a   :  { %4963 = vmatmul.msk.bf16.gmra.mxu3 %vm25_vm1, %v1475_v56  ;;  %v2433_v56 = vld [vmem:[#allocation3 + $0x76] sm:$0xff] }
 0x26b   :  { %5142 = vmatmul.msk.bf16.gmra.mxu0 %vm25_vm1, %v2449_v59  ;;  %v2450_v31 = vpack.c.bf16 %v2434_v17, %v2433_v56  ;;  %v1463_v56 = vld [vmem:[#allocation3 + $0x92] sm:$0xff] }
 0x26c   :  { %v1114_v20 = vpop.f32.mrf.mxu2 }
 0x26d   :  { %v1242_v33 = vpop.f32.mrf.mxu3 }
 0x26e   :  { %v6718_v21 = vadd.f32 %v1242_v33, %v1114_v20  ;;  %v5886_v20 = vld [vmem:[%s7591_s2 + $0xc0] sm:$0xff] }
 0x26f   :  { %2142 = vmatpush.bf16.msra.mxu2 %v5886_v20  ;;  %v1477_v20 = vpack.c.bf16 %v1463_v56, %v1268_v40 }
 0x270   :  { %v6721_v43 = vpop.f32.mrf.mxu0 }
 0x271   :  { %7610 = vst [vmem:[#allocation23_spill] sm:$0xff] %v6721_v43 }
 0x274   :  { %v1116_v25 = vpop.f32.mrf.mxu2 }
 0x275   :  { %v1244_v24 = vpop.f32.mrf.mxu3 }
 0x276   :  { %v6723_v38 = vadd.f32 %v1244_v24, %v1116_v25 }
 0x278   :  { %v6725_v59 = vpop.f32.mrf.mxu0 }
 0x279   :  { %7611 = vst [vmem:[#allocation24_spill] sm:$0xff] %v6725_v59  ;;  %4928 = vmatmul.msk.bf16.gmra.mxu2 %vm25_vm1, %v1281_v61  ;;  %v2435_v61 = vld [vmem:[#allocation3 + $0x86] sm:$0xff]  ;;  %v2436_v59 = vld [vmem:[#allocation3 + $0x8e] sm:$0xff] }
 0x27a   :  { %4964 = vmatmul.msk.bf16.gmra.mxu3 %vm25_vm1, %v1476_v44  ;;  %v2451_v15 = vpack.c.bf16 %v2436_v59, %v2435_v61  ;;  %v1270_v61 = vld [vmem:[#allocation3 + $0x9a] sm:$0xff] }
 0x27b   :  { %5143 = vmatmul.msk.bf16.gmra.mxu0 %vm25_vm1, %v2450_v31  ;;  %v6740_v31 = vpop.f32.mrf.mxu1 }
 0x27c   :  { %v1119_v33 = vpop.f32.mrf.mxu2  ;;  %7613 = vst [vmem:[#allocation26_spill] sm:$0xff] %v6740_v31  ;;  %v1283_v31 = vpack.c.bf16 %v1270_v61, %v1463_v56 }
 0x27d   :  { %v1247_v19 = vpop.f32.mrf.mxu3 }
 0x27e   :  { %v6736_v17 = vadd.f32 %v1247_v19, %v1119_v33 }
 0x280   :  { %v6738_v25 = vpop.f32.mrf.mxu0 }
 0x281   :  { %7612 = vst [vmem:[#allocation25_spill] sm:$0xff] %v6738_v25  ;;  %v2438_v25 = vld [vmem:[#allocation3 + $0x9e] sm:$0xff] }
 0x284   :  { %v1121_v44 = vpop.f32.mrf.mxu2 }
 0x285   :  { %v1249_v24 = vpop.f32.mrf.mxu3 }
 0x286   :  { %v6750_v24 = vpop.f32.mrf.mxu1 }
 0x288   :  { %v6742_v43 = vpop.f32.mrf.mxu0 }
 0x289   :  { %7614 = vst [vmem:[#allocation27_spill] sm:$0xff] %v6742_v43  ;;  %4929 = vmatmul.msk.bf16.gmra.mxu2 %vm25_vm1, %v1282_v2  ;;  %v1465_v2 = vld [vmem:[#allocation3 + $0xa2] sm:$0xff] }
 0x28a   :  { %4965 = vmatmul.msk.bf16.gmra.mxu3 %vm25_vm1, %v1477_v20  ;;  %v2437_v20 = vld [vmem:[#allocation3 + $0x96] sm:$0xff]  ;;  %v1478_v45 = vpack.c.bf16 %v1465_v2, %v1270_v61 }
 0x28b   :  { %5144 = vmatmul.msk.bf16.gmra.mxu0 %vm25_vm1, %v2451_v15 }
 0x28c   :  { %v1364_v0 = vpop.f32.mrf.mxu2 }
 0x28d   :  { %v1559_v33 = vpop.f32.mrf.mxu3  ;;  %v1423_v19 = vadd.f32 %v1364_v0, %v6461_v52  ;;  %v2452_v52 = vpack.c.bf16 %v2438_v25, %v2437_v20  ;;  %v1272_v25 = vld [vmem:[#allocation3 + $0xaa] sm:$0xff] }
 0x28e   :  { %v6759_v0 = vpop.f32.mrf.mxu1  ;;  %v1284_v20 = vpack.c.bf16 %v1272_v25, %v1465_v2 }
 0x28f   :  { %v6748_v48 = vadd.f32 %v1559_v33, %v1423_v19  ;;  %7615 = vst [vmem:[#allocation28_spill] sm:$0xff] %v6759_v0 }
 0x290   :  { %v1811_v44 = vpop.f32.mrf.mxu0 }
 0x294   :  { %v1366_v40 = vpop.f32.mrf.mxu2 }
 0x295   :  { %v1561_v59 = vpop.f32.mrf.mxu3  ;;  %v1424_v43 = vadd.f32 %v1366_v40, %v1195_v35  ;;  %v1467_v35 = vld [vmem:[#allocation3 + $0xb2] sm:$0xff]  ;;  %v2439_v40 = vld [vmem:[#allocation3 + $0xa6] sm:$0xff] }
 0x297   :  { %v6754_v15 = vadd.f32 %v1561_v59, %v1424_v43  ;;  %v1200_v43 = vadd.f32 %v6528_v55, %v6526_v54  ;;  %v2440_v59 = vld [vmem:[#allocation3 + $0xae] sm:$0xff] }
 0x298   :  { %v2453_v0 = vpack.c.bf16 %v2440_v59, %v2439_v40 }
 0x299   :  { %4930 = vmatmul.msk.bf16.gmra.mxu2 %vm25_vm1, %v1283_v31  ;;  %v6766_v31 = vpop.f32.mrf.mxu1 }
 0x29a   :  { %4966 = vmatmul.msk.bf16.gmra.mxu3 %vm25_vm1, %v1478_v45 }
 0x29b   :  { %5145 = vmatmul.msk.bf16.gmra.mxu0 %vm25_vm1, %v2452_v52  ;;  %v1479_v52 = vpack.c.bf16 %v1467_v35, %v1272_v25  ;;  %v2441_v35 = vld [vmem:[#allocation3 + $0xb6] sm:$0xff] }
 0x29c   :  { %v1369_v6 = vpop.f32.mrf.mxu2 }
 0x29d   :  { %v1564_v7 = vpop.f32.mrf.mxu3  ;;  %v1425_v33 = vadd.f32 %v1369_v6, %v6514_v29 }
 0x29f   :  { %v6762_v19 = vadd.f32 %v1564_v7, %v1425_v33  ;;  %v1205_v33 = vadd.f32 %v6567_v53, %v6565_v51 }
 0x2a1   :  { %v6774_v6 = vpop.f32.mrf.mxu1 }
 0x2a4   :  { %v1371_v56 = vpop.f32.mrf.mxu2 }
 0x2a5   :  { %v1566_v44 = vpop.f32.mrf.mxu3  ;;  %v1426_v45 = vadd.f32 %v1371_v56, %v1200_v43  ;;  %v1273_v56 = vld [vmem:[#allocation3 + $0xb2] sm:$0xf] }
 0x2a7   :  { %v6768_v61 = vadd.f32 %v1566_v44, %v1426_v45  ;;  %v1468_v44 = vld [vmem:[#allocation3 + $0xba] sm:$0xf]  ;;  %v2442_v45 = vld [vmem:[#allocation3 + $0xbe] sm:$0xff] }
 0x2a8   :  { %v1480_v59 = vpack.c.bf16 %v1468_v44, %v1468_v44 }
 0x2a9   :  { %4931 = vmatmul.msk.bf16.gmra.mxu2 %vm25_vm1, %v1284_v20  ;;  %v2454_v20 = vpack.c.bf16 %v2442_v45, %v2441_v35  ;;  %v2226_v35 = vld [vmem:[#allocation3 + $0x15] sm:$0xff] }
 0x2aa   :  { %4967 = vmatmul.msk.bf16.gmra.mxu3 %vm25_vm1, %v1479_v52 }
 0x2ab   :  { %5146 = vmatmul.msk.bf16.gmra.mxu0 %vm25_vm1, %v2453_v0  ;;  %v1285_v0 = vpack.c.bf16 %v1273_v56, %v1273_v56  ;;  %v2227_v56 = vld [vmem:[#allocation3 + $0x1d] sm:$0xff] }
 0x2ac   :  { %v1374_v29 = vpop.f32.mrf.mxu2 }
 0x2ad   :  { %v1569_v54 = vpop.f32.mrf.mxu3  ;;  %v1427_v55 = vadd.f32 %v1374_v29, %v6534_v5  ;;  %v6782_v5 = vpop.f32.mrf.mxu1 }
 0x2af   :  { %v6776_v7 = vadd.f32 %v1569_v54, %v1427_v55  ;;  %v1210_v54 = vadd.f32 %v6610_v37, %v6608_v34 }
 0x2b4   :  { %v1376_v2 = vpop.f32.mrf.mxu2 }
 0x2b5   :  { %v1571_v43 = vpop.f32.mrf.mxu3  ;;  %v1428_v25 = vadd.f32 %v1376_v2, %v1205_v33  ;;  %v6792_v55 = vpop.f32.mrf.mxu1 }
 0x2b7   :  { %v6780_v40 = vadd.f32 %v1571_v43, %v1428_v25  ;;  %v2032_v43 = vld [vmem:[#allocation3 + $0x1c] sm:$0xff]  ;;  %v2031_v25 = vld [vmem:[#allocation3 + $0x14] sm:$0xff] }
 0x2b9   :  { %4932 = vmatmul.msk.bf16.gmra.mxu2 %vm25_vm1, %v1285_v0  ;;  %v2054_v0 = vpack.c.bf16 %v2032_v43, %v2031_v25 }
 0x2ba   :  { %4968 = vmatmul.msk.bf16.gmra.mxu3 %vm25_vm1, %v1480_v59  ;;  %v2249_v59 = vpack.c.bf16 %v2227_v56, %v2226_v35  ;;  %v2033_v56 = vld [vmem:[#allocation3 + $0x24] sm:$0xff] }
 0x2bb   :  { %5147 = vmatmul.msk.bf16.gmra.mxu0 %vm25_vm1, %v2454_v20 }
 0x2bc   :  { %v1379_v51 = vpop.f32.mrf.mxu2 }
 0x2bd   :  { %v1574_v53 = vpop.f32.mrf.mxu3  ;;  %v1429_v52 = vadd.f32 %v1379_v51, %v6578_v8  ;;  %v6799_v37 = vpop.f32.mrf.mxu1 }
 0x2be   :  { %7616 = vst [vmem:[#allocation29_spill] sm:$0xff] %v6799_v37  ;;  %v2230_v37 = vld [vmem:[#allocation3 + $0x35] sm:$0xff] }
 0x2bf   :  { %v6788_v29 = vadd.f32 %v1574_v53, %v1429_v52  ;;  %v1215_v53 = vadd.f32 %v6632_v10, %v6630_v4 }
 0x2c4   :  { %v1381_v33 = vpop.f32.mrf.mxu2 }
 0x2c5   :  { %v1576_v2 = vpop.f32.mrf.mxu3  ;;  %v1430_v44 = vadd.f32 %v1381_v33, %v1210_v54  ;;  %v2034_v33 = vld [vmem:[#allocation3 + $0x2c] sm:$0xff] }
 0x2c6   :  { %v2055_v35 = vpack.c.bf16 %v2034_v33, %v2033_v56 }
 0x2c7   :  { %v6794_v45 = vadd.f32 %v1576_v2, %v1430_v44  ;;  %v2229_v2 = vld [vmem:[#allocation3 + $0x2d] sm:$0xff]  ;;  %v2228_v44 = vld [vmem:[#allocation3 + $0x25] sm:$0xff] }
 0x2c9   :  { %5065 = vmatmul.msk.bf16.vlgmr.msra.gmra.mxu2 %vm25_vm1, %v2054_v0  ;;  %v2250_v0 = vpack.c.bf16 %v2229_v2, %v2228_v44 }
 0x2ca   :  { %5101 = vmatmul.msk.bf16.vlgmr.msra.gmra.mxu3 %vm25_vm1, %v2249_v59  ;;  %v6807_v59 = vpop.f32.mrf.mxu1 }
 0x2cc   :  { %v1384_v8 = vpop.f32.mrf.mxu2 }
 0x2cd   :  { %v1579_v20 = vpop.f32.mrf.mxu3  ;;  %v1431_v34 = vadd.f32 %v1384_v8, %v6621_v57 }
 0x2cf   :  { %v6801_v51 = vadd.f32 %v1579_v20, %v1431_v34  ;;  %v2036_v34 = vld [vmem:[#allocation3 + $0x3c] sm:$0xff] }
 0x2d2   :  { %v6811_v4 = vpop.f32.mrf.mxu1 }
 0x2d3   :  { %7617 = vst [vmem:[#allocation30_spill] sm:$0xff] %v6811_v4 }
 0x2d4   :  { %v1386_v52 = vpop.f32.mrf.mxu2 }
 0x2d5   :  { %v1581_v54 = vpop.f32.mrf.mxu3  ;;  %v1432_v43 = vadd.f32 %v1386_v52, %v1215_v53  ;;  %v2231_v53 = vld [vmem:[#allocation3 + $0x3d] sm:$0xff]  ;;  %v2035_v52 = vld [vmem:[#allocation3 + $0x34] sm:$0xff] }
 0x2d7   :  { %v6805_v25 = vadd.f32 %v1581_v54, %v1432_v43  ;;  %v2056_v54 = vpack.c.bf16 %v2036_v34, %v2035_v52  ;;  %v2251_v43 = vpack.c.bf16 %v2231_v53, %v2230_v37  ;;  %v2037_v37 = vld [vmem:[#allocation3 + $0x44] sm:$0xff] }
 0x2d8   :  { %v2232_v53 = vld [vmem:[#allocation3 + $0x45] sm:$0xff] }
 0x2d9   :  { %5066 = vmatmul.msk.bf16.gmra.mxu2 %vm25_vm1, %v2055_v35 }
 0x2da   :  { %5102 = vmatmul.msk.bf16.gmra.mxu3 %vm25_vm1, %v2250_v0 }
 0x2dc   :  { %v1389_v57 = vpop.f32.mrf.mxu2 }
 0x2dd   :  { %v1584_v8 = vpop.f32.mrf.mxu3 }
 0x2de   :  { %v6815_v33 = vpop.f32.mrf.mxu1 }
 0x2df   :  { %7618 = vst [vmem:[#allocation31_spill] sm:$0xff] %v6815_v33 }
 0x2e4   :  { %v1391_v10 = vpop.f32.mrf.mxu2 }
 0x2e5   :  { %v1586_v20 = vpop.f32.mrf.mxu3  ;;  %v2038_v10 = vld [vmem:[#allocation3 + $0x4c] sm:$0xff] }
 0x2e6   :  { %v2006_v0 = vpop.f32.mrf.mxu1  ;;  %v2233_v20 = vld [vmem:[#allocation3 + $0x4d] sm:$0xff] }
 0x2e9   :  { %5067 = vmatmul.msk.bf16.gmra.mxu2 %vm25_vm1, %v2056_v54  ;;  %v2057_v54 = vpack.c.bf16 %v2038_v10, %v2037_v37  ;;  %v2234_v10 = vld [vmem:[#allocation3 + $0x55] sm:$0xff] }
 0x2ea   :  { %5103 = vmatmul.msk.bf16.gmra.mxu3 %vm25_vm1, %v2251_v43  ;;  %v2252_v43 = vpack.c.bf16 %v2233_v20, %v2232_v53  ;;  %v2235_v20 = vld [vmem:[#allocation3 + $0x5d] sm:$0xff] }
 0x2ec   :  { %v1394_v2 = vpop.f32.mrf.mxu2 }
 0x2ed   :  { %v1589_v56 = vpop.f32.mrf.mxu3  ;;  %v1435_v44 = vadd.f32 %v1394_v2, %v6656_v58  ;;  %v5905_v58 = vld [vmem:[%s7592_s3 + $0x38] sm:$0xff] }
 0x2ee   :  { %2863 = vmatpush.bf16.msra.mxu1 %v5905_v58  ;;  %v6837_v58 = vpop.f32.mrf.mxu0 }
 0x2ef   :  { %v6818_v35 = vadd.f32 %v1589_v56, %v1435_v44 }
 0x2f4   :  { %v1396_v57 = vpop.f32.mrf.mxu2 }
 0x2f5   :  { %v1591_v8 = vpop.f32.mrf.mxu3  ;;  %v1436_v34 = vadd.f32 %v1396_v57, %v6660_v11 }
 0x2f7   :  { %v6821_v52 = vadd.f32 %v1591_v8, %v1436_v34  ;;  %v2039_v8 = vld [vmem:[#allocation3 + $0x54] sm:$0xff] }
 0x2f8   :  { %v2058_v53 = vpack.c.bf16 %v6536_v16, %v2039_v8  ;;  %v6843_v8 = vpop.f32.mrf.mxu0 }
 0x2f9   :  { %5068 = vmatmul.msk.bf16.gmra.mxu2 %vm25_vm1, %v2057_v54  ;;  %v2253_v54 = vpack.c.bf16 %v2235_v20, %v2234_v10 }
 0x2fa   :  { %5104 = vmatmul.msk.bf16.gmra.mxu3 %vm25_vm1, %v2252_v43 }
 0x2fc   :  { %v1399_v2 = vpop.f32.mrf.mxu2 }
 0x2fd   :  { %v1594_v56 = vpop.f32.mrf.mxu3  ;;  %v1437_v44 = vadd.f32 %v1399_v2, %v6669_v26 }
 0x2ff   :  { %v6829_v11 = vadd.f32 %v1594_v56, %v1437_v44 }
 0x304   :  { %v1401_v0 = vpop.f32.mrf.mxu2 }
 0x305   :  { %v1596_v57 = vpop.f32.mrf.mxu3  ;;  %v1438_v34 = vadd.f32 %v1401_v0, %v6675_v42  ;;  %v2041_v42 = vld [vmem:[#allocation3 + $0x64] sm:$0xff] }
 0x306   :  { %v2236_v0 = vld [vmem:[#allocation3 + $0x65] sm:$0xff]  ;;  %v2059_v20 = vpack.c.bf16 %v6543_v27, %v2041_v42  ;;  %v5904_v27 = vld [vmem:[%s7592_s3 + $0x30] sm:$0xff] }
 0x307   :  { %v6832_v37 = vadd.f32 %v1596_v57, %v1438_v34  ;;  %v2237_v57 = vld [vmem:[#allocation3 + $0x6d] sm:$0xff]  ;;  %2864 = vmatpush.bf16.msra.mxu1 %v5904_v27 }
 0x308   :  { %v2254_v34 = vpack.c.bf16 %v2237_v57, %v2236_v0  ;;  %v2241_v27 = vld [vmem:[#allocation3 + $0x8d] sm:$0xff] }
 0x309   :  { %5069 = vmatmul.msk.bf16.gmra.mxu2 %vm25_vm1, %v2058_v53 }
 0x30a   :  { %5105 = vmatmul.msk.bf16.gmra.mxu3 %vm25_vm1, %v2253_v54 }
 0x30c   :  { %v1404_v43 = vpop.f32.mrf.mxu2 }
 0x30d   :  { %v1599_v26 = vpop.f32.mrf.mxu3  ;;  %v1439_v2 = vadd.f32 %v1404_v43, %v6690_v14 }
 0x30f   :  { %v6840_v56 = vadd.f32 %v1599_v26, %v1439_v2  ;;  %v6853_v26 = vpop.f32.mrf.mxu0 }
 0x314   :  { %v1406_v44 = vpop.f32.mrf.mxu2 }
 0x315   :  { %v1601_v33 = vpop.f32.mrf.mxu3  ;;  %v1440_v16 = vadd.f32 %v1406_v44, %v6694_v36  ;;  %v2043_v36 = vld [vmem:[#allocation3 + $0x74] sm:$0xff] }
 0x317   :  { %v6845_v10 = vadd.f32 %v1601_v33, %v1440_v16  ;;  %v2238_v33 = vld [vmem:[#allocation3 + $0x75] sm:$0xff]  ;;  %v2239_v16 = vld [vmem:[#allocation3 + $0x7d] sm:$0xff] }
 0x318   :  { %v2255_v57 = vpack.c.bf16 %v2239_v16, %v2238_v33 }
 0x319   :  { %5070 = vmatmul.msk.bf16.gmra.mxu2 %vm25_vm1, %v2059_v20  ;;  %v6864_v20 = vpop.f32.mrf.mxu0 }
 0x31a   :  { %5106 = vmatmul.msk.bf16.gmra.mxu3 %vm25_vm1, %v2254_v34 }
 0x31c   :  { %v1409_v14 = vpop.f32.mrf.mxu2 }
 0x31d   :  { %v1604_v53 = vpop.f32.mrf.mxu3  ;;  %v1441_v54 = vadd.f32 %v1409_v14, %v6703_v18  ;;  %v2060_v18 = vpack.c.bf16 %v6556_v47, %v2043_v36 }
 0x31f   :  { %v6851_v43 = vadd.f32 %v1604_v53, %v1441_v54 }
 0x324   :  { %v1411_v2 = vpop.f32.mrf.mxu2 }
 0x325   :  { %v1606_v44 = vpop.f32.mrf.mxu3  ;;  %v1442_v42 = vadd.f32 %v1411_v2, %v6709_v39  ;;  %v2045_v2 = vld [vmem:[#allocation3 + $0x84] sm:$0xff] }
 0x326   :  { %v2061_v33 = vpack.c.bf16 %v6571_v1, %v2045_v2  ;;  %v2047_v1 = vld [vmem:[#allocation3 + $0x94] sm:$0xff]  ;;  %v2243_v2 = vld [vmem:[#allocation3 + $0x9d] sm:$0xff] }
 0x327   :  { %v6859_v0 = vadd.f32 %v1606_v44, %v1442_v42  ;;  %v2240_v44 = vld [vmem:[#allocation3 + $0x85] sm:$0xff]  ;;  %v6869_v42 = vpop.f32.mrf.mxu0 }
 0x328   :  { %v2256_v16 = vpack.c.bf16 %v2241_v27, %v2240_v44  ;;  %v1813_v44 = vadd.f32 %v6563_v49, %v6748_v48  ;;  %v2062_v27 = vpack.c.bf16 %v6582_v22, %v2047_v1  ;;  %v6897_v49 = vld [vmem:[%s7594_s5 + $0x1] ss:$0 sm:$0xff]  ;;  %v2049_v1 = vld [vmem:[#allocation3 + $0xa4] sm:$0xff] }
 0x329   :  { %5071 = vmatmul.msk.bf16.gmra.mxu2 %vm25_vm1, %v2060_v18 }
 0x32a   :  { %5107 = vmatmul.msk.bf16.gmra.mxu3 %vm25_vm1, %v2255_v57 }
 0x32c   :  { %v1414_v34 = vpop.f32.mrf.mxu2 }
 0x32d   :  { %v1609_v14 = vpop.f32.mrf.mxu3  ;;  %v1443_v53 = vadd.f32 %v1414_v34, %v6718_v21 }
 0x32f   :  { %v6867_v54 = vadd.f32 %v1609_v14, %v1443_v53  ;;  %v6878_v34 = vpop.f32.mrf.mxu0  ;;  %v7619_v53 = vmov 0.0  }
 0x330   :  { %70 = vst.msk [vmem:[#allocation7 + $0x20] sm:$0xf] %vm69_vm2, %v7619_v53 }
 0x331   :  { %64 = vst.msk [vmem:[#allocation5 + $0x48] sm:$0x3f] %vm63_vm3, %v7619_v53 }
 0x334   :  { %v1416_v4 = vpop.f32.mrf.mxu2 }
 0x335   :  { %v1611_v39 = vpop.f32.mrf.mxu3  ;;  %v1444_v47 = vadd.f32 %v1416_v4, %v6723_v38 }
 0x337   :  { %v6872_v36 = vadd.f32 %v1611_v39, %v1444_v47  ;;  %v2242_v39 = vld [vmem:[#allocation3 + $0x95] sm:$0xff] }
 0x338   :  { %v2257_v47 = vpack.c.bf16 %v2243_v2, %v2242_v39 }
 0x339   :  { %5072 = vmatmul.msk.bf16.gmra.mxu2 %vm25_vm1, %v2061_v33  ;;  %v2008_v33 = vadd.f32 %v6634_v13, %v1813_v44  ;;  %v2050_v44 = vld [vmem:[#allocation3 + $0xac] sm:$0xff] }
 0x33a   :  { %5108 = vmatmul.msk.bf16.gmra.mxu3 %vm25_vm1, %v2256_v16 }
 0x33c   :  { %v1419_v21 = vpop.f32.mrf.mxu2 }
 0x33d   :  { %v1614_v18 = vpop.f32.mrf.mxu3  ;;  %v1445_v57 = vadd.f32 %v1419_v21, %v6736_v17  ;;  %v6887_v17 = vpop.f32.mrf.mxu0 }
 0x33f   :  { %v6880_v14 = vadd.f32 %v1614_v18, %v1445_v57  ;;  %v1814_v57 = vadd.f32 %v6569_v62, %v6754_v15  ;;  %v2245_v62 = vld [vmem:[#allocation3 + $0xad] sm:$0xff] }
 0x341   :  { %v2009_v13 = vadd.f32 %v6647_v30, %v1814_v57 }
 0x344   :  { %v1421_v38 = vpop.f32.mrf.mxu2 }
 0x345   :  { %v1616_v4 = vpop.f32.mrf.mxu3  ;;  %v6900_v48 = vpop.f32.mrf.mxu0 }
 0x349   :  { %5073 = vmatmul.msk.bf16.gmra.mxu2 %vm25_vm1, %v2062_v27  ;;  %v2244_v27 = vld [vmem:[#allocation3 + $0xa5] sm:$0xff] }
 0x34a   :  { %5109 = vmatmul.msk.bf16.gmra.mxu3 %vm25_vm1, %v2257_v47 }
 0x34c   :  { %v2144_v16 = vpop.f32.mrf.mxu2 }
 0x34d   :  { %v2339_v21 = vpop.f32.mrf.mxu3  ;;  %v2203_v18 = vadd.f32 %v2144_v16, %v2008_v33  ;;  %v1815_v33 = vadd.f32 %v6580_v9, %v6762_v19  ;;  %v2063_v16 = vpack.c.bf16 %v2050_v44, %v2049_v1  ;;  %v2051_v44 = vld [vmem:[#allocation3 + $0xb4] sm:$0xff] }
 0x34f   :  { %v2398_v38 = vadd.f32 %v2339_v21, %v2203_v18  ;;  %v2258_v21 = vpack.c.bf16 %v2245_v62, %v2244_v27  ;;  %v2010_v57 = vadd.f32 %v6651_v46, %v1815_v33  ;;  %v2052_v46 = vld [vmem:[#allocation3 + $0xbc] sm:$0xff] }
 0x351   :  { %v2593_v22 = vadd.f32 %v6837_v58, %v2398_v38 }
 0x353   :  { %v2617_v4 = vadd.f32 %v6897_v49, %v2593_v22 }
 0x354   :  { %v2146_v39 = vpop.f32.mrf.mxu2 }
 0x355   :  { %v2341_v2 = vpop.f32.mrf.mxu3  ;;  %v2640_v15 = vmax.f32 %v2617_v4, 0.0  ;;  %v2204_v47 = vadd.f32 %v2146_v39, %v2009_v13  ;;  %v6912_v4 = vpop.f32.mrf.mxu0  ;;  %v1816_v13 = vadd.f32 %v6597_v28, %v6768_v61  ;;  %v1817_v28 = vadd.f32 %v6606_v32, %v6776_v7 }
 0x357   :  { %2663 = vst.msk [vmem:[#allocation4] sm:$0xff] %vm25_vm1, %v2640_v15  ;;  %v2399_v58 = vadd.f32 %v2341_v2, %v2204_v47  ;;  %v2011_v2 = vadd.f32 %v6658_v60, %v1816_v13  ;;  %v2246_v15 = vld [vmem:[#allocation3 + $0xb5] sm:$0xff]  ;;  %v2247_v47 = vld [vmem:[#allocation3 + $0xbd] sm:$0xff]  ;;  %v5903_v60 = vld [vmem:[%s7592_s3 + $0x28] sm:$0xff]  ;;  %v2012_v7 = vadd.f32 %v6667_v23, %v1817_v28 }
 0x358   :  { %2865 = vmatpush.bf16.msra.mxu1 %v5903_v60  ;;  %v5902_v23 = vld [vmem:[%s7592_s3 + $0x20] sm:$0xff]  ;;  %v1819_v60 = vadd.f32 %v6623_v63, %v6788_v29 }
 0x359   :  { %v2594_v18 = vadd.f32 %v6843_v8, %v2399_v58  ;;  %5074 = vmatmul.msk.bf16.gmra.mxu2 %vm25_vm1, %v2063_v16  ;;  %v2064_v16 = vpack.c.bf16 %v2052_v46, %v2051_v44 }
 0x35a   :  { %5110 = vmatmul.msk.bf16.gmra.mxu3 %vm25_vm1, %v2258_v21  ;;  %v2443_v21 = vld [vmem:[#allocation3 + $0xc6] sm:$0xf]  ;;  %v2014_v29 = vadd.f32 %v6688_v12, %v1819_v60 }
 0x35b   :  { %v2618_v30 = vadd.f32 %v6897_v49, %v2594_v18  ;;  %v2259_v18 = vpack.c.bf16 %v2247_v47, %v2246_v15  ;;  %v2053_v47 = vld [vmem:[#allocation3 + $0xc4] sm:$0xf] }
 0x35c   :  { %v2149_v38 = vpop.f32.mrf.mxu2  ;;  %2866 = vmatpush.bf16.msra.mxu1 %v5902_v23  ;;  %v5920_v23 = vld [vmem:[%s7592_s3 + $0xb0] sm:$0xff]  ;;  %v5910_v60 = vld [vmem:[%s7592_s3 + $0x60] sm:$0xff] }
 0x35d   :  { %v2344_v22 = vpop.f32.mrf.mxu3  ;;  %v2641_v9 = vmax.f32 %v2618_v30, 0.0  ;;  %v2205_v19 = vadd.f32 %v2149_v38, %v2010_v57  ;;  %v6922_v61 = vpop.f32.mrf.mxu0  ;;  %v2455_v30 = vpack.c.bf16 %v2443_v21, %v2443_v21 }
 0x35e   :  { %v2686_v38 = vld [vmem:[#allocation4] ss:$2 sm:$0xf] }
 0x35f   :  { %2664 = vst.msk [vmem:[#allocation4 + $0x8] sm:$0xff] %vm25_vm1, %v2641_v9  ;;  %v2400_v8 = vadd.f32 %v2344_v22, %v2205_v19  ;;  %5148 = vmatmul.msk.bf16.gmra.mxu0 %vm25_vm1, %v2455_v30  ;;  %v2688_v22 = vld [vmem:[#allocation4 + $0x1] ss:$2 sm:$0xf] }
 0x361   :  { %v2595_v1 = vadd.f32 %v6853_v26, %v2400_v8 }
 0x363   :  { %v2619_v39 = vadd.f32 %v6897_v49, %v2595_v1 }
 0x364   :  { %v2151_v27 = vpop.f32.mrf.mxu2 }
 0x365   :  { %v2346_v62 = vpop.f32.mrf.mxu3  ;;  %v2642_v33 = vmax.f32 %v2619_v39, 0.0  ;;  %v2206_v58 = vadd.f32 %v2151_v27, %v2011_v2  ;;  %v2693_v2 = vmax.f32 %v2686_v38, %v2688_v22  ;;  %v2559_v27 = vpop.f32.mrf.mxu0 }
 0x367   :  { %2665 = vst.msk [vmem:[#allocation4 + $0x10] sm:$0xff] %vm25_vm1, %v2642_v33  ;;  %v2401_v26 = vadd.f32 %v2346_v62, %v2206_v58  ;;  %v2248_v33 = vld [vmem:[#allocation3 + $0xc5] sm:$0xf] }
 0x369   :  { %v2596_v57 = vadd.f32 %v6864_v20, %v2401_v26  ;;  %5075 = vmatmul.msk.bf16.gmra.mxu2 %vm25_vm1, %v2064_v16  ;;  %v1818_v20 = vadd.f32 %v6619_v50, %v6780_v40  ;;  %v2065_v26 = vpack.c.bf16 %v2053_v47, %v2053_v47 }
 0x36a   :  { %5111 = vmatmul.msk.bf16.gmra.mxu3 %vm25_vm1, %v2259_v18  ;;  %v2260_v18 = vpack.c.bf16 %v2248_v33, %v2248_v33 }
 0x36b   :  { %v2620_v32 = vadd.f32 %v6897_v49, %v2596_v57  ;;  %v2013_v40 = vadd.f32 %v6673_v41, %v1818_v20  ;;  %v5913_v41 = vld [vmem:[%s7592_s3 + $0x78] sm:$0xff] }
 0x36c   :  { %v2154_v9 = vpop.f32.mrf.mxu2  ;;  %v5917_v57 = vld [vmem:[%s7592_s3 + $0x98] sm:$0xff]  ;;  %3108 = vmatpush.bf16.msrb.mxu2 %v5913_v41 }
 0x36d   :  { %v2349_v19 = vpop.f32.mrf.mxu3  ;;  %v2643_v13 = vmax.f32 %v2620_v32, 0.0  ;;  %v2207_v8 = vadd.f32 %v2154_v9, %v2012_v7  ;;  %v2561_v32 = vpop.f32.mrf.mxu0  ;;  %3202 = vmatpush.bf16.msrb.mxu3 %v5917_v57 }
 0x36e   :  { %v2690_v1 = vld [vmem:[#allocation4 + $0xa] ss:$2 sm:$0xf]  ;;  %v2692_v39 = vld [vmem:[#allocation4 + $0xb] ss:$2 sm:$0xf] }
 0x36f   :  { %v2694_v44 = vmax.f32 %v2690_v1, %v2692_v39  ;;  %2666 = vst.msk [vmem:[#allocation4 + $0x18] sm:$0xff] %vm25_vm1, %v2643_v13  ;;  %v2402_v46 = vadd.f32 %v2349_v19, %v2207_v8  ;;  %v1820_v39 = vadd.f32 %v6628_v3, %v6794_v45  ;;  %v5911_v45 = vld [vmem:[%s7592_s3 + $0x68] sm:$0xff] }
 0x371   :  { %v2695_v62 = vmax.f32 %v2693_v2, %v2694_v44  ;;  %v2597_v15 = vadd.f32 %v6869_v42, %v2402_v46  ;;  %v5912_v44 = vld [vmem:[%s7592_s3 + $0x70] sm:$0xff] }
 0x372   :  { %v5916_v46 = vld [vmem:[%s7592_s3 + $0x90] sm:$0xff]  ;;  %3109 = vmatpush.bf16.msrb.mxu2 %v5912_v44 }
 0x373   :  { %2696 = vst.msk [vmem:[#allocation5 + $0x7] sm:$0xf] %vm69_vm2, %v2695_v62  ;;  %v2621_v50 = vadd.f32 %v6897_v49, %v2597_v15  ;;  %3203 = vmatpush.bf16.msrb.mxu3 %v5916_v46  ;;  %v5915_v62 = vld [vmem:[%s7592_s3 + $0x88] sm:$0xff] }
 0x374   :  { %v2156_v58 = vpop.f32.mrf.mxu2  ;;  %v5919_v15 = vld [vmem:[%s7592_s3 + $0xa8] sm:$0xff] }
 0x375   :  { %v2351_v16 = vpop.f32.mrf.mxu3  ;;  %v2644_v21 = vmax.f32 %v2621_v50, 0.0  ;;  %v2208_v28 = vadd.f32 %v2156_v58, %v2013_v40  ;;  %v6986_v58 = vpop.f32.mrf.mxu0 }
 0x376   :  { %v2698_v7 = vld [vmem:[#allocation4 + $0x14] ss:$2 sm:$0xf]  ;;  %v2700_v38 = vld [vmem:[#allocation4 + $0x15] ss:$2 sm:$0xf]  ;;  %3110 = vmatpush.bf16.msrb.mxu2 %v5911_v45 }
 0x377   :  { %2667 = vst.msk [vmem:[#allocation4 + $0x20] sm:$0xff] %vm25_vm1, %v2644_v21  ;;  %v2403_v42 = vadd.f32 %v2351_v16, %v2208_v28  ;;  %v2705_v20 = vmax.f32 %v2698_v7, %v2700_v38  ;;  %3204 = vmatpush.bf16.msrb.mxu3 %v5915_v62  ;;  %v7621_v28 = vld [vmem:[#allocation11_spill] sm:$0xff] }
 0x379   :  { %v2598_v30 = vadd.f32 %v6878_v34, %v2403_v42  ;;  %5076 = vmatmul.msk.bf16.gmra.mxu2 %vm25_vm1, %v2065_v26  ;;  %v5921_v34 = vld [vmem:[%s7592_s3 + $0xb8] sm:$0xff]  ;;  %v1821_v26 = vadd.f32 %v7621_v28, %v6801_v51  ;;  %v5914_v42 = vld [vmem:[%s7592_s3 + $0x80] sm:$0xff] }
 0x37a   :  { %5112 = vmatmul.msk.bf16.gmra.mxu3 %vm25_vm1, %v2260_v18  ;;  %3296 = vmatpush.bf16.msrb.mxu0 %v5921_v34  ;;  %v2802_v51 = vld [vmem:[#allocation5 + $0x1] sm:$0xff] }
 0x37b   :  { %v2622_v63 = vadd.f32 %v6897_v49, %v2598_v30  ;;  %v5918_v30 = vld [vmem:[%s7592_s3 + $0xa0] sm:$0xff]  ;;  %3111 = vmatpush.bf16.msrb.mxu2 %v5910_v60  ;;  %3205 = vmatpush.bf16.msrb.mxu3 %v5914_v42 }
 0x37c   :  { %v2159_v22 = vpop.f32.mrf.mxu2 }
 0x37d   :  { %v2354_v9 = vpop.f32.mrf.mxu3  ;;  %v2645_v19 = vmax.f32 %v2622_v63, 0.0  ;;  %v2209_v13 = vadd.f32 %v2159_v22, %v2014_v29  ;;  %v7622_v63 = vld [vmem:[#allocation19_spill] sm:$0xff] }
 0x37e   :  { %v2702_v8 = vld [vmem:[#allocation4 + $0x1e] ss:$2 sm:$0xf]  ;;  %v2704_v1 = vld [vmem:[#allocation4 + $0x1f] ss:$2 sm:$0xf]  ;;  %3297 = vmatpush.bf16.msrb.mxu0 %v5920_v23  ;;  %v2016_v29 = vadd.f32 %v7622_v63, %v1821_v26 }
 0x37f   :  { %v2706_v12 = vmax.f32 %v2702_v8, %v2704_v1  ;;  %2668 = vst.msk [vmem:[#allocation4 + $0x28] sm:$0xff] %vm25_vm1, %v2645_v19  ;;  %v2404_v2 = vadd.f32 %v2354_v9, %v2209_v13  ;;  %v7623_v19 = vld [vmem:[#allocation12_spill] sm:$0xff] }
 0x380   :  { %v1822_v13 = vadd.f32 %v7623_v19, %v6805_v25 }
 0x381   :  { %v2707_v27 = vmax.f32 %v2705_v20, %v2706_v12  ;;  %v2599_v3 = vadd.f32 %v6887_v17, %v2404_v2  ;;  %v7620_v17 = vld [vmem:[#allocation17_spill] sm:$0xff]  ;;  %v7624_v20 = vld [vmem:[#allocation22_spill] sm:$0xff] }
 0x382   :  { %v2015_v33 = vadd.f32 %v7620_v17, %v1820_v39  ;;  %3298 = vmatpush.bf16.msrb.mxu0 %v5919_v15  ;;  %v2017_v12 = vadd.f32 %v7624_v20, %v1822_v13 }
 0x383   :  { %2708 = vst.msk [vmem:[#allocation5 + $0xd] sm:$0xf] %vm69_vm2, %v2707_v27  ;;  %v2623_v47 = vadd.f32 %v6897_v49, %v2599_v3 }
 0x384   :  { %v2161_v50 = vpop.f32.mrf.mxu2 }
 0x385   :  { %v2356_v40 = vpop.f32.mrf.mxu3  ;;  %v2646_v16 = vmax.f32 %v2623_v47, 0.0  ;;  %v2210_v21 = vadd.f32 %v2161_v50, %v2015_v33 }
 0x386   :  { %3299 = vmatpush.bf16.msrb.mxu0 %v5918_v30  ;;  %v2710_v2 = vld [vmem:[#allocation4 + $0x28] ss:$2 sm:$0xf]  ;;  %v2712_v44 = vld [vmem:[#allocation4 + $0x29] ss:$2 sm:$0xf] }
 0x387   :  { %2669 = vst.msk [vmem:[#allocation4 + $0x30] sm:$0xff] %vm25_vm1, %v2646_v16  ;;  %v2405_v18 = vadd.f32 %v2356_v40, %v2210_v21  ;;  %v2717_v25 = vmax.f32 %v2710_v2, %v2712_v44 }
 0x389   :  { %v2600_v41 = vadd.f32 %v6900_v48, %v2405_v18  ;;  %v7006_v48 = vpop.f32.mrf.mxu0 }
 0x38a   :  { %v2803_v57 = vld [vmem:[#allocation5 + $0x9] sm:$0xff] }
 0x38b   :  { %v2624_v32 = vadd.f32 %v6897_v49, %v2600_v41  ;;  %v2810_v34 = vpack.c.bf16 %v2803_v57, %v2802_v51  ;;  %v3047_v28 = vld [vmem:[#allocation5 + $0x6] sm:$0xff] }
 0x38c   :  { %v2164_v7 = vpop.f32.mrf.mxu2  ;;  %v3141_v26 = vld [vmem:[#allocation5 + $0x7] sm:$0xff] }
 0x38d   :  { %v2359_v38 = vpop.f32.mrf.mxu3  ;;  %v2647_v22 = vmax.f32 %v2624_v32, 0.0  ;;  %v2211_v9 = vadd.f32 %v2164_v7, %v2016_v29  ;;  %5173 = vmatmul.msk.bf16.vlgmr.msra.gmra.mxu1 %vm25_vm1, %v2810_v34  ;;  %v7019_v18 = vld [vmem:[#allocation5 + $0x8] sm:$0xff] }
 0x38f   :  { %2670 = vst.msk [vmem:[#allocation4 + $0x38] sm:$0xff] %vm25_vm1, %v2647_v22  ;;  %v2406_v8 = vadd.f32 %v2359_v38, %v2211_v9  ;;  %v7625_v22 = vld [vmem:[#allocation13_spill] sm:$0xff] }
 0x390   :  { %v1825_v9 = vadd.f32 %v7625_v22, %v6818_v35 }
 0x391   :  { %v2601_v1 = vadd.f32 %v6912_v4, %v2406_v8  ;;  %v7013_v17 = vpop.f32.mrf.mxu0 }
 0x393   :  { %v2625_v39 = vadd.f32 %v6897_v49, %v2601_v1  ;;  %v7626_v1 = vld [vmem:[#allocation26_spill] sm:$0xff] }
 0x394   :  { %v2166_v46 = vpop.f32.mrf.mxu2 }
 0x395   :  { %v2361_v23 = vpop.f32.mrf.mxu3  ;;  %v2648_v27 = vmax.f32 %v2625_v39, 0.0  ;;  %v2212_v3 = vadd.f32 %v2166_v46, %v2017_v12  ;;  %v2020_v39 = vadd.f32 %v7626_v1, %v1825_v9  ;;  %v7627_v46 = vld [vmem:[#allocation14_spill] sm:$0xff]  ;;  %v7630_v1 = vld [vmem:[#allocation16_spill] sm:$0xff] }
 0x396   :  { %v2714_v45 = vld [vmem:[#allocation4 + $0x32] ss:$2 sm:$0xf]  ;;  %v2716_v62 = vld [vmem:[#allocation4 + $0x33] ss:$2 sm:$0xf] }
 0x397   :  { %v2718_v15 = vmax.f32 %v2714_v45, %v2716_v62  ;;  %2671 = vst.msk [vmem:[#allocation4 + $0x40] sm:$0xff] %vm25_vm1, %v2648_v27  ;;  %v2407_v47 = vadd.f32 %v2361_v23, %v2212_v3  ;;  %v1826_v23 = vadd.f32 %v7627_v46, %v6821_v52  ;;  %v7041_v3 = vld [vmem:[#allocation5 + $0x1e] sm:$0xff] }
 0x398   :  { %v3144_v45 = vld [vmem:[#allocation5 + $0x1f] sm:$0xff] }
 0x399   :  { %v2719_v4 = vmax.f32 %v2717_v25, %v2718_v15  ;;  %v2602_v33 = vadd.f32 %v6922_v61, %v2407_v47  ;;  %v7025_v41 = vpop.f32.mrf.mxu0  ;;  %v7044_v25 = vld [vmem:[#allocation5 + $0x20] sm:$0xff]  ;;  %v2021_v15 = vadd.f32 %v6750_v24, %v1826_v23 }
 0x39b   :  { %2720 = vst.msk [vmem:[#allocation5 + $0x13] sm:$0xf] %vm69_vm2, %v2719_v4  ;;  %v2626_v50 = vadd.f32 %v6897_v49, %v2602_v33 }
 0x39c   :  { %v2169_v40 = vpop.f32.mrf.mxu2 }
 0x39d   :  { %v2364_v16 = vpop.f32.mrf.mxu3  ;;  %v2649_v21 = vmax.f32 %v2626_v50, 0.0 }
 0x39e   :  { %v2722_v32 = vld [vmem:[#allocation4 + $0x3c] ss:$2 sm:$0xf]  ;;  %v2724_v63 = vld [vmem:[#allocation4 + $0x3d] ss:$2 sm:$0xf] }
 0x39f   :  { %2672 = vst.msk [vmem:[#allocation4 + $0x48] sm:$0xff] %vm25_vm1, %v2649_v21  ;;  %v2729_v19 = vmax.f32 %v2722_v32, %v2724_v63 }
 0x3a1   :  { %v7037_v2 = vpop.f32.mrf.mxu0 }
 0x3a2   :  { %v7021_v60 = vld [vmem:[#allocation5 + $0xe] sm:$0xff] }
 0x3a3   :  { %v3142_v42 = vld [vmem:[#allocation5 + $0xf] sm:$0xff]  ;;  %v3055_v61 = vpack.c.bf16 %v7021_v60, %v3047_v28 }
 0x3a4   :  { %v7023_v30 = vld [vmem:[#allocation5 + $0x10] sm:$0xff]  ;;  %v3149_v51 = vpack.c.bf16 %v3142_v42, %v3141_v26  ;;  %v2171_v29 = vpop.f32.mrf.mxu2 }
 0x3a5   :  { %v3243_v57 = vpack.c.bf16 %v7023_v30, %v7019_v18  ;;  %v2366_v34 = vpop.f32.mrf.mxu3  ;;  %5249 = vmatmul.msk.bf16.vlgmr.msrb.gmra.mxu2 %vm25_vm1, %v3055_v61  ;;  %v2804_v62 = vld [vmem:[#allocation5 + $0x11] sm:$0xff] }
 0x3a6   :  { %5277 = vmatmul.msk.bf16.vlgmr.msrb.gmra.mxu3 %vm25_vm1, %v3149_v51  ;;  %v2726_v7 = vld [vmem:[#allocation4 + $0x46] ss:$2 sm:$0xf]  ;;  %v2728_v38 = vld [vmem:[#allocation4 + $0x47] ss:$2 sm:$0xf] }
 0x3a7   :  { %5305 = vmatmul.msk.bf16.vlgmr.msrb.gmra.mxu0 %vm25_vm1, %v3243_v57  ;;  %v2730_v13 = vmax.f32 %v2726_v7, %v2728_v38  ;;  %v7628_v57 = vld [vmem:[#allocation15_spill] sm:$0xff]  ;;  %v7629_v38 = vld [vmem:[#allocation28_spill] sm:$0xff] }
 0x3a8   :  { %v1827_v32 = vadd.f32 %v7628_v57, %v6829_v11 }
 0x3a9   :  { %v2731_v8 = vmax.f32 %v2729_v19, %v2730_v13  ;;  %v2576_v63 = vpop.f32.mrf.mxu0 }
 0x3aa   :  { %v2022_v22 = vadd.f32 %v7629_v38, %v1827_v32 }
 0x3ab   :  { %2732 = vst.msk [vmem:[#allocation5 + $0x19] sm:$0xf] %vm69_vm2, %v2731_v8 }
 0x3ac   :  { %v2174_v20 = vpop.f32.mrf.mxu2 }
 0x3ad   :  { %v2369_v12 = vpop.f32.mrf.mxu3  ;;  %v2215_v44 = vadd.f32 %v2174_v20, %v2020_v39  ;;  %v1828_v39 = vadd.f32 %v7630_v1, %v6832_v37 }
 0x3af   :  { %v2410_v27 = vadd.f32 %v2369_v12, %v2215_v44  ;;  %v2023_v44 = vadd.f32 %v6766_v31, %v1828_v39  ;;  %v5901_v31 = vld [vmem:[%s7592_s3 + $0x18] sm:$0xff] }
 0x3b0   :  { %2928 = vmatpush.bf16.msrb.mxu1 %v5901_v31  ;;  %v2806_v39 = vld [vmem:[#allocation5 + $0x21] sm:$0xff]  ;;  %v7635_v31 = vld [vmem:[#allocation29_spill] sm:$0xff] }
 0x3b1   :  { %v2605_v35 = vadd.f32 %v6986_v58, %v2410_v27  ;;  %v7073_v20 = vpop.f32.mrf.mxu0 }
 0x3b2   :  { %v2805_v47 = vld [vmem:[#allocation5 + $0x19] sm:$0xff] }
 0x3b3   :  { %v7047_v4 = vld [vmem:[#allocation5 + $0x16] sm:$0xff]  ;;  %v2629_v50 = vadd.f32 %v6897_v49, %v2605_v35  ;;  %v2811_v40 = vpack.c.bf16 %v2805_v47, %v2804_v62 }
 0x3b4   :  { %v3143_v33 = vld [vmem:[#allocation5 + $0x17] sm:$0xff]  ;;  %v3056_v52 = vpack.c.bf16 %v7041_v3, %v7047_v4  ;;  %v2176_v28 = vpop.f32.mrf.mxu2  ;;  %v3525_v42 = vpack.c.bf16 %v7047_v4, %v7021_v60  ;;  %v5924_v4 = vld [vmem:[%s7592_s3 + $0xd0] sm:$0xff] }
 0x3b5   :  { %v3150_v16 = vpack.c.bf16 %v3144_v45, %v3143_v33  ;;  %v7052_v21 = vld [vmem:[#allocation5 + $0x18] sm:$0xff]  ;;  %v2371_v58 = vpop.f32.mrf.mxu3  ;;  %v2652_v61 = vmax.f32 %v2629_v50, 0.0  ;;  %v2216_v51 = vadd.f32 %v2176_v28, %v2021_v15  ;;  %5174 = vmatmul.msk.bf16.gmra.mxu1 %vm25_vm1, %v2811_v40 }
 0x3b6   :  { %v3244_v26 = vpack.c.bf16 %v7044_v25, %v7052_v21  ;;  %v2791_v24 = vpack.c.bf16 %v7052_v21, %v7023_v30  ;;  %5250 = vmatmul.msk.bf16.gmra.mxu2 %vm25_vm1, %v3056_v52  ;;  %v7631_v35 = vld [vmem:[#allocation18_spill] sm:$0xff]  ;;  %v5925_v21 = vld [vmem:[%s7592_s3 + $0xd8] sm:$0xff] }
 0x3b7   :  { %5278 = vmatmul.msk.bf16.gmra.mxu3 %vm25_vm1, %v3150_v16  ;;  %2675 = vst.msk [vmem:[#allocation4 + $0x60] sm:$0xff] %vm25_vm1, %v2652_v61  ;;  %v2411_v29 = vadd.f32 %v2371_v58, %v2216_v51  ;;  %v1829_v62 = vadd.f32 %v7631_v35, %v6840_v56 }
 0x3b8   :  { %5306 = vmatmul.msk.bf16.gmra.mxu0 %vm25_vm1, %v3244_v26 }
 0x3b9   :  { %v2606_v34 = vadd.f32 %v7006_v48, %v2411_v29  ;;  %v7082_v47 = vpop.f32.mrf.mxu0  ;;  %v2024_v33 = vadd.f32 %v6774_v6, %v1829_v62 }
 0x3bb   :  { %v2630_v7 = vadd.f32 %v6897_v49, %v2606_v34 }
 0x3bc   :  { %v2179_v9 = vpop.f32.mrf.mxu2 }
 0x3bd   :  { %v2374_v19 = vpop.f32.mrf.mxu3  ;;  %v2653_v13 = vmax.f32 %v2630_v7, 0.0  ;;  %v2217_v8 = vadd.f32 %v2179_v9, %v2022_v22 }
 0x3bf   :  { %2676 = vst.msk [vmem:[#allocation4 + $0x68] sm:$0xff] %vm25_vm1, %v2653_v13  ;;  %v2412_v11 = vadd.f32 %v2374_v19, %v2217_v8 }
 0x3c1   :  { %v2607_v12 = vadd.f32 %v7013_v17, %v2412_v11  ;;  %v2584_v9 = vpop.f32.mrf.mxu0 }
 0x3c3   :  { %v2631_v48 = vadd.f32 %v6897_v49, %v2607_v12 }
 0x3c4   :  { %v2181_v46 = vpop.f32.mrf.mxu2 }
 0x3c5   :  { %v2376_v23 = vpop.f32.mrf.mxu3  ;;  %v2654_v27 = vmax.f32 %v2631_v48, 0.0  ;;  %v2218_v45 = vadd.f32 %v2181_v46, %v2023_v44  ;;  %v5900_v46 = vld [vmem:[%s7592_s3 + $0x10] sm:$0xff] }
 0x3c6   :  { %v2734_v50 = vld [vmem:[#allocation4 + $0x64] ss:$2 sm:$0xf]  ;;  %v2736_v40 = vld [vmem:[#allocation4 + $0x65] ss:$2 sm:$0xf]  ;;  %2929 = vmatpush.bf16.msrb.mxu1 %v5900_v46 }
 0x3c7   :  { %2677 = vst.msk [vmem:[#allocation4 + $0x70] sm:$0xff] %vm25_vm1, %v2654_v27  ;;  %v2413_v37 = vadd.f32 %v2376_v23, %v2218_v45  ;;  %v2741_v51 = vmax.f32 %v2734_v50, %v2736_v40 }
 0x3c9   :  { %v2608_v15 = vadd.f32 %v7025_v41, %v2413_v37  ;;  %v7632_v41 = vld [vmem:[#allocation20_spill] sm:$0xff]  ;;  %v7111_v37 = vpop.f32.mrf.mxu0 }
 0x3ca   :  { %v1830_v61 = vadd.f32 %v7632_v41, %v6845_v10  ;;  %v7633_v10 = vld [vmem:[#allocation21_spill] sm:$0xff]  ;;  %v7636_v41 = vld [vmem:[#allocation24_spill] sm:$0xff] }
 0x3cb   :  { %v2632_v17 = vadd.f32 %v6897_v49, %v2608_v15  ;;  %v1831_v8 = vadd.f32 %v7633_v10, %v6851_v43  ;;  %v5899_v15 = vld [vmem:[%s7592_s3 + $0x8] sm:$0xff] }
 0x3cc   :  { %v2184_v52 = vpop.f32.mrf.mxu2  ;;  %v2025_v7 = vadd.f32 %v6782_v5, %v1830_v61  ;;  %2930 = vmatpush.bf16.msrb.mxu1 %v5899_v15  ;;  %v1833_v61 = vadd.f32 %v7636_v41, %v6867_v54  ;;  %v7637_v54 = vld [vmem:[#allocation25_spill] sm:$0xff] }
 0x3cd   :  { %v2379_v16 = vpop.f32.mrf.mxu3  ;;  %v2655_v56 = vmax.f32 %v2632_v17, 0.0  ;;  %v2219_v28 = vadd.f32 %v2184_v52, %v2024_v33  ;;  %v2026_v5 = vadd.f32 %v6792_v55, %v1831_v8  ;;  %v1834_v10 = vadd.f32 %v7637_v54, %v6872_v36  ;;  %v5898_v36 = vld [vmem:[%s7592_s3] sm:$0xff] }
 0x3ce   :  { %v2738_v58 = vld [vmem:[#allocation4 + $0x6e] ss:$2 sm:$0xf]  ;;  %v2740_v26 = vld [vmem:[#allocation4 + $0x6f] ss:$2 sm:$0xf] }
 0x3cf   :  { %v2742_v57 = vmax.f32 %v2738_v58, %v2740_v26  ;;  %2678 = vst.msk [vmem:[#allocation4 + $0x78] sm:$0xff] %vm25_vm1, %v2655_v56  ;;  %v2414_v6 = vadd.f32 %v2379_v16, %v2219_v28 }
 0x3d0   :  { %2931 = vmatpush.bf16.msrb.mxu1 %v5898_v36 }
 0x3d1   :  { %v2743_v32 = vmax.f32 %v2741_v51, %v2742_v57  ;;  %v2609_v29 = vadd.f32 %v7037_v2, %v2414_v6 }
 0x3d3   :  { %2744 = vst.msk [vmem:[#allocation5 + $0x2b] sm:$0xf] %vm69_vm2, %v2743_v32  ;;  %v2633_v34 = vadd.f32 %v6897_v49, %v2609_v29 }
 0x3d4   :  { %v2186_v38 = vpop.f32.mrf.mxu2 }
 0x3d5   :  { %v2381_v22 = vpop.f32.mrf.mxu3  ;;  %v2656_v19 = vmax.f32 %v2633_v34, 0.0  ;;  %v2220_v13 = vadd.f32 %v2186_v38, %v2025_v7  ;;  %v2028_v7 = vadd.f32 %v6807_v59, %v1833_v61 }
 0x3d6   :  { %v2746_v40 = vld [vmem:[#allocation4 + $0x78] ss:$2 sm:$0xf]  ;;  %v2748_v52 = vld [vmem:[#allocation4 + $0x79] ss:$2 sm:$0xf] }
 0x3d7   :  { %2679 = vst.msk [vmem:[#allocation4 + $0x80] sm:$0xff] %vm25_vm1, %v2656_v19  ;;  %v2415_v1 = vadd.f32 %v2381_v22, %v2220_v13  ;;  %v2753_v51 = vmax.f32 %v2746_v40, %v2748_v52 }
 0x3d9   :  { %v2610_v11 = vadd.f32 %v2576_v63, %v2415_v1  ;;  %v7634_v63 = vld [vmem:[#allocation23_spill] sm:$0xff] }
 0x3da   :  { %v2807_v2 = vld [vmem:[#allocation5 + $0x29] sm:$0xff]  ;;  %v1832_v62 = vadd.f32 %v7634_v63, %v6859_v0 }
 0x3db   :  { %v7099_v12 = vld [vmem:[#allocation5 + $0x26] sm:$0xff]  ;;  %v2634_v48 = vadd.f32 %v6897_v49, %v2610_v11  ;;  %v2812_v44 = vpack.c.bf16 %v2807_v2, %v2806_v39 }
 0x3dc   :  { %v3526_v43 = vpack.c.bf16 %v7099_v12, %v7041_v3  ;;  %v2189_v23 = vpop.f32.mrf.mxu2  ;;  %v2027_v50 = vadd.f32 %v7635_v31, %v1832_v62  ;;  %v2589_v6 = vpop.f32.mrf.mxu0  ;;  %v5909_v62 = vld [vmem:[%s7592_s3 + $0x58] sm:$0xff] }
 0x3dd   :  { %v2384_v27 = vpop.f32.mrf.mxu3  ;;  %v2657_v45 = vmax.f32 %v2634_v48, 0.0  ;;  %v2221_v35 = vadd.f32 %v2189_v23, %v2026_v5  ;;  %5175 = vmatmul.msk.bf16.gmra.mxu1 %vm25_vm1, %v2812_v44  ;;  %v7638_v5 = vld [vmem:[#allocation30_spill] sm:$0xff]  ;;  %v2954_v3 = vld [vmem:[#allocation5 + $0xa] sm:$0xff] }
 0x3de   :  { %v2029_v59 = vadd.f32 %v7638_v5, %v1834_v10  ;;  %3014 = vmatpush.bf16.msra.mxu1 %v5909_v62 }
 0x3df   :  { %2680 = vst.msk [vmem:[#allocation4 + $0x88] sm:$0xff] %vm25_vm1, %v2657_v45  ;;  %v2416_v55 = vadd.f32 %v2384_v27, %v2221_v35 }
 0x3e1   :  { %v2611_v17 = vadd.f32 %v7073_v20, %v2416_v55  ;;  %v7639_v55 = vld [vmem:[#allocation27_spill] sm:$0xff] }
 0x3e2   :  { %v1835_v15 = vadd.f32 %v7639_v55, %v6880_v14  ;;  %v7640_v14 = vld [vmem:[#allocation31_spill] sm:$0xff] }
 0x3e3   :  { %v2635_v33 = vadd.f32 %v6897_v49, %v2611_v17 }
 0x3e4   :  { %v2191_v16 = vpop.f32.mrf.mxu2  ;;  %v2591_v1 = vpop.f32.mrf.mxu0 }
 0x3e5   :  { %v2386_v0 = vpop.f32.mrf.mxu3  ;;  %v2658_v56 = vmax.f32 %v2635_v33, 0.0  ;;  %v2222_v28 = vadd.f32 %v2191_v16, %v2027_v50  ;;  %v5931_v1 = vld [vmem:[%s7592_s3 + $0x108] sm:$0xff] }
 0x3e6   :  { %v2750_v58 = vld [vmem:[#allocation4 + $0x82] ss:$2 sm:$0xf]  ;;  %v2752_v26 = vld [vmem:[#allocation4 + $0x83] ss:$2 sm:$0xf] }
 0x3e7   :  { %v2754_v57 = vmax.f32 %v2750_v58, %v2752_v26  ;;  %2681 = vst.msk [vmem:[#allocation4 + $0x90] sm:$0xff] %vm25_vm1, %v2658_v56  ;;  %v2417_v20 = vadd.f32 %v2386_v0, %v2222_v28  ;;  %v2030_v56 = vadd.f32 %v7640_v14, %v1835_v15 }
 0x3e9   :  { %v2755_v32 = vmax.f32 %v2753_v51, %v2754_v57  ;;  %v2612_v29 = vadd.f32 %v7082_v47, %v2417_v20  ;;  %v3145_v47 = vld [vmem:[#allocation5 + $0x27] sm:$0xff] }
 0x3ea   :  { %v5929_v51 = vld [vmem:[%s7592_s3 + $0xf8] sm:$0xff] }
 0x3eb   :  { %2756 = vst.msk [vmem:[#allocation5 + $0x31] sm:$0xf] %vm69_vm2, %v2755_v32  ;;  %v2636_v34 = vadd.f32 %v6897_v49, %v2612_v29  ;;  %v7159_v20 = vld [vmem:[#allocation5 + $0x28] sm:$0xff]  ;;  %3484 = vmatpush.bf16.msra.mxu2 %v5929_v51 }
 0x3ec   :  { %v2194_v38 = vpop.f32.mrf.mxu2  ;;  %v2792_v30 = vpack.c.bf16 %v7159_v20, %v7044_v25  ;;  %v3430_v51 = vld [vmem:[#allocation5 + $0x45] sm:$0xf] }
 0x3ed   :  { %v2389_v22 = vpop.f32.mrf.mxu3  ;;  %v2659_v19 = vmax.f32 %v2636_v34, 0.0  ;;  %v2223_v13 = vadd.f32 %v2194_v38, %v2028_v7 }
 0x3ee   :  { %v2758_v23 = vld [vmem:[#allocation4 + $0x8c] ss:$2 sm:$0xf]  ;;  %v2760_v27 = vld [vmem:[#allocation4 + $0x8d] ss:$2 sm:$0xf] }
 0x3ef   :  { %2682 = vst.msk [vmem:[#allocation4 + $0x98] sm:$0xff] %vm25_vm1, %v2659_v19  ;;  %v2418_v8 = vadd.f32 %v2389_v22, %v2223_v13  ;;  %v2765_v31 = vmax.f32 %v2758_v23, %v2760_v27  ;;  %v5928_v19 = vld [vmem:[%s7592_s3 + $0xf0] sm:$0xff] }
 0x3f0   :  { %3485 = vmatpush.bf16.msra.mxu2 %v5928_v19  ;;  %v2782_v23 = vld [vmem:[#allocation5] sm:$0xff] }
 0x3f1   :  { %v2613_v39 = vadd.f32 %v2584_v9, %v2418_v8  ;;  %v5927_v8 = vld [vmem:[%s7592_s3 + $0xe8] sm:$0xff]  ;;  %v2790_v27 = vpack.c.bf16 %v7019_v18, %v2782_v23  ;;  %v5906_v18 = vld [vmem:[%s7592_s3 + $0x40] sm:$0xff] }
 0x3f2   :  { %v7130_v11 = vld [vmem:[#allocation5 + $0x2e] sm:$0xff]  ;;  %v3331_v23 = vld [vmem:[#allocation5 + $0x1c] sm:$0xff] }
 0x3f3   :  { %v3146_v2 = vld [vmem:[#allocation5 + $0x2f] sm:$0xff]  ;;  %v2637_v48 = vadd.f32 %v6897_v49, %v2613_v39  ;;  %v3057_v44 = vpack.c.bf16 %v7130_v11, %v7099_v12  ;;  %v2953_v12 = vld [vmem:[#allocation5 + $0x2] sm:$0xff] }
 0x3f4   :  { %v3151_v46 = vpack.c.bf16 %v3146_v2, %v3145_v47  ;;  %v2196_v45 = vpop.f32.mrf.mxu2  ;;  %3486 = vmatpush.bf16.msra.mxu2 %v5927_v8  ;;  %v5926_v39 = vld [vmem:[%s7592_s3 + $0xe0] sm:$0xff] }
 0x3f5   :  { %v2391_v9 = vpop.f32.mrf.mxu3  ;;  %v2660_v35 = vmax.f32 %v2637_v48, 0.0  ;;  %v2224_v63 = vadd.f32 %v2196_v45, %v2029_v59  ;;  %5251 = vmatmul.msk.bf16.gmra.mxu2 %vm25_vm1, %v3057_v44  ;;  %v5930_v47 = vld [vmem:[%s7592_s3 + $0x100] sm:$0xff]  ;;  %v5907_v45 = vld [vmem:[%s7592_s3 + $0x48] sm:$0xff] }
 0x3f6   :  { %5279 = vmatmul.msk.bf16.gmra.mxu3 %vm25_vm1, %v3151_v46  ;;  %v2762_v17 = vld [vmem:[#allocation4 + $0x96] ss:$2 sm:$0xf]  ;;  %v2764_v33 = vld [vmem:[#allocation4 + $0x97] ss:$2 sm:$0xf] }
 0x3f7   :  { %v2766_v50 = vmax.f32 %v2762_v17, %v2764_v33  ;;  %2683 = vst.msk [vmem:[#allocation4 + $0xa0] sm:$0xff] %vm25_vm1, %v2660_v35  ;;  %v2419_v40 = vadd.f32 %v2391_v9, %v2224_v63  ;;  %v3427_v14 = vld [vmem:[#allocation5 + $0x2d] sm:$0xff] }
 0x3f8   :  { %3487 = vmatpush.bf16.msra.mxu2 %v5926_v39 }
 0x3f9   :  { %v2767_v52 = vmax.f32 %v2765_v31, %v2766_v50  ;;  %v2614_v16 = vadd.f32 %v7111_v37, %v2419_v40  ;;  %v5933_v37 = vld [vmem:[%s7592_s3 + $0x118] sm:$0xff]  ;;  %v3424_v50 = vld [vmem:[#allocation5 + $0x15] sm:$0xff] }
 0x3fa   :  { %3578 = vmatpush.bf16.msra.mxu3 %v5933_v37  ;;  %v3423_v40 = vld [vmem:[#allocation5 + $0xd] sm:$0xff] }
 0x3fb   :  { %2768 = vst.msk [vmem:[#allocation5 + $0x37] sm:$0xf] %vm69_vm2, %v2767_v52  ;;  %v2638_v0 = vadd.f32 %v6897_v49, %v2614_v16  ;;  %v3431_v52 = vpack.c.bf16 %v3424_v50, %v3423_v40  ;;  %v3426_v16 = vld [vmem:[#allocation5 + $0x25] sm:$0xff] }
 0x3fc   :  { %v2199_v28 = vpop.f32.mrf.mxu2 }
 0x3fd   :  { %v2394_v58 = vpop.f32.mrf.mxu3  ;;  %v2661_v26 = vmax.f32 %v2638_v0, 0.0  ;;  %v2225_v41 = vadd.f32 %v2199_v28, %v2030_v56 }
 0x3fe   :  { %v2770_v2 = vld [vmem:[#allocation4 + $0xa0] ss:$2 sm:$0xf]  ;;  %v2772_v48 = vld [vmem:[#allocation4 + $0xa1] ss:$2 sm:$0xf] }
 0x3ff   :  { %2684 = vst.msk [vmem:[#allocation4 + $0xa8] sm:$0xff] %vm25_vm1, %v2661_v26  ;;  %v2420_v61 = vadd.f32 %v2394_v58, %v2225_v41  ;;  %v2777_v44 = vmax.f32 %v2770_v2, %v2772_v48  ;;  %v5923_v26 = vld [vmem:[%s7592_s3 + $0xc8] sm:$0xff] }
 0x400   :  { %v3330_v2 = vld [vmem:[#allocation5 + $0x14] sm:$0xff] }
 0x401   :  { %v2615_v57 = vadd.f32 %v2589_v6, %v2420_v61  ;;  %v5932_v6 = vld [vmem:[%s7592_s3 + $0x110] sm:$0xff] }
 0x402   :  { %v2808_v32 = vld [vmem:[#allocation5 + $0x31] sm:$0xff]  ;;  %v2809_v29 = vld [vmem:[#allocation5 + $0x39] sm:$0xf]  ;;  %3579 = vmatpush.bf16.msra.mxu3 %v5932_v6  ;;  %v2957_v6 = vld [vmem:[#allocation5 + $0x22] sm:$0xff] }
 0x403   :  { %v7161_v34 = vld [vmem:[#allocation5 + $0x30] sm:$0xff]  ;;  %v2639_v7 = vadd.f32 %v6897_v49, %v2615_v57  ;;  %v2813_v38 = vpack.c.bf16 %v2809_v29, %v2808_v32  ;;  %v5908_v49 = vld [vmem:[%s7592_s3 + $0x50] sm:$0xff]  ;;  %v2789_v60 = vld [vmem:[#allocation5 + $0x38] sm:$0xf] }
 0x404   :  { %v3245_v22 = vpack.c.bf16 %v7161_v34, %v7159_v20  ;;  %v2201_v13 = vpop.f32.mrf.mxu2  ;;  %3015 = vmatpush.bf16.msra.mxu1 %v5908_v49  ;;  %v2793_v25 = vpack.c.bf16 %v2789_v60, %v7161_v34  ;;  %v2955_v29 = vld [vmem:[#allocation5 + $0x12] sm:$0xff]  ;;  %v2956_v34 = vld [vmem:[#allocation5 + $0x1a] sm:$0xff] }
 0x405   :  { %v2396_v54 = vpop.f32.mrf.mxu3  ;;  %v2662_v10 = vmax.f32 %v2639_v7, 0.0  ;;  %5176 = vmatmul.msk.bf16.gmra.mxu1 %vm25_vm1, %v2813_v38  ;;  %v2962_v7 = vpack.c.bf16 %v2956_v34, %v2955_v29  ;;  %v5922_v38 = vld [vmem:[%s7592_s3 + $0xc0] sm:$0xff] }
 0x406   :  { %5307 = vmatmul.msk.bf16.gmra.mxu0 %vm25_vm1, %v3245_v22  ;;  %3580 = vmatpush.bf16.msra.mxu3 %v5931_v1  ;;  %v2958_v13 = vld [vmem:[#allocation5 + $0x2a] sm:$0xff]  ;;  %v2959_v1 = vld [vmem:[#allocation5 + $0x32] sm:$0xff] }
 0x407   :  { %2685 = vst.msk [vmem:[#allocation4 + $0xb0] sm:$0xf] %vm69_vm2, %v2662_v10  ;;  %v2963_v54 = vpack.c.bf16 %v2958_v13, %v2957_v6  ;;  %v5940_v13 = vld [vmem:[%s7593_s4 + $0x30] sm:$0xff] }
 0x408   :  { %3016 = vmatpush.bf16.msra.mxu1 %v5907_v45 }
 0x40a   :  { %3581 = vmatpush.bf16.msra.mxu3 %v5930_v47  ;;  %v7227_v28 = vpop.f32.mrf.mxu1 }
 0x40c   :  { %3017 = vmatpush.bf16.msra.mxu1 %v5906_v18 }
 0x40e   :  { %v2774_v5 = vld [vmem:[#allocation4 + $0xaa] ss:$2 sm:$0xf]  ;;  %v2776_v59 = vld [vmem:[#allocation4 + $0xab] ss:$2 sm:$0xf] }
 0x40f   :  { %v2778_v46 = vmax.f32 %v2774_v5, %v2776_v59  ;;  %v3329_v5 = vld [vmem:[#allocation5 + $0xc] sm:$0xff] }
 0x410   :  { %v3337_v59 = vpack.c.bf16 %v3330_v2, %v3329_v5 }
 0x411   :  { %v2779_v36 = vmax.f32 %v2777_v44, %v2778_v46  ;;  %v3332_v46 = vld [vmem:[#allocation5 + $0x24] sm:$0xff] }
 0x412   :  { %v7236_v41 = vpop.f32.mrf.mxu1 }
 0x413   :  { %2780 = vst.msk [vmem:[#allocation5 + $0x3d] sm:$0xf] %vm69_vm2, %v2779_v36 }
 0x415   :  { %5193 = vmatmul.msk.bf16.vlgmr.msrb.gmra.mxu1 %vm25_vm1, %v2790_v27  ;;  %v3338_v27 = vpack.c.bf16 %v3332_v46, %v3331_v23 }
 0x416   :  { %3390 = vmatpush.bf16.msrb.mxu1 %v5925_v21 }
 0x41a   :  { %v3053_v9 = vld [vmem:[#allocation5 + $0x36] sm:$0xff]  ;;  %v3054_v35 = vld [vmem:[#allocation5 + $0x3e] sm:$0xf]  ;;  %3391 = vmatpush.bf16.msrb.mxu1 %v5924_v4 }
 0x41b   :  { %v3147_v63 = vld [vmem:[#allocation5 + $0x37] sm:$0xff]  ;;  %v3058_v62 = vpack.c.bf16 %v3054_v35, %v3053_v9  ;;  %v3148_v55 = vld [vmem:[#allocation5 + $0x3f] sm:$0xf]  ;;  %v3527_v58 = vpack.c.bf16 %v3053_v9, %v7130_v11  ;;  %v3524_v11 = vld [vmem:[#allocation5 + $0x46] sm:$0xf] }
 0x41c   :  { %v3241_v15 = vld [vmem:[#allocation5 + $0x38] sm:$0xff]  ;;  %v3242_v17 = vld [vmem:[#allocation5 + $0x40] sm:$0xf]  ;;  %v3152_v33 = vpack.c.bf16 %v3148_v55, %v3147_v63  ;;  %v3333_v63 = vld [vmem:[#allocation5 + $0x2c] sm:$0xff] }
 0x41d   :  { %v3246_v31 = vpack.c.bf16 %v3242_v17, %v3241_v15  ;;  %5252 = vmatmul.msk.bf16.gmra.mxu2 %vm25_vm1, %v3058_v62  ;;  %v3429_v61 = vld [vmem:[#allocation5 + $0x3d] sm:$0xff]  ;;  %v3334_v9 = vld [vmem:[#allocation5 + $0x34] sm:$0xff] }
 0x41e   :  { %5280 = vmatmul.msk.bf16.gmra.mxu3 %vm25_vm1, %v3152_v33  ;;  %3392 = vmatpush.bf16.msrb.mxu1 %v5923_v26  ;;  %v3523_v37 = vld [vmem:[#allocation5 + $0x3e] sm:$0xff]  ;;  %v3434_v57 = vpack.c.bf16 %v3430_v51, %v3429_v61  ;;  %v2960_v49 = vld [vmem:[#allocation5 + $0x3a] sm:$0xf]  ;;  %v3339_v62 = vpack.c.bf16 %v3334_v9, %v3333_v63  ;;  %v5949_v51 = vld [vmem:[%s7593_s4 + $0x78] sm:$0xff] }
 0x41f   :  { %5308 = vmatmul.msk.bf16.gmra.mxu0 %vm25_vm1, %v3246_v31  ;;  %v3528_v20 = vpack.c.bf16 %v3524_v11, %v3523_v37  ;;  %v2964_v39 = vpack.c.bf16 %v2960_v49, %v2959_v1  ;;  %v3335_v33 = vld [vmem:[#allocation5 + $0x3c] sm:$0xff]  ;;  %v3336_v31 = vld [vmem:[#allocation5 + $0x44] sm:$0xf]  ;;  %3896 = vmatpush.bf16.msrb.mxu3 %v5949_v51 }
 0x420   :  { %v3340_v40 = vpack.c.bf16 %v3336_v31, %v3335_v33  ;;  %v5944_v49 = vld [vmem:[%s7593_s4 + $0x50] sm:$0xff] }
 0x422   :  { %3393 = vmatpush.bf16.msrb.mxu1 %v5922_v38 }
 0x425   :  { %5194 = vmatmul.msk.bf16.gmra.mxu1 %vm25_vm1, %v2791_v24  ;;  %v3425_v24 = vld [vmem:[#allocation5 + $0x1d] sm:$0xff] }
 0x426   :  { %v3432_v0 = vpack.c.bf16 %v3426_v16, %v3425_v24 }
 0x428   :  { %v3113_v55 = vpop.f32.mrf.mxu2 }
 0x429   :  { %v3207_v17 = vpop.f32.mrf.mxu3 }
 0x42d   :  { %5361 = vmatmul.msk.bf16.vlgmr.msra.gmra.mxu2 %vm25_vm1, %v3431_v52 }
 0x42e   :  { %5389 = vmatmul.msk.bf16.vlgmr.msra.gmra.mxu3 %vm25_vm1, %v3525_v42  ;;  %v3428_v42 = vld [vmem:[#allocation5 + $0x35] sm:$0xff] }
 0x42f   :  { %v3433_v56 = vpack.c.bf16 %v3428_v42, %v3427_v14 }
 0x430   :  { %v3115_v52 = vpop.f32.mrf.mxu2 }
 0x432   :  { %v7239_v32 = vpop.f32.mrf.mxu1 }
 0x435   :  { %5195 = vmatmul.msk.bf16.gmra.mxu1 %vm25_vm1, %v2792_v30  ;;  %v3209_v30 = vpop.f32.mrf.mxu3 }
 0x439   :  { %v3118_v24 = vpop.f32.mrf.mxu2 }
 0x43a   :  { %v2875_v22 = vpop.f32.mrf.mxu1 }
 0x43b   :  { %v3301_v22 = vpop.f32.mrf.mxu0 }
 0x43d   :  { %5362 = vmatmul.msk.bf16.gmra.mxu2 %vm25_vm1, %v3432_v0  ;;  %v7270_v16 = vpop.f32.mrf.mxu3 }
 0x43e   :  { %5390 = vmatmul.msk.bf16.gmra.mxu3 %vm25_vm1, %v3526_v43  ;;  %v2961_v43 = vpack.c.bf16 %v2954_v3, %v2953_v12  ;;  %v5937_v3 = vld [vmem:[%s7593_s4 + $0x18] sm:$0xff] }
 0x43f   :  { %v5945_v12 = vld [vmem:[%s7593_s4 + $0x58] sm:$0xff] }
 0x440   :  { %3844 = vmatpush.bf16.msrb.mxu2 %v5945_v12  ;;  %v5934_v12 = vld [vmem:[%s7593_s4] sm:$0xff] }
 0x441   :  { %v3120_v60 = vpop.f32.mrf.mxu2 }
 0x444   :  { %3845 = vmatpush.bf16.msrb.mxu2 %v5944_v49 }
 0x445   :  { %5196 = vmatmul.msk.bf16.gmra.mxu1 %vm25_vm1, %v2793_v25  ;;  %v3214_v25 = vpop.f32.mrf.mxu3 }
 0x44d   :  { %5363 = vmatmul.msk.bf16.gmra.mxu2 %vm25_vm1, %v3433_v56 }
 0x44e   :  { %5391 = vmatmul.msk.bf16.gmra.mxu3 %vm25_vm1, %v3527_v58  ;;  %v5941_v58 = vld [vmem:[%s7593_s4 + $0x38] sm:$0xff] }
 0x44f   :  { %3753 = vmatpush.bf16.msra.mxu0 %v5941_v58 }
 0x453   :  { %3754 = vmatpush.bf16.msra.mxu0 %v5940_v13 }
 0x455   :  { %5221 = vmatmul.msk.bf16.vlgmr.msra.gmra.mxu1 %vm25_vm1, %v2961_v43 }
 0x456   :  { %3793 = vmatpush.bf16.msra.mxu1 %v5937_v3 }
 0x45a   :  { %v7246_v19 = vpop.f32.mrf.mxu1 }
 0x45d   :  { %5364 = vmatmul.msk.bf16.gmra.mxu2 %vm25_vm1, %v3434_v57 }
 0x45e   :  { %5392 = vmatmul.msk.bf16.gmra.mxu3 %vm25_vm1, %v3528_v20 }
 0x462   :  { %v7249_v10 = vpop.f32.mrf.mxu1 }
 0x465   :  { %5222 = vmatmul.msk.bf16.gmra.mxu1 %vm25_vm1, %v2962_v7 }
 0x475   :  { %5223 = vmatmul.msk.bf16.gmra.mxu1 %vm25_vm1, %v2963_v54  ;;  %v5936_v54 = vld [vmem:[%s7593_s4 + $0x10] sm:$0xff] }
 0x476   :  { %3794 = vmatpush.bf16.msra.mxu1 %v5936_v54 }
 0x478   :  { %v7272_v42 = vpop.f32.mrf.mxu2 }
 0x479   :  { %v7274_v14 = vpop.f32.mrf.mxu3 }
 0x480   :  { %v7285_v43 = vpop.f32.mrf.mxu2 }
 0x481   :  { %v7287_v61 = vpop.f32.mrf.mxu3 }
 0x482   :  { %v2883_v8 = vpop.f32.mrf.mxu1 }
 0x485   :  { %5224 = vmatmul.msk.bf16.gmra.mxu1 %vm25_vm1, %v2964_v39 }
 0x48a   :  { %v7252_v47 = vpop.f32.mrf.mxu1 }
 0x492   :  { %v2933_v48 = vpop.f32.mrf.mxu1 }
 0x493   :  { %v2934_v38 = vadd.f32 %v2933_v48, %v7227_v28 }
 0x495   :  { %5333 = vmatmul.msk.bf16.vlgmr.msrb.gmra.mxu1 %vm25_vm1, %v3337_v59  ;;  %v3303_v59 = vpop.f32.mrf.mxu0 }
 0x49a   :  { %v7255_v44 = vpop.f32.mrf.mxu1 }
 0x49b   :  { %v2936_v2 = vadd.f32 %v7255_v44, %v7236_v41  ;;  %v7328_v41 = vld [vmem:[%s7594_s5 + $0x2] ss:$0 sm:$0xff] }
 0x4a0   :  { %v7292_v37 = vpop.f32.mrf.mxu2 }
 0x4a1   :  { %v7296_v57 = vpop.f32.mrf.mxu3 }
 0x4a2   :  { %v7257_v36 = vpop.f32.mrf.mxu1 }
 0x4a5   :  { %5334 = vmatmul.msk.bf16.gmra.mxu1 %vm25_vm1, %v3338_v27 }
 0x4a8   :  { %v7300_v29 = vpop.f32.mrf.mxu2 }
 0x4a9   :  { %v7302_v34 = vpop.f32.mrf.mxu3 }
 0x4aa   :  { %v2940_v45 = vpop.f32.mrf.mxu1 }
 0x4ab   :  { %v5948_v45 = vld [vmem:[%s7593_s4 + $0x70] sm:$0xff] }
 0x4ac   :  { %3897 = vmatpush.bf16.msrb.mxu3 %v5948_v45  ;;  %v5955_v45 = vld [vmem:[%s7593_s4 + $0xa8] sm:$0xff] }
 0x4b1   :  { %v3583_v1 = vpop.f32.mrf.mxu3 }
 0x4b2   :  { %v7260_v35 = vpop.f32.mrf.mxu1 }
 0x4b5   :  { %5335 = vmatmul.msk.bf16.gmra.mxu1 %vm25_vm1, %v3339_v62  ;;  %v2939_v62 = vadd.f32 %v7257_v36, %v7239_v32  ;;  %v3306_v32 = vpop.f32.mrf.mxu0 }
 0x4b9   :  { %v3585_v9 = vpop.f32.mrf.mxu3 }
 0x4ba   :  { %v7263_v15 = vpop.f32.mrf.mxu1 }
 0x4c1   :  { %v3588_v3 = vpop.f32.mrf.mxu3 }
 0x4c2   :  { %v2948_v18 = vpop.f32.mrf.mxu1 }
 0x4c3   :  { %v7265_v50 = vadd.f32 %v2948_v18, %v2883_v8  ;;  %v3489_v8 = vpop.f32.mrf.mxu2  ;;  %v5939_v18 = vld [vmem:[%s7593_s4 + $0x28] sm:$0xff] }
 0x4c4   :  { %3755 = vmatpush.bf16.msra.mxu0 %v5939_v18 }
 0x4c5   :  { %5336 = vmatmul.msk.bf16.gmra.mxu1 %vm25_vm1, %v3340_v40  ;;  %v5935_v40 = vld [vmem:[%s7593_s4 + $0x8] sm:$0xff] }
 0x4c6   :  { %3795 = vmatpush.bf16.msra.mxu1 %v5935_v40 }
 0x4ca   :  { %v7268_v21 = vpop.f32.mrf.mxu1  ;;  %3796 = vmatpush.bf16.msra.mxu1 %v5934_v12 }
 0x4cb   :  { %v3491_v46 = vpop.f32.mrf.mxu2 }
 0x4d2   :  { %v3019_v0 = vpop.f32.mrf.mxu1 }
 0x4d3   :  { %v3039_v6 = vadd.f32 %v3019_v0, %v2934_v38  ;;  %v3494_v60 = vpop.f32.mrf.mxu2 }
 0x4d5   :  { %v3133_v28 = vadd.f32 %v3113_v55, %v3039_v6  ;;  %v5957_v6 = vld [vmem:[%s7593_s4 + $0xb8] sm:$0xff] }
 0x4d6   :  { %4000 = vmatpush.bf16.msrb.mxu1 %v5957_v6  ;;  %v5958_v6 = vld [vmem:[%s7593_s4 + $0xc0] sm:$0xff] }
 0x4d7   :  { %v3227_v5 = vadd.f32 %v3207_v17, %v3133_v28 }
 0x4d9   :  { %v3321_v27 = vadd.f32 %v3301_v22, %v3227_v5  ;;  %v5953_v22 = vld [vmem:[%s7593_s4 + $0x98] sm:$0xff] }
 0x4da   :  { %v3021_v4 = vpop.f32.mrf.mxu1 }
 0x4db   :  { %v3040_v48 = vadd.f32 %v3021_v4, %v2936_v2  ;;  %v5947_v4 = vld [vmem:[%s7593_s4 + $0x68] sm:$0xff]  ;;  %v3496_v2 = vpop.f32.mrf.mxu2 }
 0x4dc   :  { %3898 = vmatpush.bf16.msrb.mxu3 %v5947_v4 }
 0x4dd   :  { %v3134_v23 = vadd.f32 %v3115_v52, %v3040_v48 }
 0x4df   :  { %v3228_v44 = vadd.f32 %v3209_v30, %v3134_v23  ;;  %v5943_v30 = vld [vmem:[%s7593_s4 + $0x48] sm:$0xff] }
 0x4e0   :  { %3846 = vmatpush.bf16.msrb.mxu2 %v5943_v30 }
 0x4e1   :  { %v3322_v0 = vadd.f32 %v3303_v59, %v3228_v44  ;;  %v5942_v59 = vld [vmem:[%s7593_s4 + $0x40] sm:$0xff] }
 0x4e2   :  { %v3024_v56 = vpop.f32.mrf.mxu1 }
 0x4e3   :  { %v3041_v33 = vadd.f32 %v3024_v56, %v2939_v62 }
 0x4e4   :  { %3847 = vmatpush.bf16.msrb.mxu2 %v5942_v59 }
 0x4e5   :  { %v3135_v36 = vadd.f32 %v3118_v24, %v3041_v33  ;;  %v5938_v24 = vld [vmem:[%s7593_s4 + $0x20] sm:$0xff]  ;;  %v2946_v33 = vadd.f32 %v7263_v15, %v7249_v10 }
 0x4e6   :  { %3756 = vmatpush.bf16.msra.mxu0 %v5938_v24  ;;  %v5950_v10 = vld [vmem:[%s7593_s4 + $0x80] sm:$0xff]  ;;  %v5963_v24 = vld [vmem:[%s7593_s4 + $0xe8] sm:$0xff] }
 0x4e7   :  { %v3229_v51 = vadd.f32 %v7270_v16, %v3135_v36  ;;  %v2944_v16 = vadd.f32 %v7260_v35, %v7246_v19  ;;  %v5952_v19 = vld [vmem:[%s7593_s4 + $0x90] sm:$0xff]  ;;  %v3590_v35 = vpop.f32.mrf.mxu3  ;;  %v5954_v15 = vld [vmem:[%s7593_s4 + $0xa0] sm:$0xff] }
 0x4e9   :  { %v3323_v54 = vadd.f32 %v3306_v32, %v3229_v51 }
 0x4ea   :  { %v3026_v26 = vpop.f32.mrf.mxu1  ;;  %3948 = vmatpush.bf16.msrb.mxu0 %v5953_v22 }
 0x4ee   :  { %3949 = vmatpush.bf16.msrb.mxu0 %v5952_v19  ;;  %v5977_v19 = vld [vmem:[%s7593_s4 + $0x38] sm:$0xff] }
 0x4ef   :  { %v3593_v4 = vpop.f32.mrf.mxu3 }
 0x4f2   :  { %v7294_v11 = vpop.f32.mrf.mxu1 }
 0x4f3   :  { %v3043_v48 = vadd.f32 %v7294_v11, %v2944_v16  ;;  %v5956_v11 = vld [vmem:[%s7593_s4 + $0xb0] sm:$0xff] }
 0x4f4   :  { %4001 = vmatpush.bf16.msrb.mxu1 %v5956_v11 }
 0x4f8   :  { %4002 = vmatpush.bf16.msrb.mxu1 %v5955_v45  ;;  %v3595_v45 = vpop.f32.mrf.mxu3 }
 0x4fa   :  { %v7298_v20 = vpop.f32.mrf.mxu1 }
 0x4fb   :  { %v3044_v32 = vadd.f32 %v7298_v20, %v2946_v33  ;;  %v5960_v20 = vld [vmem:[%s7593_s4 + $0xd0] sm:$0xff] }
 0x4fc   :  { %4003 = vmatpush.bf16.msrb.mxu1 %v5954_v15 }
 0x502   :  { %v7304_v7 = vpop.f32.mrf.mxu1 }
 0x50a   :  { %v7316_v39 = vpop.f32.mrf.mxu1 }
 0x512   :  { %v3395_v63 = vpop.f32.mrf.mxu1 }
 0x513   :  { %v3415_v55 = vadd.f32 %v3395_v63, %v3321_v27  ;;  %v5951_v27 = vld [vmem:[%s7593_s4 + $0x88] sm:$0xff]  ;;  %v3137_v63 = vadd.f32 %v7272_v42, %v3043_v48 }
 0x514   :  { %3950 = vmatpush.bf16.msrb.mxu0 %v5951_v27  ;;  %v2951_v27 = vadd.f32 %v7268_v21, %v7252_v47  ;;  %v5976_v47 = vld [vmem:[%s7593_s4 + $0x30] sm:$0xff] }
 0x515   :  { %v3509_v31 = vadd.f32 %v3489_v8, %v3415_v55  ;;  %v3308_v8 = vpop.f32.mrf.mxu0  ;;  %v5965_v55 = vld [vmem:[%s7593_s4 + $0xf8] sm:$0xff] }
 0x517   :  { %v3603_v17 = vadd.f32 %v3583_v1, %v3509_v31 }
 0x518   :  { %3951 = vmatpush.bf16.msrb.mxu0 %v5950_v10 }
 0x519   :  { %v3612_v52 = vadd.f32 %v7328_v41, %v3603_v17 }
 0x51a   :  { %v3397_v25 = vpop.f32.mrf.mxu1 }
 0x51b   :  { %v3620_v56 = vmax.f32 %v3612_v52, 0.0  ;;  %v3416_v58 = vadd.f32 %v3397_v25, %v3322_v0  ;;  %v3499_v25 = vpop.f32.mrf.mxu2 }
 0x51d   :  { %3628 = vst.msk [vmem:[#allocation6] sm:$0xff] %vm25_vm1, %v3620_v56  ;;  %v3510_v26 = vadd.f32 %v3491_v46, %v3416_v58  ;;  %v5946_v46 = vld [vmem:[%s7593_s4 + $0x60] sm:$0xff]  ;;  %v3311_v18 = vpop.f32.mrf.mxu0  ;;  %v3138_v56 = vadd.f32 %v7285_v43, %v3044_v32  ;;  %v3045_v43 = vadd.f32 %v7304_v7, %v7265_v50  ;;  %v5969_v50 = vld [vmem:[%s7593_s4 + $0x118] sm:$0xff] }
 0x51e   :  { %3899 = vmatpush.bf16.msrb.mxu3 %v5946_v46 }
 0x51f   :  { %v3604_v38 = vadd.f32 %v3585_v9, %v3510_v26  ;;  %v5961_v9 = vld [vmem:[%s7593_s4 + $0xd8] sm:$0xff]  ;;  %v3232_v22 = vadd.f32 %v7287_v61, %v3138_v56  ;;  %v3139_v7 = vadd.f32 %v7292_v37, %v3045_v43  ;;  %v5974_v56 = vld [vmem:[%s7593_s4 + $0x20] sm:$0xff] }
 0x520   :  { %4052 = vmatpush.bf16.msra.mxu2 %v5961_v9  ;;  %v5989_v43 = vld [vmem:[%s7593_s4 + $0x98] sm:$0xff] }
 0x521   :  { %v3613_v13 = vadd.f32 %v7328_v41, %v3604_v38 }
 0x522   :  { %v3400_v49 = vpop.f32.mrf.mxu1  ;;  %4104 = vmatpush.bf16.msra.mxu3 %v5965_v55  ;;  %v5968_v55 = vld [vmem:[%s7593_s4 + $0x110] sm:$0xff] }
 0x523   :  { %v3621_v1 = vmax.f32 %v3613_v13, 0.0  ;;  %v3417_v28 = vadd.f32 %v3400_v49, %v3323_v54  ;;  %v5962_v13 = vld [vmem:[%s7593_s4 + $0xe0] sm:$0xff]  ;;  %v3501_v61 = vpop.f32.mrf.mxu2 }
 0x524   :  { %v3636_v31 = vld [vmem:[#allocation6] ss:$2 sm:$0x3]  ;;  %v3638_v44 = vld [vmem:[#allocation6 + $0x1] ss:$2 sm:$0x3]  ;;  %4053 = vmatpush.bf16.msra.mxu2 %v5960_v20  ;;  %v3598_v20 = vpop.f32.mrf.mxu3 }
 0x525   :  { %3629 = vst.msk [vmem:[#allocation6 + $0x8] sm:$0xff] %vm25_vm1, %v3621_v1  ;;  %v3511_v5 = vadd.f32 %v3494_v60, %v3417_v28  ;;  %v3643_v52 = vmax.f32 %v3636_v31, %v3638_v44  ;;  %v3231_v60 = vadd.f32 %v7274_v14, %v3137_v63  ;;  %v5964_v14 = vld [vmem:[%s7593_s4 + $0xf0] sm:$0xff]  ;;  %v3313_v54 = vpop.f32.mrf.mxu0  ;;  %v3233_v31 = vadd.f32 %v7296_v57, %v3139_v7 }
 0x526   :  { %4105 = vmatpush.bf16.msra.mxu3 %v5964_v14 }
 0x527   :  { %v3605_v23 = vadd.f32 %v3588_v3, %v3511_v5  ;;  %v3325_v58 = vadd.f32 %v3311_v18, %v3231_v60  ;;  %v5959_v3 = vld [vmem:[%s7593_s4 + $0xc8] sm:$0xff]  ;;  %v3326_v5 = vadd.f32 %v3313_v54, %v3232_v22 }
 0x528   :  { %4054 = vmatpush.bf16.msra.mxu2 %v5959_v3 }
 0x529   :  { %v3614_v62 = vadd.f32 %v7328_v41, %v3605_v23 }
 0x52a   :  { %v3402_v17 = vpop.f32.mrf.mxu1  ;;  %4106 = vmatpush.bf16.msra.mxu3 %v5963_v24 }
 0x52b   :  { %v3622_v40 = vmax.f32 %v3614_v62, 0.0  ;;  %v3046_v62 = vadd.f32 %v7316_v39, %v2951_v27  ;;  %v5967_v39 = vld [vmem:[%s7593_s4 + $0x108] sm:$0xff] }
 0x52c   :  { %v3640_v36 = vld [vmem:[#allocation6 + $0x6] ss:$2 sm:$0x3]  ;;  %v3642_v42 = vld [vmem:[#allocation6 + $0x7] ss:$2 sm:$0x3]  ;;  %4055 = vmatpush.bf16.msra.mxu2 %v5958_v6 }
 0x52d   :  { %v3644_v0 = vmax.f32 %v3640_v36, %v3642_v42  ;;  %3630 = vst.msk [vmem:[#allocation6 + $0x10] sm:$0xff] %vm25_vm1, %v3622_v40  ;;  %v3648_v12 = vld [vmem:[#allocation6 + $0xc] ss:$2 sm:$0x3]  ;;  %v3316_v21 = vpop.f32.mrf.mxu0  ;;  %v3140_v17 = vadd.f32 %v7300_v29, %v3046_v62  ;;  %v5973_v29 = vld [vmem:[%s7593_s4 + $0x18] sm:$0xff] }
 0x52e   :  { %v3650_v51 = vld [vmem:[#allocation6 + $0xd] ss:$2 sm:$0x3]  ;;  %4107 = vmatpush.bf16.msra.mxu3 %v5962_v13  ;;  %v3327_v40 = vadd.f32 %v3316_v21, %v3233_v31 }
 0x52f   :  { %v3645_v30 = vmax.f32 %v3643_v52, %v3644_v0  ;;  %v3655_v1 = vmax.f32 %v3648_v12, %v3650_v51  ;;  %v5975_v42 = vld [vmem:[%s7593_s4 + $0x28] sm:$0xff]  ;;  %v3504_v52 = vpop.f32.mrf.mxu2 }
 0x530   :  { %v5983_v62 = vld [vmem:[%s7593_s4 + $0x68] sm:$0xff] }
 0x531   :  { %3646 = vst.msk [vmem:[#allocation7 + $0x5] sm:$0x3] %vm52_vm4, %v3645_v30  ;;  %v3234_v30 = vadd.f32 %v7302_v34, %v3140_v17  ;;  %v5980_v34 = vld [vmem:[%s7593_s4 + $0x50] sm:$0xff]  ;;  %v5986_v17 = vld [vmem:[%s7593_s4 + $0x80] sm:$0xff] }
 0x532   :  { %v3405_v26 = vpop.f32.mrf.mxu1 }
 0x533   :  { %v3419_v38 = vadd.f32 %v3405_v26, %v3325_v58  ;;  %v5972_v58 = vld [vmem:[%s7593_s4 + $0x10] sm:$0xff] }
 0x534   :  { %v3652_v49 = vld [vmem:[#allocation6 + $0x12] ss:$2 sm:$0x3]  ;;  %v3654_v8 = vld [vmem:[#allocation6 + $0x13] ss:$2 sm:$0x3] }
 0x535   :  { %v3513_v16 = vadd.f32 %v3499_v25, %v3419_v38  ;;  %v3656_v28 = vmax.f32 %v3652_v49, %v3654_v8  ;;  %v5981_v25 = vld [vmem:[%s7593_s4 + $0x58] sm:$0xff]  ;;  %v3318_v12 = vpop.f32.mrf.mxu0 }
 0x536   :  { %v3328_v51 = vadd.f32 %v3318_v12, %v3234_v30  ;;  %v5985_v38 = vld [vmem:[%s7593_s4 + $0x78] sm:$0xff]  ;;  %v6003_v12 = vld [vmem:[%s7593_s4 + $0x108] sm:$0xff] }
 0x537   :  { %v3607_v2 = vadd.f32 %v3593_v4, %v3513_v16  ;;  %v3657_v48 = vmax.f32 %v3655_v1, %v3656_v28  ;;  %v5966_v4 = vld [vmem:[%s7593_s4 + $0x100] sm:$0xff]  ;;  %v5971_v16 = vld [vmem:[%s7593_s4 + $0x8] sm:$0xff]  ;;  %v3506_v7 = vpop.f32.mrf.mxu2 }
 0x538   :  { %v3711_v59 = vld [vmem:[#allocation7 + $0x1] sm:$0xff] }
 0x539   :  { %v3701_v46 = vld [vmem:[#allocation7] sm:$0xff]  ;;  %v3616_v35 = vadd.f32 %v7328_v41, %v3607_v2  ;;  %v3712_v11 = vpack.c.bf16 %v3711_v59, %v3711_v59  ;;  %3658 = vst.msk [vmem:[#allocation7 + $0x9] sm:$0x3] %vm52_vm4, %v3657_v48  ;;  %v5979_v1 = vld [vmem:[%s7593_s4 + $0x48] sm:$0xff] }
 0x53a   :  { %v3702_v23 = vpack.c.bf16 %v3701_v46, %v3701_v46  ;;  %v3407_v37 = vpop.f32.mrf.mxu1 }
 0x53b   :  { %v3624_v9 = vmax.f32 %v3616_v35, 0.0  ;;  %v3420_v63 = vadd.f32 %v3407_v37, %v3326_v5  ;;  %5418 = vmatmul.msk.bf16.vlgmr.msra.gmra.mxu0 %vm25_vm1, %v3712_v11  ;;  %v3600_v35 = vpop.f32.mrf.mxu3  ;;  %v5970_v11 = vld [vmem:[%s7593_s4] sm:$0xff] }
 0x53c   :  { %5435 = vmatmul.msk.bf16.vlgmr.msra.gmra.mxu1 %vm25_vm1, %v3702_v23  ;;  %4156 = vmatpush.bf16.msra.mxu0 %v5969_v50  ;;  %v5984_v50 = vld [vmem:[%s7593_s4 + $0x70] sm:$0xff]  ;;  %v5978_v23 = vld [vmem:[%s7593_s4 + $0x40] sm:$0xff] }
 0x53d   :  { %4231 = vmatpush.bf16.msra.mxu1 %v5977_v19  ;;  %3632 = vst.msk [vmem:[#allocation6 + $0x20] sm:$0xff] %vm25_vm1, %v3624_v9  ;;  %v3514_v33 = vadd.f32 %v3501_v61, %v3420_v63  ;;  %v5988_v61 = vld [vmem:[%s7593_s4 + $0x90] sm:$0xff] }
 0x53f   :  { %v3608_v44 = vadd.f32 %v3595_v45, %v3514_v33  ;;  %v5993_v33 = vld [vmem:[%s7593_s4 + $0xb8] sm:$0xff] }
 0x540   :  { %4157 = vmatpush.bf16.msra.mxu0 %v5968_v55  ;;  %v3802_v32 = vld [vmem:[#allocation7 + $0x2] sm:$0xff] }
 0x541   :  { %4232 = vmatpush.bf16.msra.mxu1 %v5976_v47  ;;  %v3617_v18 = vadd.f32 %v7328_v41, %v3608_v44  ;;  %v3854_v36 = vld [vmem:[#allocation7 + $0x4] sm:$0xff]  ;;  %v3803_v0 = vpack.c.bf16 %v3802_v32, %v3802_v32 }
 0x542   :  { %v3410_v57 = vpop.f32.mrf.mxu1  ;;  %v3855_v60 = vpack.c.bf16 %v3854_v36, %v3854_v36  ;;  %v3906_v3 = vld [vmem:[#allocation7 + $0x5] sm:$0xff]  ;;  %v6001_v36 = vld [vmem:[%s7593_s4 + $0xf8] sm:$0xff] }
 0x543   :  { %v3625_v10 = vmax.f32 %v3617_v18, 0.0  ;;  %v3421_v15 = vadd.f32 %v3410_v57, %v3327_v40  ;;  %5460 = vmatmul.msk.bf16.vlgmr.msrb.gmra.mxu2 %vm25_vm1, %v3803_v0  ;;  %v3958_v24 = vld [vmem:[#allocation7 + $0x6] sm:$0xff]  ;;  %v3907_v13 = vpack.c.bf16 %v3906_v3, %v3906_v3  ;;  %v5992_v18 = vld [vmem:[%s7593_s4 + $0xb0] sm:$0xff] }
 0x544   :  { %5485 = vmatmul.msk.bf16.vlgmr.msrb.gmra.mxu3 %vm25_vm1, %v3855_v60  ;;  %4158 = vmatpush.bf16.msra.mxu0 %v5967_v39  ;;  %v3660_v22 = vld [vmem:[#allocation6 + $0x24] ss:$2 sm:$0x3]  ;;  %v3959_v54 = vpack.c.bf16 %v3958_v24, %v3958_v24  ;;  %v3662_v49 = vld [vmem:[#allocation6 + $0x25] ss:$2 sm:$0x3] }
 0x545   :  { %3633 = vst.msk [vmem:[#allocation6 + $0x28] sm:$0xff] %vm25_vm1, %v3625_v10  ;;  %v3515_v14 = vadd.f32 %v3504_v52, %v3421_v15  ;;  %4233 = vmatpush.bf16.msra.mxu1 %v5975_v42  ;;  %4271 = vmatpush.bf16.msrb.mxu2 %v5973_v29  ;;  %v3667_v59 = vmax.f32 %v3660_v22, %v3662_v49  ;;  %v4010_v37 = vld [vmem:[#allocation7 + $0x8] sm:$0xff]  ;;  %v5982_v44 = vld [vmem:[%s7593_s4 + $0x60] sm:$0xff]  ;;  %v5996_v40 = vld [vmem:[%s7593_s4 + $0xd0] sm:$0xff] }
 0x546   :  { %4321 = vmatpush.bf16.msrb.mxu3 %v5981_v25  ;;  %v4062_v9 = vld [vmem:[#allocation7 + $0x9] sm:$0xff]  ;;  %v4011_v47 = vpack.c.bf16 %v4010_v37, %v4010_v37  ;;  %v6005_v42 = vld [vmem:[%s7593_s4 + $0x118] sm:$0xff] }
 0x547   :  { %v3609_v26 = vadd.f32 %v3598_v20, %v3515_v14  ;;  %v5987_v55 = vld [vmem:[%s7593_s4 + $0x88] sm:$0xff]  ;;  %v4063_v21 = vpack.c.bf16 %v4062_v9, %v4062_v9  ;;  %v6000_v10 = vld [vmem:[%s7593_s4 + $0xf0] sm:$0xff] }
 0x548   :  { %4159 = vmatpush.bf16.msra.mxu0 %v5966_v4  ;;  %v4114_v39 = vld [vmem:[#allocation7 + $0xa] sm:$0xff] }
 0x549   :  { %v3618_v6 = vadd.f32 %v7328_v41, %v3609_v26  ;;  %4234 = vmatpush.bf16.msra.mxu1 %v5974_v56  ;;  %4272 = vmatpush.bf16.msrb.mxu2 %v5972_v58  ;;  %v4115_v57 = vpack.c.bf16 %v4114_v39, %v4114_v39  ;;  %v5991_v29 = vld [vmem:[%s7593_s4 + $0xa8] sm:$0xff]  ;;  %v6004_v15 = vld [vmem:[%s7593_s4 + $0x110] sm:$0xff]  ;;  %v5990_v56 = vld [vmem:[%s7593_s4 + $0xa0] sm:$0xff] }
 0x54a   :  { %v3412_v8 = vpop.f32.mrf.mxu1  ;;  %4322 = vmatpush.bf16.msrb.mxu3 %v5980_v34  ;;  %v5995_v25 = vld [vmem:[%s7593_s4 + $0xc8] sm:$0xff]  ;;  %v5994_v58 = vld [vmem:[%s7593_s4 + $0xc0] sm:$0xff] }
 0x54b   :  { %v3626_v28 = vmax.f32 %v3618_v6, 0.0  ;;  %v3422_v2 = vadd.f32 %v3412_v8, %v3328_v51  ;;  %5510 = vmatmul.msk.bf16.vlgmr.msrb.gmra.mxu0 %vm25_vm1, %v3907_v13  ;;  %v5999_v34 = vld [vmem:[%s7593_s4 + $0xe8] sm:$0xff]  ;;  %v5998_v51 = vld [vmem:[%s7593_s4 + $0xe0] sm:$0xff] }
 0x54c   :  { %5535 = vmatmul.msk.bf16.vlgmr.msrb.gmra.mxu1 %vm25_vm1, %v3959_v54  ;;  %v3664_v48 = vld [vmem:[#allocation6 + $0x2a] ss:$2 sm:$0x3]  ;;  %v3666_v5 = vld [vmem:[#allocation6 + $0x2b] ss:$2 sm:$0x3]  ;;  %4372 = vmatpush.bf16.msrb.mxu0 %v5985_v38 }
 0x54d   :  { %4423 = vmatpush.bf16.msrb.mxu1 %v5989_v43  ;;  %v3668_v46 = vmax.f32 %v3664_v48, %v3666_v5  ;;  %3634 = vst.msk [vmem:[#allocation6 + $0x30] sm:$0xff] %vm25_vm1, %v3626_v28  ;;  %v3516_v19 = vadd.f32 %v3506_v7, %v3422_v2  ;;  %4273 = vmatpush.bf16.msrb.mxu2 %v5971_v16  ;;  %v6002_v38 = vld [vmem:[%s7593_s4 + $0x100] sm:$0xff] }
 0x54e   :  { %4323 = vmatpush.bf16.msrb.mxu3 %v5979_v1 }
 0x54f   :  { %v3669_v27 = vmax.f32 %v3667_v59, %v3668_v46  ;;  %v3610_v45 = vadd.f32 %v3600_v35, %v3516_v19 }
 0x550   :  { %4373 = vmatpush.bf16.msrb.mxu0 %v5984_v50 }
 0x551   :  { %4424 = vmatpush.bf16.msrb.mxu1 %v5988_v61  ;;  %3670 = vst.msk [vmem:[#allocation7 + $0x15] sm:$0x3] %vm52_vm4, %v3669_v27  ;;  %v3619_v63 = vadd.f32 %v7328_v41, %v3610_v45  ;;  %4274 = vmatpush.bf16.msrb.mxu2 %v5970_v11  ;;  %v5997_v41 = vld [vmem:[%s7593_s4 + $0xd8] sm:$0xff] }
 0x552   :  { %4324 = vmatpush.bf16.msrb.mxu3 %v5978_v23 }
 0x553   :  { %v3627_v31 = vmax.f32 %v3619_v63, 0.0  ;;  %5560 = vmatmul.msk.bf16.vlgmr.msra.gmra.mxu2 %vm25_vm1, %v4011_v47  ;;  %v3683_v47 = vlaneseq }
 0x554   :  { %5585 = vmatmul.msk.bf16.vlgmr.msra.gmra.mxu3 %vm25_vm1, %v4063_v21  ;;  %4374 = vmatpush.bf16.msrb.mxu0 %v5983_v62  ;;  %v3672_v52 = vld [vmem:[#allocation6 + $0x30] ss:$2 sm:$0x3]  ;;  %v3674_v60 = vld [vmem:[#allocation6 + $0x31] ss:$2 sm:$0x3] }
 0x555   :  { %3635 = vst.msk [vmem:[#allocation6 + $0x38] sm:$0xf] %vm69_vm2, %v3627_v31  ;;  %4425 = vmatpush.bf16.msrb.mxu1 %v5987_v55  ;;  %4474 = vmatpush.bf16.msra.mxu2 %v5993_v33  ;;  %v3679_v14 = vmax.f32 %v3672_v52, %v3674_v60  ;;  %v3684_v33 = vshrl.u32 %v3683_v47, 7 }
 0x556   :  { %4525 = vmatpush.bf16.msra.mxu3 %v5997_v41 }
 0x557   :  { %v3689_v39 = vand.u32 3, %v3684_v33 }
 0x558   :  { %v4190_v32 = vld [vmem:[#allocation7 + $0x11] sm:$0xff]  ;;  %4375 = vmatpush.bf16.msrb.mxu0 %v5982_v44 }
 0x559   :  { %v4191_v0 = vpack.c.bf16 %v4190_v32, %v4190_v32  ;;  %4426 = vmatpush.bf16.msrb.mxu1 %v5986_v17  ;;  %4475 = vmatpush.bf16.msra.mxu2 %v5992_v18  ;;  %v4180_v24 = vld [vmem:[#allocation7 + $0x10] sm:$0xff]  ;;  %vm3697_vm5 = vcmp.lt.s32.totalorder %v3689_v39, 2 }
 0x55a   :  { %4526 = vmatpush.bf16.msra.mxu3 %v5996_v40  ;;  %v4181_v26 = vpack.c.bf16 %v4180_v24, %v4180_v24 }
 0x55b   :  { %5610 = vmatmul.msk.bf16.vlgmr.msra.gmra.mxu0 %vm25_vm1, %v4115_v57  ;;  %v5393_v57 = vsel %vm3697_vm5, 1.0, %v7619_v53 }
 0x55c   :  { %5635 = vmatmul.msk.bf16.vlgmr.msra.gmra.mxu1 %vm25_vm1, %v4191_v0  ;;  %v3676_v20 = vld [vmem:[#allocation6 + $0x36] ss:$2 sm:$0x3]  ;;  %v3678_v30 = vld [vmem:[#allocation6 + $0x37] ss:$2 sm:$0x3]  ;;  %4576 = vmatpush.bf16.msra.mxu0 %v6001_v36 }
 0x55d   :  { %4627 = vmatpush.bf16.msra.mxu1 %v6005_v42  ;;  %v3680_v4 = vmax.f32 %v3676_v20, %v3678_v30  ;;  %4476 = vmatpush.bf16.msra.mxu2 %v5991_v29  ;;  %v6011_v36 = vld [vmem:[%s7594_s5 + $0x3] ss:$0 sm:$0xff]  ;;  %s6040_s5 = smov [#allocation8]  }
 0x55e   :  { %4527 = vmatpush.bf16.msra.mxu3 %v5995_v25  ;;  %s4654_s12 = sshll.u32 %s6040_s5, 4  ;;  %s4655_s12 = int_to_ptr.vmem [resolvable:$true] %s4654_s12 }
 0x55f   :  { %v3681_v3 = vmax.f32 %v3679_v14, %v3680_v4 }
 0x560   :  { %4577 = vmatpush.bf16.msra.mxu0 %v6000_v10 }
 0x561   :  { %4628 = vmatpush.bf16.msra.mxu1 %v6004_v15  ;;  %3682 = vst.msk [vmem:[#allocation7 + $0x19] sm:$0x3] %vm52_vm4, %v3681_v3  ;;  %4477 = vmatpush.bf16.msra.mxu2 %v5990_v56 }
 0x562   :  { %4528 = vmatpush.bf16.msra.mxu3 %v5994_v58 }
 0x563   :  { %5652 = vmatmul.msk.bf16.vlgmr.msrb.gmra.mxu2 %vm25_vm1, %v4181_v26 }
 0x564   :  { %4578 = vmatpush.bf16.msra.mxu0 %v5999_v34 }
 0x565   :  { %4629 = vmatpush.bf16.msra.mxu1 %v6003_v12 }
 0x568   :  { %v4280_v43 = vld [vmem:[#allocation7 + $0x12] sm:$0xff]  ;;  %4579 = vmatpush.bf16.msra.mxu0 %v5998_v51  ;;  %v4586_v2 = vld [vmem:[#allocation7 + $0x1a] sm:$0xff] }
 0x569   :  { %v4331_v22 = vld [vmem:[#allocation7 + $0x14] sm:$0xff]  ;;  %v4281_v13 = vpack.c.bf16 %v4280_v43, %v4280_v43  ;;  %4630 = vmatpush.bf16.msra.mxu1 %v6002_v38  ;;  %v4587_v7 = vpack.c.bf16 %v4586_v2, %v4586_v2 }
 0x56a   :  { %v4382_v6 = vld [vmem:[#allocation7 + $0x15] sm:$0xff]  ;;  %v4332_v54 = vpack.c.bf16 %v4331_v22, %v4331_v22 }
 0x56b   :  { %v4383_v49 = vpack.c.bf16 %v4382_v6, %v4382_v6  ;;  %5677 = vmatmul.msk.bf16.vlgmr.msrb.gmra.mxu3 %vm25_vm1, %v4281_v13  ;;  %v4433_v8 = vld [vmem:[#allocation7 + $0x16] sm:$0xff] }
 0x56c   :  { %5702 = vmatmul.msk.bf16.vlgmr.msrb.gmra.mxu0 %vm25_vm1, %v4332_v54  ;;  %v4434_v16 = vpack.c.bf16 %v4433_v8, %v4433_v8  ;;  %v4484_v1 = vld [vmem:[#allocation7 + $0x18] sm:$0xff] }
 0x56d   :  { %5727 = vmatmul.msk.bf16.vlgmr.msrb.gmra.mxu1 %vm25_vm1, %v4383_v49  ;;  %v4535_v28 = vld [vmem:[#allocation7 + $0x19] sm:$0xff]  ;;  %v4485_v50 = vpack.c.bf16 %v4484_v1, %v4484_v1 }
 0x56e   :  { %v4536_v61 = vpack.c.bf16 %v4535_v28, %v4535_v28 }
 0x573   :  { %5752 = vmatmul.msk.bf16.vlgmr.msra.gmra.mxu2 %vm25_vm1, %v4434_v16 }
 0x57b   :  { %5777 = vmatmul.msk.bf16.vlgmr.msra.gmra.mxu3 %vm25_vm1, %v4485_v50 }
 0x57c   :  { %5802 = vmatmul.msk.bf16.vlgmr.msra.gmra.mxu0 %vm25_vm1, %v4536_v61 }
 0x57d   :  { %5827 = vmatmul.msk.bf16.vlgmr.msra.gmra.mxu1 %vm25_vm1, %v4587_v7 }
 0x5b8   :  { %v3758_v48 = vpop.f32.mrf.mxu0 }
 0x5b9   :  { %v3798_v5 = vpop.f32.mrf.mxu1 }
 0x5ba   :  { %v3799_v11 = vadd.f32 %v3798_v5, %v3758_v48 }
 0x5c0   :  { %v3760_v59 = vpop.f32.mrf.mxu0 }
 0x5c1   :  { %v3800_v46 = vpop.f32.mrf.mxu1 }
 0x5c6   :  { %v3849_v19 = vpop.f32.mrf.mxu2 }
 0x5c7   :  { %v3901_v35 = vpop.f32.mrf.mxu3  ;;  %v3853_v45 = vadd.f32 %v3849_v19, %v3799_v11 }
 0x5c8   :  { %v3953_v23 = vpop.f32.mrf.mxu0 }
 0x5c9   :  { %v4005_v27 = vpop.f32.mrf.mxu1  ;;  %v3905_v37 = vadd.f32 %v3901_v35, %v3853_v45 }
 0x5cb   :  { %v3957_v21 = vadd.f32 %v3953_v23, %v3905_v37 }
 0x5cd   :  { %v4009_v41 = vadd.f32 %v4005_v27, %v3957_v21 }
 0x5ce   :  { %v3851_v9 = vpop.f32.mrf.mxu2 }
 0x5cf   :  { %v3903_v63 = vpop.f32.mrf.mxu3 }
 0x5d0   :  { %v3955_v62 = vpop.f32.mrf.mxu0 }
 0x5d1   :  { %v4007_v55 = vpop.f32.mrf.mxu1 }
 0x5d6   :  { %v4057_v31 = vpop.f32.mrf.mxu2 }
 0x5d7   :  { %v4109_v44 = vpop.f32.mrf.mxu3  ;;  %v4061_v17 = vadd.f32 %v4057_v31, %v4009_v41 }
 0x5d8   :  { %v4161_v18 = vpop.f32.mrf.mxu0 }
 0x5d9   :  { %v4236_v40 = vpop.f32.mrf.mxu1  ;;  %v4113_v32 = vadd.f32 %v4109_v44, %v4061_v17 }
 0x5db   :  { %v4165_v42 = vadd.f32 %v4161_v18, %v4113_v32 }
 0x5dd   :  { %v4167_v52 = vadd.f32 %v6011_v36, %v4165_v42 }
 0x5de   :  { %v4059_v0 = vpop.f32.mrf.mxu2 }
 0x5df   :  { %v4111_v60 = vpop.f32.mrf.mxu3  ;;  %v4168_v29 = vmax.f32 %v4167_v52, 0.0 }
 0x5e0   :  { %v4163_v25 = vpop.f32.mrf.mxu0 }
 0x5e1   :  { %v4238_v10 = vpop.f32.mrf.mxu1  ;;  %v4169_v15 = vmul.f32 %v5393_v57, %v4168_v29 }
 0x5e3   :  { %v4170_v20 = vsel %vm25_vm1, %v4169_v15, 0.0 }
 0x5e4   :  { %v4171_v30 = vrot.slane %v4170_v20, 4 }
 0x5e6   :  { %v4172_v14 = vadd.f32 %v4171_v30, %v4170_v20  ;;  %v4276_v4 = vpop.f32.mrf.mxu2 }
 0x5e7   :  { %v4277_v38 = vadd.f32 %v4276_v4, %v4236_v40 }
 0x5e8   :  { %v4173_v58 = vrot.slane %v4172_v14, 2 }
 0x5e9   :  { %v4377_v56 = vpop.f32.mrf.mxu0 }
 0x5ea   :  { %v4428_v3 = vpop.f32.mrf.mxu1  ;;  %v4174_v24 = vadd.f32 %v4173_v58, %v4172_v14 }
 0x5ec   :  { %v4175_v34 = vrot.slane %v4174_v24, 1 }
 0x5ee   :  { %v4326_v12 = vpop.f32.mrf.mxu3  ;;  %v4278_v26 = vpop.f32.mrf.mxu2  ;;  %v4176_v51 = vadd.f32 %v4175_v34, %v4174_v24 }
 0x5ef   :  { %v4330_v6 = vadd.f32 %v4326_v12, %v4277_v38 }
 0x5f0   :  { %v4177_v22 = vmul.f32 0.25, %v4176_v51 }
 0x5f1   :  { %v4379_v53 = vpop.f32.mrf.mxu0  ;;  %v4381_v54 = vadd.f32 %v4377_v56, %v4330_v6 }
 0x5f2   :  { %v4430_v43 = vpop.f32.mrf.mxu1  ;;  %4179 = vst.msk [vmem:[#allocation8] sm:$0x1] %vm4178_vm6, %v4177_v22 }
 0x5f3   :  { %v4432_v1 = vadd.f32 %v4428_v3, %v4381_v54 }
 0x5f6   :  { %v4328_v13 = vpop.f32.mrf.mxu3  ;;  %v4479_v49 = vpop.f32.mrf.mxu2 }
 0x5f7   :  { %v4483_v28 = vadd.f32 %v4479_v49, %v4432_v1 }
 0x5f9   :  { %v4581_v8 = vpop.f32.mrf.mxu0 }
 0x5fa   :  { %v4632_v16 = vpop.f32.mrf.mxu1 }
 0x5fe   :  { %v4530_v2 = vpop.f32.mrf.mxu3  ;;  %v4481_v50 = vpop.f32.mrf.mxu2 }
 0x5ff   :  { %v4534_v61 = vadd.f32 %v4530_v2, %v4483_v28 }
 0x601   :  { %v4583_v7 = vpop.f32.mrf.mxu0  ;;  %v4585_v48 = vadd.f32 %v4581_v8, %v4534_v61 }
 0x602   :  { %v4634_v5 = vpop.f32.mrf.mxu1 }
 0x603   :  { %v4636_v59 = vadd.f32 %v4632_v16, %v4585_v48 }
 0x605   :  { %v4637_v46 = vadd.f32 %v6011_v36, %v4636_v59 }
 0x606   :  { %v4532_v19 = vpop.f32.mrf.mxu3 }
 0x607   :  { %v4638_v35 = vmax.f32 %v4637_v46, 0.0 }
 0x609   :  { %v4639_v11 = vmul.f32 %v5393_v57, %v4638_v35 }
 0x60b   :  { %v4640_v23 = vsel %vm25_vm1, %v4639_v11, 0.0 }
 0x60c   :  { %v4641_v27 = vrot.slane %v4640_v23, 4 }
 0x60e   :  { %v4642_v45 = vadd.f32 %v4641_v27, %v4640_v23 }
 0x610   :  { %v4643_v37 = vrot.slane %v4642_v45, 2 }
 0x612   :  { %v4644_v9 = vadd.f32 %v4643_v37, %v4642_v45 }
 0x614   :  { %v4645_v63 = vrot.slane %v4644_v9, 1 }
 0x616   :  { %v4646_v62 = vadd.f32 %v4645_v63, %v4644_v9 }
 0x618   :  { %v4647_v55 = vmul.f32 0.25, %v4646_v62 }
 0x61a   :  { %4648 = vst.msk [vmem:[#allocation8 + $0x1] sm:$0x1] %vm4178_vm6, %v4647_v55 }
 0x61b   :  { %4659 = dma.vmem_to_hbm [thread:$0]  %s4655_s12, 32, %s4657_s14, [#allocation9]  }
 0x61c   :  { %6037 = dma.done.wait [#allocation9], 32  }
 0x61d   :  { %6038 = vsyncadd [#allocation9], 4294967264 }
 0x61e   :  { %4664 = vsyncpa [#allocation9], 1 }

</bundles_post_ra>
